<compile_context>
chip_gen: v7x
topology: tpu7x:2x2x1
jax: 0.10.0
libtpu: 0.0.40
codegen_flags: <defaults>
</compile_context>

<pallas_src>
import functools

import jax
import jax.numpy as jnp
from jax.experimental import pallas as pl
from jax.experimental.pallas import tpu as pltpu

_EPS = 1e-5
_NEG = -1e9
_ROW_TILE_CAP = 512
_BATCH_TILE_CAP = 16
_TILE_BUDGET = 20 * 1024 * 1024      # target VMEM working set per kernel
_VMEM_LIMIT = 48 * 1024 * 1024       # scoped VMEM limit (fits v5e/v6e/v7x)


# ----------------------------------------------------------------------------
# Probe: can this JAX build single-buffer a BlockSpec via pipeline_mode=Buffered(1)?
# ----------------------------------------------------------------------------
def _probe_buffered_one():
    try:
        def _copy(x_ref, o_ref):
            o_ref[...] = x_ref[...]
        spec = pl.BlockSpec((8, 128), lambda i: (0, 0), pipeline_mode=pl.Buffered(1))
        x = jnp.zeros((16, 128), jnp.float32)
        y = pl.pallas_call(
            _copy,
            out_shape=jax.ShapeDtypeStruct((16, 128), jnp.float32),
            grid=(2,),
            in_specs=[spec],
            out_specs=pl.BlockSpec((8, 128), lambda i: (i, 0)),
        )(x)
        jax.block_until_ready(y)
        return True
    except Exception:
        return False


_BUFFERED_OK = _probe_buffered_one()


def _const_spec(shape):
    """BlockSpec for a grid-invariant operand (weights / biases): single-buffered if possible."""
    index_map = lambda *_: (0,) * len(shape)
    if _BUFFERED_OK:
        return pl.BlockSpec(shape, index_map, pipeline_mode=pl.Buffered(1))
    return pl.BlockSpec(shape, index_map)


def _cparams():
    return pltpu.CompilerParams(dimension_semantics=("parallel",),
                                vmem_limit_bytes=_VMEM_LIMIT)


# ----------------------------------------------------------------------------
# Tiling helpers (budget-derived, sublane-legal)
# ----------------------------------------------------------------------------
def _row_tile(rows, per_row_bytes):
    tm = min(rows, _ROW_TILE_CAP, max(8, _TILE_BUDGET // max(per_row_bytes, 1)))
    if tm >= rows:
        return rows
    return max(8, (tm // 8) * 8)


def _batch_tile(batch, per_batch_bytes):
    cap = min(batch, _BATCH_TILE_CAP, max(1, _TILE_BUDGET // max(per_batch_bytes, 1)))
    if cap >= batch:
        return batch
    for t in range(cap, 7, -1):            # must be a multiple of 8 (sublane rule) dividing batch
        if batch % t == 0 and t % 8 == 0:
            return t
    return batch


# ----------------------------------------------------------------------------
# Kernels
# ----------------------------------------------------------------------------
def _inproj_kernel(x_ref, w_ref, b_ref, s_ref, st_ref, g_ref, be_ref, o_ref, *, inv_cg, eps):
    """Linear (bf16 MXU) + CELU(1) + GroupNorm on a (TM, N) row tile.

    GroupNorm statistics use segment-sum matmuls (one-hot S / S^T) so everything stays in the
    (rows, lanes) layout -- no per-group lane slicing, no concatenation."""
    x = x_ref[...]
    y = jnp.dot(x, w_ref[...], preferred_element_type=jnp.float32) + b_ref[...]
    # CELU(alpha=1): x if x > 0 else exp(x) - 1
    y = jnp.where(y > 0.0, y, jnp.exp(jnp.minimum(y, 0.0)) - 1.0)
    s = s_ref[...]                                                     # (N, G) one-hot
    st = st_ref[...]                                                   # (G, N)
    gsum = jnp.dot(y, s, preferred_element_type=jnp.float32)           # (TM, G)
    gsq = jnp.dot(y * y, s, preferred_element_type=jnp.float32)        # (TM, G)
    mu = gsum * inv_cg
    var = jnp.maximum(gsq * inv_cg - mu * mu, 0.0)
    mu_f = jnp.dot(mu, st, preferred_element_type=jnp.float32)         # (TM, N)
    inv_f = jnp.dot(jax.lax.rsqrt(var + eps), st, preferred_element_type=jnp.float32)
    o_ref[...] = ((y - mu_f) * inv_f * g_ref[...] + be_ref[...]).astype(o_ref.dtype)


def _geo_fuse_kernel(att_ref, geo_ref, wg_ref, bg_ref, wa_ref, wt_ref, bgate_ref, o_ref):
    """geo_transform Linear + sigmoid-gated dual (geo) attention, fused (split gate weights)."""
    att = att_ref[...]
    geo_t = (jnp.dot(geo_ref[...], wg_ref[...], preferred_element_type=jnp.float32)
             + bg_ref[...])
    z = (jnp.dot(att, wa_ref[...], preferred_element_type=jnp.float32)
         + jnp.dot(geo_t.astype(jnp.bfloat16), wt_ref[...], preferred_element_type=jnp.float32)
         + bgate_ref[...])
    gate = jax.nn.sigmoid(z)
    o_ref[...] = (gate * att.astype(jnp.float32) + (1.0 - gate) * geo_t).astype(o_ref.dtype)


def _masked_pool_kernel(x_ref, m_ref, o_ref):
    """Masked mean pool over regions for a (TB, M, D) batch tile -> lane-dense (TB, D)."""
    x = x_ref[...].astype(jnp.float32)
    m = m_ref[...]                                                     # (TB, M, 1)
    num = jnp.sum(x * m, axis=1)                                       # (TB, D)
    den = jnp.maximum(jnp.sum(m, axis=1), 1e-6)
    o_ref[...] = (num / den).astype(o_ref.dtype)


def _scatt_kernel(qv1_ref, kv2_ref, m_ref, wab_ref, bab_ref, wsp_ref, bsp_ref,
                  wch_ref, bch_ref, e_ref, o_ref):
    """Full SCAtt (low-rank bilinear attention) for a TB-batch tile; all heads at once via
    block-diagonal weights, lane-dense (TB, D) output."""
    D = e_ref.shape[1]
    tb, M, _ = kv2_ref.shape

    qv1 = qv1_ref[...]                                                 # (TB, 2D)   bf16
    kv2 = kv2_ref[...]                                                 # (TB, M, 2D) bf16
    q = qv1[:, :D]
    v1 = qv1[:, D:].astype(jnp.float32)
    k = kv2[:, :, :D]
    v2 = kv2[:, :, D:].astype(jnp.float32)
    mask = m_ref[...]                                                  # (TB, M, 1) f32

    # low-rank bilinear joint map: q broadcast over regions, elementwise with k
    attn_map = (q[:, None, :] * k).reshape(tb * M, D)

    # attention_basic: per-head Linear(Dh, mid) + ReLU -> one wide matmul (block-diagonal weight)
    am = jnp.dot(attn_map, wab_ref[...], preferred_element_type=jnp.float32) + bab_ref[...]
    am = jnp.maximum(am, 0.0)                                          # (TB*M, H*mid)
    hm = am.shape[1]
    am3 = am.reshape(tb, M, hm)

    # masked mean pool over regions (denominator clamped against fully-padded rows)
    den = jnp.maximum(jnp.sum(mask, axis=1), 1e-6)                     # (TB, 1)
    am_pool = jnp.sum(am3 * mask, axis=1) / den                        # (TB, H*mid)

    # attention_last: per-head Linear(mid, 1) -> spatial logits (TB, M, H)
    logits = jnp.dot(am.astype(jnp.bfloat16), wsp_ref[...],
                     preferred_element_type=jnp.float32)
    H = logits.shape[1]
    logits = logits.reshape(tb, M, H) + bsp_ref[...]

    # masked softmax over regions; fully-masked rows get exactly-zero attention
    logits = jnp.where(mask > 0.0, logits, _NEG)
    logits = logits - jnp.max(logits, axis=1, keepdims=True)
    p = jnp.exp(logits) * mask
    attn = p / jnp.maximum(jnp.sum(p, axis=1, keepdims=True), 1e-9)    # (TB, M, H)

    # attention_last2: per-head Linear(mid, Dh) on the pooled map -> channel gate (TB, D)
    alpha_ch = jax.nn.sigmoid(
        jnp.dot(am_pool.astype(jnp.bfloat16), wch_ref[...],
                preferred_element_type=jnp.float32) + bch_ref[...])

    # expand per-head attention across its Dh lanes (one-hot matmul) and aggregate value2
    attn_d = jnp.dot(attn.reshape(tb * M, H).astype(jnp.bfloat16), e_ref[...],
                     preferred_element_type=jnp.float32).reshape(tb, M, D)
    agg = jnp.sum(attn_d * v2, axis=1)                                 # (TB, D)

    o_ref[...] = (v1 * alpha_ch * agg).astype(o_ref.dtype)


def _bifeat_kernel(att_ref, gv_ref, wtop_ref, wbot_ref, b_ref, g_ref, be_ref, o_ref, *, eps):
    """bifeat_emb (concat -> Linear -> ReLU) + residual + LayerNorm, fused.
    Concat replaced by split weights: att half as one (TB*M, D) matmul, gv half as one (TB, D)."""
    tb, M, D = att_ref.shape
    att = att_ref[...]
    gv = gv_ref[...]
    y = jnp.dot(att.reshape(tb * M, D), wbot_ref[...],
                preferred_element_type=jnp.float32).reshape(tb, M, D)
    ytop = jnp.dot(gv, wtop_ref[...], preferred_element_type=jnp.float32)      # (TB, D)
    y = jnp.maximum(y + ytop[:, None, :] + b_ref[...], 0.0)
    z = y + att.astype(jnp.float32)
    mu = jnp.mean(z, axis=-1, keepdims=True)
    var = jnp.mean(jnp.square(z - mu), axis=-1, keepdims=True)
    o_ref[...] = ((z - mu) * jax.lax.rsqrt(var + eps) * g_ref[...] + be_ref[...]).astype(o_ref.dtype)


def _linear_ln_kernel(x_ref, w_ref, b_ref, g_ref, be_ref, o_ref, *, eps):
    """Final projection Linear + LayerNorm, fused."""
    y = jnp.dot(x_ref[...], w_ref[...], preferred_element_type=jnp.float32) + b_ref[...]
    mu = jnp.mean(y, axis=-1, keepdims=True)
    var = jnp.mean(jnp.square(y - mu), axis=-1, keepdims=True)
    o_ref[...] = ((y - mu) * jax.lax.rsqrt(var + eps) * g_ref[...] + be_ref[...]).astype(o_ref.dtype)


# ----------------------------------------------------------------------------
# Wrappers
# ----------------------------------------------------------------------------
def fused_inproj(x, w_t, b, seg_s, seg_st, gn_g, gn_b, inv_cg):
    """x:(R,K) bf16 -> (R,N) bf16; row-tiled Linear + CELU + GroupNorm."""
    R, K = x.shape
    N = w_t.shape[1]
    G = seg_s.shape[1]
    per_row = 4 * K + 4 * N + 16 * N          # bf16 io double-buffered + f32 temporaries
    tm = _row_tile(R, per_row)
    return pl.pallas_call(
        functools.partial(_inproj_kernel, inv_cg=inv_cg, eps=_EPS),
        out_shape=jax.ShapeDtypeStruct((R, N), jnp.bfloat16),
        grid=(pl.cdiv(R, tm),),
        in_specs=[
            pl.BlockSpec((tm, K), lambda i: (i, 0)),
            _const_spec((K, N)),
            _const_spec((1, N)),
            _const_spec((N, G)),
            _const_spec((G, N)),
            _const_spec((1, N)),
            _const_spec((1, N)),
        ],
        out_specs=pl.BlockSpec((tm, N), lambda i: (i, 0)),
        compiler_params=_cparams(),
    )(x, w_t, b, seg_s, seg_st, gn_g, gn_b)


def fused_geo_attention(att2d, geo2d, gp):
    R, D = att2d.shape
    G = geo2d.shape[1]
    per_row = 4 * (D + G) + 16 * D
    tm = _row_tile(R, per_row)
    return pl.pallas_call(
        _geo_fuse_kernel,
        out_shape=jax.ShapeDtypeStruct((R, D), jnp.bfloat16),
        grid=(pl.cdiv(R, tm),),
        in_specs=[
            pl.BlockSpec((tm, D), lambda i: (i, 0)),
            pl.BlockSpec((tm, G), lambda i: (i, 0)),
            _const_spec((G, D)),
            _const_spec((1, D)),
            _const_spec((D, D)),
            _const_spec((D, D)),
            _const_spec((1, D)),
        ],
        out_specs=pl.BlockSpec((tm, D), lambda i: (i, 0)),
        compiler_params=_cparams(),
    )(att2d, geo2d, gp["geo_w"], gp["geo_b"], gp["gate_wa"], gp["gate_wg"], gp["gate_b"])


def masked_mean_pool(att_feats, mask_col):
    B, M, D = att_feats.shape
    tb = _batch_tile(B, 8 * M * D)
    return pl.pallas_call(
        _masked_pool_kernel,
        out_shape=jax.ShapeDtypeStruct((B, D), jnp.bfloat16),
        grid=(B // tb,),
        in_specs=[
            pl.BlockSpec((tb, M, D), lambda b: (b, 0, 0)),
            pl.BlockSpec((tb, M, 1), lambda b: (b, 0, 0)),
        ],
        out_specs=pl.BlockSpec((tb, D), lambda b: (b, 0)),
        compiler_params=_cparams(),
    )(att_feats, mask_col)


def fused_scatt(qv1, kv2, mask_col, lr):
    """qv1:(B,2D), kv2:(B,M,2D) bf16 (untransposed) -> (B,D) bf16."""
    B, M, D2 = kv2.shape
    D = D2 // 2
    hm = lr["ab_w"].shape[1]
    H = lr["sp_w"].shape[1]
    per_batch = M * (20 * D + 8 * hm) + 8 * D
    tb = _batch_tile(B, per_batch)
    return pl.pallas_call(
        _scatt_kernel,
        out_shape=jax.ShapeDtypeStruct((B, D), jnp.bfloat16),
        grid=(B // tb,),
        in_specs=[
            pl.BlockSpec((tb, 2 * D), lambda b: (b, 0)),
            pl.BlockSpec((tb, M, 2 * D), lambda b: (b, 0, 0)),
            pl.BlockSpec((tb, M, 1), lambda b: (b, 0, 0)),
            _const_spec((D, hm)),
            _const_spec((1, hm)),
            _const_spec((hm, H)),
            _const_spec((1, H)),
            _const_spec((hm, D)),
            _const_spec((1, D)),
            _const_spec((H, D)),
        ],
        out_specs=pl.BlockSpec((tb, D), lambda b: (b, 0)),
        compiler_params=_cparams(),
    )(qv1, kv2, mask_col,
      lr["ab_w"], lr["ab_b"], lr["sp_w"], lr["sp_b"], lr["ch_w"], lr["ch_b"], lr["expand_e"])


def fused_bifeat_ln(att_feats, gv_feat, lp):
    B, M, D = att_feats.shape
    tb = _batch_tile(B, 22 * M * D)
    return pl.pallas_call(
        functools.partial(_bifeat_kernel, eps=_EPS),
        out_shape=jax.ShapeDtypeStruct((B, M, D), jnp.bfloat16),
        grid=(B // tb,),
        in_specs=[
            pl.BlockSpec((tb, M, D), lambda b: (b, 0, 0)),
            pl.BlockSpec((tb, D), lambda b: (b, 0)),
            _const_spec((D, D)),
            _const_spec((D, D)),
            _const_spec((1, D)),
            _const_spec((1, D)),
            _const_spec((1, D)),
        ],
        out_specs=pl.BlockSpec((tb, M, D), lambda b: (b, 0, 0)),
        compiler_params=_cparams(),
    )(att_feats, gv_feat, lp["bif_wtop"], lp["bif_wbot"], lp["bif_b"], lp["ln_w"], lp["ln_b"])


def fused_linear_ln(x, w_t, b, g, beta):
    R, K = x.shape
    N = w_t.shape[1]
    per_row = 4 * K + 12 * N
    tm = _row_tile(R, per_row)
    return pl.pallas_call(
        functools.partial(_linear_ln_kernel, eps=_EPS),
        out_shape=jax.ShapeDtypeStruct((R, N), jnp.bfloat16),
        grid=(pl.cdiv(R, tm),),
        in_specs=[
            pl.BlockSpec((tm, K), lambda i: (i, 0)),
            _const_spec((K, N)),
            _const_spec((1, N)),
            _const_spec((1, N)),
            _const_spec((1, N)),
        ],
        out_specs=pl.BlockSpec((tm, N), lambda i: (i, 0)),
        compiler_params=_cparams(),
    )(x, w_t, b, g, beta)


# ----------------------------------------------------------------------------
# Model forward
# ----------------------------------------------------------------------------
def lowrank_forward(lr, gv_feat, att_feats, mask_col):
    """One LowRank + SCAtt sublayer. gv_feat:(B,D) bf16, att_feats:(B,M,D) bf16 -> (B,D) bf16."""
    B, M, D = att_feats.shape
    inv_cg = lr["inv_cg"]
    # q & v1 project the same input (gv) -> one fused Linear+CELU+GroupNorm(2H) call
    qv1 = fused_inproj(gv_feat, lr["qv1_w"], lr["qv1_b"], lr["seg_s"], lr["seg_st"],
                       lr["qv1_gn_w"], lr["qv1_gn_b"], inv_cg)                    # (B, 2D)
    # k & v2 project the same input (att_feats); consumed untransposed (no HBM transpose)
    kv2 = fused_inproj(att_feats.reshape(B * M, D), lr["kv2_w"], lr["kv2_b"],
                       lr["seg_s"], lr["seg_st"], lr["kv2_gn_w"], lr["kv2_gn_b"],
                       inv_cg).reshape(B, M, 2 * D)
    return fused_scatt(qv1, kv2, mask_col, lr)                                    # (B, D)


def enc_block_forward(params, gv_feat, att_feats, att_mask, geo_feats):
    D = params["D"]
    B, M0, _ = att_feats.shape
    G = geo_feats.shape[-1]

    # pad the region axis to a sublane multiple; padding is masked out everywhere downstream
    M = ((M0 + 7) // 8) * 8
    if M != M0:
        pad3 = ((0, 0), (0, M - M0), (0, 0))
        att_feats = jnp.pad(att_feats, pad3)
        geo_feats = jnp.pad(geo_feats, pad3)
        att_mask = jnp.pad(att_mask, ((0, 0), (0, M - M0)))

    att_bf = att_feats.astype(jnp.bfloat16)
    geo_bf = geo_feats.astype(jnp.bfloat16)
    mask_col = att_mask.reshape(B, M, 1).astype(jnp.float32)

    # geo_transform + dual (geo) attention, fused; bf16 activations from here on
    att_feats = fused_geo_attention(att_bf.reshape(B * M, D),
                                    geo_bf.reshape(B * M, G),
                                    params["geoatt"]).reshape(B, M, D)

    if gv_feat.shape[-1] == 1:
        gv_feat = masked_mean_pool(att_feats, mask_col)                           # (B, D)
    else:
        gv_feat = gv_feat.astype(jnp.bfloat16)

    feat_arr = [gv_feat]
    for lp in params["layers"]:
        gv_feat = lowrank_forward(lp["lowrank"], gv_feat, att_feats, mask_col)
        att_feats = fused_bifeat_ln(att_feats, gv_feat, lp)
        feat_arr.append(gv_feat)

    gv = jnp.concatenate(feat_arr, axis=-1)                                       # (B, D*(L+1))
    gv = fused_linear_ln(gv, params["proj_w"], params["proj_b"],
                         params["final_ln_w"], params["final_ln_b"])
    return gv, att_feats[:, :M0, :]


# ----------------------------------------------------------------------------
# Deterministic parameter init (weights pre-transposed (K, N), bf16; biases/gains f32;
# per-head SCAtt weights stored block-diagonal so the kernel runs wide matmuls)
# ----------------------------------------------------------------------------
def _dense(key, in_dim, out_dim, scale=0.1):
    kw, kb = jax.random.split(key)
    w = scale * jax.random.normal(kw, (in_dim, out_dim), jnp.float32)
    b = 0.01 * jax.random.normal(kb, (1, out_dim), jnp.float32)
    return w, b


def _block_diag(blocks):
    rows = sum(b.shape[0] for b in blocks)
    cols = sum(b.shape[1] for b in blocks)
    out = jnp.zeros((rows, cols), blocks[0].dtype)
    r = c = 0
    for b in blocks:
        out = out.at[r:r + b.shape[0], c:c + b.shape[1]].set(b)
        r += b.shape[0]
        c += b.shape[1]
    return out


def init_params(key, D, G, H, mid, L):
    Dh = D // H
    keys = jax.random.split(key, 4 + L)
    p = {"D": D, "H": H}

    geo_w, geo_b = _dense(keys[0], G, D)
    gate_wa, _ = _dense(keys[1], D, D)       # gate weight half acting on att_feats
    gate_wg, gate_b = _dense(keys[2], D, D)  # gate weight half acting on geo-transformed feats
    p["geoatt"] = {"geo_w": geo_w.astype(jnp.bfloat16), "geo_b": geo_b,
                   "gate_wa": gate_wa.astype(jnp.bfloat16),
                   "gate_wg": gate_wg.astype(jnp.bfloat16), "gate_b": gate_b}

    proj_w, p["proj_b"] = _dense(keys[3], D * (L + 1), D)
    p["proj_w"] = proj_w.astype(jnp.bfloat16)
    p["final_ln_w"] = jnp.ones((1, D), jnp.float32)
    p["final_ln_b"] = jnp.zeros((1, D), jnp.float32)

    # structural constants shared by every layer
    seg = _block_diag([jnp.ones((Dh, 1), jnp.float32)] * (2 * H))               # (2D, 2H)
    expand_e = _block_diag([jnp.ones((1, Dh), jnp.float32)] * H).astype(jnp.bfloat16)  # (H, D)

    layers = []
    for i in range(L):
        lk = jax.random.split(keys[4 + i], 8)
        lr = {"seg_s": seg, "seg_st": seg.T, "expand_e": expand_e, "inv_cg": 1.0 / Dh}
        # q & v1 in_proj (same input: gv_feat) -> concatenated Linear, GroupNorm over 2H groups
        w, lr["qv1_b"] = _dense(lk[0], D, 2 * D)
        lr["qv1_w"] = w.astype(jnp.bfloat16)
        lr["qv1_gn_w"] = jnp.ones((1, 2 * D), jnp.float32)
        lr["qv1_gn_b"] = jnp.zeros((1, 2 * D), jnp.float32)
        # k & v2 in_proj (same input: att_feats)
        w, lr["kv2_b"] = _dense(lk[1], D, 2 * D)
        lr["kv2_w"] = w.astype(jnp.bfloat16)
        lr["kv2_gn_w"] = jnp.ones((1, 2 * D), jnp.float32)
        lr["kv2_gn_b"] = jnp.zeros((1, 2 * D), jnp.float32)
        # SCAtt: attention_basic Linear(Dh, mid); attention_last Linear(mid, 1);
        #        attention_last2 Linear(mid, Dh) -- shared per head, stored block-diagonal
        ab_w, ab_b = _dense(lk[2], Dh, mid)
        lr["ab_w"] = _block_diag([ab_w] * H).astype(jnp.bfloat16)               # (D, H*mid)
        lr["ab_b"] = jnp.tile(ab_b, (1, H))                                      # (1, H*mid)
        al_w = 0.1 * jax.random.normal(lk[3], (mid, 1), jnp.float32)
        al_b = 0.01 * jax.random.normal(lk[4], (1, 1), jnp.float32)
        lr["sp_w"] = _block_diag([al_w] * H).astype(jnp.bfloat16)               # (H*mid, H)
        lr["sp_b"] = jnp.tile(al_b, (1, H))                                      # (1, H)
        al2_w, al2_b = _dense(lk[5], mid, Dh)
        lr["ch_w"] = _block_diag([al2_w] * H).astype(jnp.bfloat16)              # (H*mid, D)
        lr["ch_b"] = jnp.tile(al2_b, (1, H))                                     # (1, D)
        layer = {"lowrank": lr}
        # bifeat Linear(2D, D) split into the gv half and the att half
        wtop, _ = _dense(lk[6], D, D)
        wbot, layer["bif_b"] = _dense(lk[7], D, D)
        layer["bif_wtop"] = wtop.astype(jnp.bfloat16)
        layer["bif_wbot"] = wbot.astype(jnp.bfloat16)
        layer["ln_w"] = jnp.ones((1, D), jnp.float32)
        layer["ln_b"] = jnp.zeros((1, D), jnp.float32)
        layers.append(layer)
    p["layers"] = layers
    return p


# ----------------------------------------------------------------------------
if __name__ == "__main__":
    B, M, D, G = 2, 8, 32, 16       # batch, num regions, embed_dim, geo_dim
    H, mid, L = 4, 16, 2            # att_heads, att_mid_dim middle, layer_num

    params = init_params(jax.random.PRNGKey(0), D, G, H, mid, L)

    k1, k2 = jax.random.split(jax.random.PRNGKey(0))
    att_feats = jax.random.normal(k1, (B, M, D), jnp.float32)
    geo_feats = jax.random.normal(k2, (B, M, G), jnp.float32)
    att_mask = jnp.ones((B, M), jnp.float32).at[:, M - 2:].set(0.0)  # last 2 regions padded
    gv_feat = jnp.zeros((B, 1), jnp.float32)                          # triggers mean-pool path

    fwd = jax.jit(lambda gv, a, m, g: enc_block_forward(params, gv, a, m, g))
    gv_out, att_out = fwd(gv_feat, att_feats, att_mask, geo_feats)
    jax.block_until_ready((gv_out, att_out))
    assert gv_out.shape == (B, D) and att_out.shape == (B, M, D)
    assert bool(jnp.all(jnp.isfinite(gv_out.astype(jnp.float32))))
    assert bool(jnp.all(jnp.isfinite(att_out.astype(jnp.float32))))
    print("KERNEL_OK")
</pallas_src>

<mosaic_0001>
module attributes {stable_mosaic.version = 11 : i64} {
  func.func @_copy(%arg0: i32, %arg1: memref<8x128xf32, #tpu.memory_space<vmem>>, %arg2: memref<8x128xf32, #tpu.memory_space<vmem>>) attributes {dimension_semantics = [#tpu.dimension_semantics<arbitrary>], iteration_bounds = array<i64: 2>, scalar_prefetch = 0 : i64, scratch_operands = 0 : i64, tpu.core_type = #tpu.core_type<tc>, window_params = [{pipeline_mode = #tpu.pipeline_mode<synchronous>, transform_indices = @transform_0, window_bounds = array<i64: 8, 128>}, {transform_indices = @transform_1, window_bounds = array<i64: 8, 128>}]} {
    %c0 = arith.constant 0 : index
    %c0_0 = arith.constant 0 : index
    %0 = vector.load %arg1[%c0, %c0_0] : memref<8x128xf32, #tpu.memory_space<vmem>>, vector<8x128xf32>
    %c0_1 = arith.constant 0 : index
    %c0_2 = arith.constant 0 : index
    %1 = vector.load %arg2[%c0_1, %c0_2] : memref<8x128xf32, #tpu.memory_space<vmem>>, vector<8x128xf32>
    tpu.vector_store %arg2[%c0_1, %c0_2], %0 {strides = array<i32>} : memref<8x128xf32, #tpu.memory_space<vmem>>, vector<8x128xf32>,
    return
  }
  func.func @transform_0(%arg0: i32) -> (i32, i32) {
    %c0_i32 = arith.constant 0 : i32
    %c0_i32_0 = arith.constant 0 : i32
    %c0_i32_1 = arith.constant 0 : i32
    return %c0_i32, %c0_i32_0 : i32, i32
  }
  func.func @transform_1(%arg0: i32) -> (i32, i32) {
    %c0_i32 = arith.constant 0 : i32
    %c0_i32_0 = arith.constant 0 : i32
    return %arg0, %c0_i32 : i32, i32
  }
}

module attributes {stable_mosaic.version = 11 : i64} {
  func.func @_inproj_kernel(%arg0: i32, %arg1: memref<2x32xbf16, #tpu.memory_space<vmem>>, %arg2: memref<32x64xbf16, #tpu.memory_space<vmem>>, %arg3: memref<1x64xf32, #tpu.memory_space<vmem>>, %arg4: memref<64x8xf32, #tpu.memory_space<vmem>>, %arg5: memref<8x64xf32, #tpu.memory_space<vmem>>, %arg6: memref<1x64xf32, #tpu.memory_space<vmem>>, %arg7: memref<1x64xf32, #tpu.memory_space<vmem>>, %arg8: memref<2x64xbf16, #tpu.memory_space<vmem>>) attributes {dimension_semantics = [#tpu.dimension_semantics<parallel>], iteration_bounds = array<i64: 1>, scalar_prefetch = 0 : i64, scratch_operands = 0 : i64, tpu.core_type = #tpu.core_type<tc>, window_params = [{transform_indices = @transform_0, window_bounds = array<i64: 2, 32>}, {pipeline_mode = #tpu.pipeline_mode<synchronous>, transform_indices = @transform_1, window_bounds = array<i64: 32, 64>}, {pipeline_mode = #tpu.pipeline_mode<synchronous>, transform_indices = @transform_2, window_bounds = array<i64: 1, 64>}, {pipeline_mode = #tpu.pipeline_mode<synchronous>, transform_indices = @transform_3, window_bounds = array<i64: 64, 8>}, {pipeline_mode = #tpu.pipeline_mode<synchronous>, transform_indices = @transform_4, window_bounds = array<i64: 8, 64>}, {pipeline_mode = #tpu.pipeline_mode<synchronous>, transform_indices = @transform_5, window_bounds = array<i64: 1, 64>}, {pipeline_mode = #tpu.pipeline_mode<synchronous>, transform_indices = @transform_6, window_bounds = array<i64: 1, 64>}, {transform_indices = @transform_7, window_bounds = array<i64: 2, 64>}]} {
    %c0 = arith.constant 0 : index
    %c0_0 = arith.constant 0 : index
    %0 = vector.load %arg1[%c0, %c0_0] : memref<2x32xbf16, #tpu.memory_space<vmem>>, vector<2x32xbf16>
    %c0_1 = arith.constant 0 : index
    %c0_2 = arith.constant 0 : index
    %1 = vector.load %arg2[%c0_1, %c0_2] : memref<32x64xbf16, #tpu.memory_space<vmem>>, vector<32x64xbf16>
    %cst = arith.constant dense<0.000000e+00> : vector<2x64xf32>
    %2 = tpu.matmul %0, %1, %cst {dimension_numbers = #tpu.dot_dimension_numbers<[1], [0], [0], [1], [0, 0, 1, 1], [], []>} : vector<2x32xbf16>, vector<32x64xbf16>, vector<2x64xf32> -> vector<2x64xf32>
    %c0_3 = arith.constant 0 : index
    %c0_4 = arith.constant 0 : index
    %3 = vector.load %arg3[%c0_3, %c0_4] : memref<1x64xf32, #tpu.memory_space<vmem>>, vector<1x64xf32>
    %4 = vector.broadcast %3 : vector<1x64xf32> to vector<2x64xf32>
    %5 = arith.addf %2, %4 : vector<2x64xf32>
    %cst_5 = arith.constant 0.000000e+00 : f32
    %6 = vector.broadcast %cst_5 : f32 to vector<2x64xf32>
    %7 = arith.cmpf ogt, %5, %6 : vector<2x64xf32>
    %cst_6 = arith.constant 0.000000e+00 : f32
    %8 = vector.broadcast %cst_6 : f32 to vector<2x64xf32>
    %9 = arith.minimumf %5, %8 : vector<2x64xf32>
    %10 = math.exp %9 : vector<2x64xf32>
    %cst_7 = arith.constant 1.000000e+00 : f32
    %11 = vector.broadcast %cst_7 : f32 to vector<2x64xf32>
    %12 = arith.subf %10, %11 : vector<2x64xf32>
    %13 = arith.select %7, %5, %12 : vector<2x64xi1>, vector<2x64xf32>
    %c0_8 = arith.constant 0 : index
    %c0_9 = arith.constant 0 : index
    %14 = vector.load %arg4[%c0_8, %c0_9] : memref<64x8xf32, #tpu.memory_space<vmem>>, vector<64x8xf32>
    %c0_10 = arith.constant 0 : index
    %c0_11 = arith.constant 0 : index
    %15 = vector.load %arg5[%c0_10, %c0_11] : memref<8x64xf32, #tpu.memory_space<vmem>>, vector<8x64xf32>
    %cst_12 = arith.constant dense<0.000000e+00> : vector<2x8xf32>
    %16 = tpu.matmul %13, %14, %cst_12 {dimension_numbers = #tpu.dot_dimension_numbers<[1], [0], [0], [1], [0, 0, 1, 1], [], []>} : vector<2x64xf32>, vector<64x8xf32>, vector<2x8xf32> -> vector<2x8xf32>
    %17 = arith.mulf %13, %13 : vector<2x64xf32>
    %cst_13 = arith.constant dense<0.000000e+00> : vector<2x8xf32>
    %18 = tpu.matmul %17, %14, %cst_13 {dimension_numbers = #tpu.dot_dimension_numbers<[1], [0], [0], [1], [0, 0, 1, 1], [], []>} : vector<2x64xf32>, vector<64x8xf32>, vector<2x8xf32> -> vector<2x8xf32>
    %cst_14 = arith.constant 1.250000e-01 : f32
    %19 = vector.broadcast %cst_14 : f32 to vector<2x8xf32>
    %20 = arith.mulf %16, %19 : vector<2x8xf32>
    %cst_15 = arith.constant 1.250000e-01 : f32
    %21 = vector.broadcast %cst_15 : f32 to vector<2x8xf32>
    %22 = arith.mulf %18, %21 : vector<2x8xf32>
    %23 = arith.mulf %20, %20 : vector<2x8xf32>
    %24 = arith.subf %22, %23 : vector<2x8xf32>
    %cst_16 = arith.constant 0.000000e+00 : f32
    %25 = vector.broadcast %cst_16 : f32 to vector<2x8xf32>
    %26 = arith.maximumf %24, %25 : vector<2x8xf32>
    %cst_17 = arith.constant dense<0.000000e+00> : vector<2x64xf32>
    %27 = tpu.matmul %20, %15, %cst_17 {dimension_numbers = #tpu.dot_dimension_numbers<[1], [0], [0], [1], [0, 0, 1, 1], [], []>} : vector<2x8xf32>, vector<8x64xf32>, vector<2x64xf32> -> vector<2x64xf32>
    %cst_18 = arith.constant 9.99999974E-6 : f32
    %28 = vector.broadcast %cst_18 : f32 to vector<2x8xf32>
    %29 = arith.addf %26, %28 : vector<2x8xf32>
    %30 = math.rsqrt %29 : vector<2x8xf32>
    %cst_19 = arith.constant dense<0.000000e+00> : vector<2x64xf32>
    %31 = tpu.matmul %30, %15, %cst_19 {dimension_numbers = #tpu.dot_dimension_numbers<[1], [0], [0], [1], [0, 0, 1, 1], [], []>} : vector<2x8xf32>, vector<8x64xf32>, vector<2x64xf32> -> vector<2x64xf32>
    %32 = arith.subf %13, %27 : vector<2x64xf32>
    %33 = arith.mulf %32, %31 : vector<2x64xf32>
    %c0_20 = arith.constant 0 : index
    %c0_21 = arith.constant 0 : index
    %34 = vector.load %arg6[%c0_20, %c0_21] : memref<1x64xf32, #tpu.memory_space<vmem>>, vector<1x64xf32>
    %35 = vector.broadcast %34 : vector<1x64xf32> to vector<2x64xf32>
    %36 = arith.mulf %33, %35 : vector<2x64xf32>
    %c0_22 = arith.constant 0 : index
    %c0_23 = arith.constant 0 : index
    %37 = vector.load %arg7[%c0_22, %c0_23] : memref<1x64xf32, #tpu.memory_space<vmem>>, vector<1x64xf32>
    %38 = vector.broadcast %37 : vector<1x64xf32> to vector<2x64xf32>
    %39 = arith.addf %36, %38 : vector<2x64xf32>
    %40 = arith.truncf %39 : vector<2x64xf32> to vector<2x64xbf16>
    %c0_24 = arith.constant 0 : index
    %c0_25 = arith.constant 0 : index
    %41 = vector.load %arg8[%c0_24, %c0_25] : memref<2x64xbf16, #tpu.memory_space<vmem>>, vector<2x64xbf16>
    tpu.vector_store %arg8[%c0_24, %c0_25], %40 {strides = array<i32>} : memref<2x64xbf16, #tpu.memory_space<vmem>>, vector<2x64xbf16>,
    return
  }
  func.func @transform_0(%arg0: i32) -> (i32, i32) {
    %c0_i32 = arith.constant 0 : i32
    %c0_i32_0 = arith.constant 0 : i32
    return %arg0, %c0_i32 : i32, i32
  }
  func.func @transform_1(%arg0: i32) -> (i32, i32) {
    %c0_i32 = arith.constant 0 : i32
    %c0_i32_0 = arith.constant 0 : i32
    %c0_i32_1 = arith.constant 0 : i32
    return %c0_i32, %c0_i32_0 : i32, i32
  }
  func.func @transform_2(%arg0: i32) -> (i32, i32) {
    %c0_i32 = arith.constant 0 : i32
    %c0_i32_0 = arith.constant 0 : i32
    %c0_i32_1 = arith.constant 0 : i32
    return %c0_i32, %c0_i32_0 : i32, i32
  }
  func.func @transform_3(%arg0: i32) -> (i32, i32) {
    %c0_i32 = arith.constant 0 : i32
    %c0_i32_0 = arith.constant 0 : i32
    %c0_i32_1 = arith.constant 0 : i32
    return %c0_i32, %c0_i32_0 : i32, i32
  }
  func.func @transform_4(%arg0: i32) -> (i32, i32) {
    %c0_i32 = arith.constant 0 : i32
    %c0_i32_0 = arith.constant 0 : i32
    %c0_i32_1 = arith.constant 0 : i32
    return %c0_i32, %c0_i32_0 : i32, i32
  }
  func.func @transform_5(%arg0: i32) -> (i32, i32) {
    %c0_i32 = arith.constant 0 : i32
    %c0_i32_0 = arith.constant 0 : i32
    %c0_i32_1 = arith.constant 0 : i32
    return %c0_i32, %c0_i32_0 : i32, i32
  }
  func.func @transform_6(%arg0: i32) -> (i32, i32) {
    %c0_i32 = arith.constant 0 : i32
    %c0_i32_0 = arith.constant 0 : i32
    %c0_i32_1 = arith.constant 0 : i32
    return %c0_i32, %c0_i32_0 : i32, i32
  }
  func.func @transform_7(%arg0: i32) -> (i32, i32) {
    %c0_i32 = arith.constant 0 : i32
    %c0_i32_0 = arith.constant 0 : i32
    return %arg0, %c0_i32 : i32, i32
  }
}

module attributes {stable_mosaic.version = 11 : i64} {
  func.func @_geo_fuse_kernel(%arg0: i32, %arg1: memref<16x32xbf16, #tpu.memory_space<vmem>>, %arg2: memref<16x16xbf16, #tpu.memory_space<vmem>>, %arg3: memref<16x32xbf16, #tpu.memory_space<vmem>>, %arg4: memref<1x32xf32, #tpu.memory_space<vmem>>, %arg5: memref<32x32xbf16, #tpu.memory_space<vmem>>, %arg6: memref<32x32xbf16, #tpu.memory_space<vmem>>, %arg7: memref<1x32xf32, #tpu.memory_space<vmem>>, %arg8: memref<16x32xbf16, #tpu.memory_space<vmem>>) attributes {dimension_semantics = [#tpu.dimension_semantics<parallel>], iteration_bounds = array<i64: 1>, scalar_prefetch = 0 : i64, scratch_operands = 0 : i64, tpu.core_type = #tpu.core_type<tc>, window_params = [{transform_indices = @transform_0, window_bounds = array<i64: 16, 32>}, {transform_indices = @transform_1, window_bounds = array<i64: 16, 16>}, {pipeline_mode = #tpu.pipeline_mode<synchronous>, transform_indices = @transform_2, window_bounds = array<i64: 16, 32>}, {pipeline_mode = #tpu.pipeline_mode<synchronous>, transform_indices = @transform_3, window_bounds = array<i64: 1, 32>}, {pipeline_mode = #tpu.pipeline_mode<synchronous>, transform_indices = @transform_4, window_bounds = array<i64: 32, 32>}, {pipeline_mode = #tpu.pipeline_mode<synchronous>, transform_indices = @transform_5, window_bounds = array<i64: 32, 32>}, {pipeline_mode = #tpu.pipeline_mode<synchronous>, transform_indices = @transform_6, window_bounds = array<i64: 1, 32>}, {transform_indices = @transform_7, window_bounds = array<i64: 16, 32>}]} {
    %c0 = arith.constant 0 : index
    %c0_0 = arith.constant 0 : index
    %0 = vector.load %arg1[%c0, %c0_0] : memref<16x32xbf16, #tpu.memory_space<vmem>>, vector<16x32xbf16>
    %c0_1 = arith.constant 0 : index
    %c0_2 = arith.constant 0 : index
    %1 = vector.load %arg2[%c0_1, %c0_2] : memref<16x16xbf16, #tpu.memory_space<vmem>>, vector<16x16xbf16>
    %c0_3 = arith.constant 0 : index
    %c0_4 = arith.constant 0 : index
    %2 = vector.load %arg3[%c0_3, %c0_4] : memref<16x32xbf16, #tpu.memory_space<vmem>>, vector<16x32xbf16>
    %cst = arith.constant dense<0.000000e+00> : vector<16x32xf32>
    %3 = tpu.matmul %1, %2, %cst {dimension_numbers = #tpu.dot_dimension_numbers<[1], [0], [0], [1], [0, 0, 1, 1], [], []>} : vector<16x16xbf16>, vector<16x32xbf16>, vector<16x32xf32> -> vector<16x32xf32>
    %c0_5 = arith.constant 0 : index
    %c0_6 = arith.constant 0 : index
    %4 = vector.load %arg4[%c0_5, %c0_6] : memref<1x32xf32, #tpu.memory_space<vmem>>, vector<1x32xf32>
    %5 = vector.broadcast %4 : vector<1x32xf32> to vector<16x32xf32>
    %6 = arith.addf %3, %5 : vector<16x32xf32>
    %c0_7 = arith.constant 0 : index
    %c0_8 = arith.constant 0 : index
    %7 = vector.load %arg5[%c0_7, %c0_8] : memref<32x32xbf16, #tpu.memory_space<vmem>>, vector<32x32xbf16>
    %cst_9 = arith.constant dense<0.000000e+00> : vector<16x32xf32>
    %8 = tpu.matmul %0, %7, %cst_9 {dimension_numbers = #tpu.dot_dimension_numbers<[1], [0], [0], [1], [0, 0, 1, 1], [], []>} : vector<16x32xbf16>, vector<32x32xbf16>, vector<16x32xf32> -> vector<16x32xf32>
    %9 = arith.truncf %6 : vector<16x32xf32> to vector<16x32xbf16>
    %c0_10 = arith.constant 0 : index
    %c0_11 = arith.constant 0 : index
    %10 = vector.load %arg6[%c0_10, %c0_11] : memref<32x32xbf16, #tpu.memory_space<vmem>>, vector<32x32xbf16>
    %cst_12 = arith.constant dense<0.000000e+00> : vector<16x32xf32>
    %11 = tpu.matmul %9, %10, %cst_12 {dimension_numbers = #tpu.dot_dimension_numbers<[1], [0], [0], [1], [0, 0, 1, 1], [], []>} : vector<16x32xbf16>, vector<32x32xbf16>, vector<16x32xf32> -> vector<16x32xf32>
    %12 = arith.addf %8, %11 : vector<16x32xf32>
    %c0_13 = arith.constant 0 : index
    %c0_14 = arith.constant 0 : index
    %13 = vector.load %arg7[%c0_13, %c0_14] : memref<1x32xf32, #tpu.memory_space<vmem>>, vector<1x32xf32>
    %14 = vector.broadcast %13 : vector<1x32xf32> to vector<16x32xf32>
    %15 = arith.addf %12, %14 : vector<16x32xf32>
    %16 = arith.negf %15 : vector<16x32xf32>
    %17 = math.exp %16 : vector<16x32xf32>
    %cst_15 = arith.constant 1.000000e+00 : f32
    %18 = vector.broadcast %cst_15 : f32 to vector<16x32xf32>
    %19 = arith.addf %18, %17 : vector<16x32xf32>
    %20 = arith.divf %18, %19 : vector<16x32xf32>
    %21 = arith.extf %0 : vector<16x32xbf16> to vector<16x32xf32>
    %22 = arith.mulf %20, %21 : vector<16x32xf32>
    %cst_16 = arith.constant 1.000000e+00 : f32
    %23 = vector.broadcast %cst_16 : f32 to vector<16x32xf32>
    %24 = arith.subf %23, %20 : vector<16x32xf32>
    %25 = arith.mulf %24, %6 : vector<16x32xf32>
    %26 = arith.addf %22, %25 : vector<16x32xf32>
    %27 = arith.truncf %26 : vector<16x32xf32> to vector<16x32xbf16>
    %c0_17 = arith.constant 0 : index
    %c0_18 = arith.constant 0 : index
    %28 = vector.load %arg8[%c0_17, %c0_18] : memref<16x32xbf16, #tpu.memory_space<vmem>>, vector<16x32xbf16>
    tpu.vector_store %arg8[%c0_17, %c0_18], %27 {strides = array<i32>} : memref<16x32xbf16, #tpu.memory_space<vmem>>, vector<16x32xbf16>,
    return
  }
  func.func @transform_0(%arg0: i32) -> (i32, i32) {
    %c0_i32 = arith.constant 0 : i32
    %c0_i32_0 = arith.constant 0 : i32
    return %arg0, %c0_i32 : i32, i32
  }
  func.func @transform_1(%arg0: i32) -> (i32, i32) {
    %c0_i32 = arith.constant 0 : i32
    %c0_i32_0 = arith.constant 0 : i32
    return %arg0, %c0_i32 : i32, i32
  }
  func.func @transform_2(%arg0: i32) -> (i32, i32) {
    %c0_i32 = arith.constant 0 : i32
    %c0_i32_0 = arith.constant 0 : i32
    %c0_i32_1 = arith.constant 0 : i32
    return %c0_i32, %c0_i32_0 : i32, i32
  }
  func.func @transform_3(%arg0: i32) -> (i32, i32) {
    %c0_i32 = arith.constant 0 : i32
    %c0_i32_0 = arith.constant 0 : i32
    %c0_i32_1 = arith.constant 0 : i32
    return %c0_i32, %c0_i32_0 : i32, i32
  }
  func.func @transform_4(%arg0: i32) -> (i32, i32) {
    %c0_i32 = arith.constant 0 : i32
    %c0_i32_0 = arith.constant 0 : i32
    %c0_i32_1 = arith.constant 0 : i32
    return %c0_i32, %c0_i32_0 : i32, i32
  }
  func.func @transform_5(%arg0: i32) -> (i32, i32) {
    %c0_i32 = arith.constant 0 : i32
    %c0_i32_0 = arith.constant 0 : i32
    %c0_i32_1 = arith.constant 0 : i32
    return %c0_i32, %c0_i32_0 : i32, i32
  }
  func.func @transform_6(%arg0: i32) -> (i32, i32) {
    %c0_i32 = arith.constant 0 : i32
    %c0_i32_0 = arith.constant 0 : i32
    %c0_i32_1 = arith.constant 0 : i32
    return %c0_i32, %c0_i32_0 : i32, i32
  }
  func.func @transform_7(%arg0: i32) -> (i32, i32) {
    %c0_i32 = arith.constant 0 : i32
    %c0_i32_0 = arith.constant 0 : i32
    return %arg0, %c0_i32 : i32, i32
  }
}

module attributes {stable_mosaic.version = 11 : i64} {
  func.func @_masked_pool_kernel(%arg0: i32, %arg1: memref<2x8x32xbf16, #tpu.memory_space<vmem>>, %arg2: memref<2x8x1xf32, #tpu.memory_space<vmem>>, %arg3: memref<2x32xbf16, #tpu.memory_space<vmem>>) attributes {dimension_semantics = [#tpu.dimension_semantics<parallel>], iteration_bounds = array<i64: 1>, scalar_prefetch = 0 : i64, scratch_operands = 0 : i64, tpu.core_type = #tpu.core_type<tc>, window_params = [{transform_indices = @transform_0, window_bounds = array<i64: 2, 8, 32>}, {transform_indices = @transform_1, window_bounds = array<i64: 2, 8, 1>}, {transform_indices = @transform_2, window_bounds = array<i64: 2, 32>}]} {
    %c0 = arith.constant 0 : index
    %c0_0 = arith.constant 0 : index
    %c0_1 = arith.constant 0 : index
    %0 = vector.load %arg1[%c0, %c0_0, %c0_1] : memref<2x8x32xbf16, #tpu.memory_space<vmem>>, vector<2x8x32xbf16>
    %1 = arith.extf %0 : vector<2x8x32xbf16> to vector<2x8x32xf32>
    %c0_2 = arith.constant 0 : index
    %c0_3 = arith.constant 0 : index
    %c0_4 = arith.constant 0 : index
    %2 = vector.load %arg2[%c0_2, %c0_3, %c0_4] : memref<2x8x1xf32, #tpu.memory_space<vmem>>, vector<2x8x1xf32>
    %3 = vector.broadcast %2 : vector<2x8x1xf32> to vector<2x8x32xf32>
    %4 = arith.mulf %1, %3 : vector<2x8x32xf32>
    %cst = arith.constant dense<0.000000e+00> : vector<2x32xf32>
    %5 = vector.multi_reduction <add>, %4, %cst [1] : vector<2x8x32xf32> to vector<2x32xf32>
    %cst_5 = arith.constant dense<0.000000e+00> : vector<2x1xf32>
    %6 = vector.multi_reduction <add>, %2, %cst_5 [1] : vector<2x8x1xf32> to vector<2x1xf32>
    %cst_6 = arith.constant 9.99999997E-7 : f32
    %7 = vector.broadcast %cst_6 : f32 to vector<2x1xf32>
    %8 = arith.maximumf %6, %7 : vector<2x1xf32>
    %9 = vector.broadcast %8 : vector<2x1xf32> to vector<2x32xf32>
    %10 = arith.divf %5, %9 : vector<2x32xf32>
    %11 = arith.truncf %10 : vector<2x32xf32> to vector<2x32xbf16>
    %c0_7 = arith.constant 0 : index
    %c0_8 = arith.constant 0 : index
    %12 = vector.load %arg3[%c0_7, %c0_8] : memref<2x32xbf16, #tpu.memory_space<vmem>>, vector<2x32xbf16>
    tpu.vector_store %arg3[%c0_7, %c0_8], %11 {strides = array<i32>} : memref<2x32xbf16, #tpu.memory_space<vmem>>, vector<2x32xbf16>,
    return
  }
  func.func @transform_0(%arg0: i32) -> (i32, i32, i32) {
    %c0_i32 = arith.constant 0 : i32
    %c0_i32_0 = arith.constant 0 : i32
    %c0_i32_1 = arith.constant 0 : i32
    return %arg0, %c0_i32, %c0_i32_0 : i32, i32, i32
  }
  func.func @transform_1(%arg0: i32) -> (i32, i32, i32) {
    %c0_i32 = arith.constant 0 : i32
    %c0_i32_0 = arith.constant 0 : i32
    %c0_i32_1 = arith.constant 0 : i32
    return %arg0, %c0_i32, %c0_i32_0 : i32, i32, i32
  }
  func.func @transform_2(%arg0: i32) -> (i32, i32) {
    %c0_i32 = arith.constant 0 : i32
    %c0_i32_0 = arith.constant 0 : i32
    return %arg0, %c0_i32 : i32, i32
  }
}

module attributes {stable_mosaic.version = 11 : i64} {
  func.func @_inproj_kernel(%arg0: i32, %arg1: memref<16x32xbf16, #tpu.memory_space<vmem>>, %arg2: memref<32x64xbf16, #tpu.memory_space<vmem>>, %arg3: memref<1x64xf32, #tpu.memory_space<vmem>>, %arg4: memref<64x8xf32, #tpu.memory_space<vmem>>, %arg5: memref<8x64xf32, #tpu.memory_space<vmem>>, %arg6: memref<1x64xf32, #tpu.memory_space<vmem>>, %arg7: memref<1x64xf32, #tpu.memory_space<vmem>>, %arg8: memref<16x64xbf16, #tpu.memory_space<vmem>>) attributes {dimension_semantics = [#tpu.dimension_semantics<parallel>], iteration_bounds = array<i64: 1>, scalar_prefetch = 0 : i64, scratch_operands = 0 : i64, tpu.core_type = #tpu.core_type<tc>, window_params = [{transform_indices = @transform_0, window_bounds = array<i64: 16, 32>}, {pipeline_mode = #tpu.pipeline_mode<synchronous>, transform_indices = @transform_1, window_bounds = array<i64: 32, 64>}, {pipeline_mode = #tpu.pipeline_mode<synchronous>, transform_indices = @transform_2, window_bounds = array<i64: 1, 64>}, {pipeline_mode = #tpu.pipeline_mode<synchronous>, transform_indices = @transform_3, window_bounds = array<i64: 64, 8>}, {pipeline_mode = #tpu.pipeline_mode<synchronous>, transform_indices = @transform_4, window_bounds = array<i64: 8, 64>}, {pipeline_mode = #tpu.pipeline_mode<synchronous>, transform_indices = @transform_5, window_bounds = array<i64: 1, 64>}, {pipeline_mode = #tpu.pipeline_mode<synchronous>, transform_indices = @transform_6, window_bounds = array<i64: 1, 64>}, {transform_indices = @transform_7, window_bounds = array<i64: 16, 64>}]} {
    %c0 = arith.constant 0 : index
    %c0_0 = arith.constant 0 : index
    %0 = vector.load %arg1[%c0, %c0_0] : memref<16x32xbf16, #tpu.memory_space<vmem>>, vector<16x32xbf16>
    %c0_1 = arith.constant 0 : index
    %c0_2 = arith.constant 0 : index
    %1 = vector.load %arg2[%c0_1, %c0_2] : memref<32x64xbf16, #tpu.memory_space<vmem>>, vector<32x64xbf16>
    %cst = arith.constant dense<0.000000e+00> : vector<16x64xf32>
    %2 = tpu.matmul %0, %1, %cst {dimension_numbers = #tpu.dot_dimension_numbers<[1], [0], [0], [1], [0, 0, 1, 1], [], []>} : vector<16x32xbf16>, vector<32x64xbf16>, vector<16x64xf32> -> vector<16x64xf32>
    %c0_3 = arith.constant 0 : index
    %c0_4 = arith.constant 0 : index
    %3 = vector.load %arg3[%c0_3, %c0_4] : memref<1x64xf32, #tpu.memory_space<vmem>>, vector<1x64xf32>
    %4 = vector.broadcast %3 : vector<1x64xf32> to vector<16x64xf32>
    %5 = arith.addf %2, %4 : vector<16x64xf32>
    %cst_5 = arith.constant 0.000000e+00 : f32
    %6 = vector.broadcast %cst_5 : f32 to vector<16x64xf32>
    %7 = arith.cmpf ogt, %5, %6 : vector<16x64xf32>
    %cst_6 = arith.constant 0.000000e+00 : f32
    %8 = vector.broadcast %cst_6 : f32 to vector<16x64xf32>
    %9 = arith.minimumf %5, %8 : vector<16x64xf32>
    %10 = math.exp %9 : vector<16x64xf32>
    %cst_7 = arith.constant 1.000000e+00 : f32
    %11 = vector.broadcast %cst_7 : f32 to vector<16x64xf32>
    %12 = arith.subf %10, %11 : vector<16x64xf32>
    %13 = arith.select %7, %5, %12 : vector<16x64xi1>, vector<16x64xf32>
    %c0_8 = arith.constant 0 : index
    %c0_9 = arith.constant 0 : index
    %14 = vector.load %arg4[%c0_8, %c0_9] : memref<64x8xf32, #tpu.memory_space<vmem>>, vector<64x8xf32>
    %c0_10 = arith.constant 0 : index
    %c0_11 = arith.constant 0 : index
    %15 = vector.load %arg5[%c0_10, %c0_11] : memref<8x64xf32, #tpu.memory_space<vmem>>, vector<8x64xf32>
    %cst_12 = arith.constant dense<0.000000e+00> : vector<16x8xf32>
    %16 = tpu.matmul %13, %14, %cst_12 {dimension_numbers = #tpu.dot_dimension_numbers<[1], [0], [0], [1], [0, 0, 1, 1], [], []>} : vector<16x64xf32>, vector<64x8xf32>, vector<16x8xf32> -> vector<16x8xf32>
    %17 = arith.mulf %13, %13 : vector<16x64xf32>
    %cst_13 = arith.constant dense<0.000000e+00> : vector<16x8xf32>
    %18 = tpu.matmul %17, %14, %cst_13 {dimension_numbers = #tpu.dot_dimension_numbers<[1], [0], [0], [1], [0, 0, 1, 1], [], []>} : vector<16x64xf32>, vector<64x8xf32>, vector<16x8xf32> -> vector<16x8xf32>
    %cst_14 = arith.constant 1.250000e-01 : f32
    %19 = vector.broadcast %cst_14 : f32 to vector<16x8xf32>
    %20 = arith.mulf %16, %19 : vector<16x8xf32>
    %cst_15 = arith.constant 1.250000e-01 : f32
    %21 = vector.broadcast %cst_15 : f32 to vector<16x8xf32>
    %22 = arith.mulf %18, %21 : vector<16x8xf32>
    %23 = arith.mulf %20, %20 : vector<16x8xf32>
    %24 = arith.subf %22, %23 : vector<16x8xf32>
    %cst_16 = arith.constant 0.000000e+00 : f32
    %25 = vector.broadcast %cst_16 : f32 to vector<16x8xf32>
    %26 = arith.maximumf %24, %25 : vector<16x8xf32>
    %cst_17 = arith.constant dense<0.000000e+00> : vector<16x64xf32>
    %27 = tpu.matmul %20, %15, %cst_17 {dimension_numbers = #tpu.dot_dimension_numbers<[1], [0], [0], [1], [0, 0, 1, 1], [], []>} : vector<16x8xf32>, vector<8x64xf32>, vector<16x64xf32> -> vector<16x64xf32>
    %cst_18 = arith.constant 9.99999974E-6 : f32
    %28 = vector.broadcast %cst_18 : f32 to vector<16x8xf32>
    %29 = arith.addf %26, %28 : vector<16x8xf32>
    %30 = math.rsqrt %29 : vector<16x8xf32>
    %cst_19 = arith.constant dense<0.000000e+00> : vector<16x64xf32>
    %31 = tpu.matmul %30, %15, %cst_19 {dimension_numbers = #tpu.dot_dimension_numbers<[1], [0], [0], [1], [0, 0, 1, 1], [], []>} : vector<16x8xf32>, vector<8x64xf32>, vector<16x64xf32> -> vector<16x64xf32>
    %32 = arith.subf %13, %27 : vector<16x64xf32>
    %33 = arith.mulf %32, %31 : vector<16x64xf32>
    %c0_20 = arith.constant 0 : index
    %c0_21 = arith.constant 0 : index
    %34 = vector.load %arg6[%c0_20, %c0_21] : memref<1x64xf32, #tpu.memory_space<vmem>>, vector<1x64xf32>
    %35 = vector.broadcast %34 : vector<1x64xf32> to vector<16x64xf32>
    %36 = arith.mulf %33, %35 : vector<16x64xf32>
    %c0_22 = arith.constant 0 : index
    %c0_23 = arith.constant 0 : index
    %37 = vector.load %arg7[%c0_22, %c0_23] : memref<1x64xf32, #tpu.memory_space<vmem>>, vector<1x64xf32>
    %38 = vector.broadcast %37 : vector<1x64xf32> to vector<16x64xf32>
    %39 = arith.addf %36, %38 : vector<16x64xf32>
    %40 = arith.truncf %39 : vector<16x64xf32> to vector<16x64xbf16>
    %c0_24 = arith.constant 0 : index
    %c0_25 = arith.constant 0 : index
    %41 = vector.load %arg8[%c0_24, %c0_25] : memref<16x64xbf16, #tpu.memory_space<vmem>>, vector<16x64xbf16>
    tpu.vector_store %arg8[%c0_24, %c0_25], %40 {strides = array<i32>} : memref<16x64xbf16, #tpu.memory_space<vmem>>, vector<16x64xbf16>,
    return
  }
  func.func @transform_0(%arg0: i32) -> (i32, i32) {
    %c0_i32 = arith.constant 0 : i32
    %c0_i32_0 = arith.constant 0 : i32
    return %arg0, %c0_i32 : i32, i32
  }
  func.func @transform_1(%arg0: i32) -> (i32, i32) {
    %c0_i32 = arith.constant 0 : i32
    %c0_i32_0 = arith.constant 0 : i32
    %c0_i32_1 = arith.constant 0 : i32
    return %c0_i32, %c0_i32_0 : i32, i32
  }
  func.func @transform_2(%arg0: i32) -> (i32, i32) {
    %c0_i32 = arith.constant 0 : i32
    %c0_i32_0 = arith.constant 0 : i32
    %c0_i32_1 = arith.constant 0 : i32
    return %c0_i32, %c0_i32_0 : i32, i32
  }
  func.func @transform_3(%arg0: i32) -> (i32, i32) {
    %c0_i32 = arith.constant 0 : i32
    %c0_i32_0 = arith.constant 0 : i32
    %c0_i32_1 = arith.constant 0 : i32
    return %c0_i32, %c0_i32_0 : i32, i32
  }
  func.func @transform_4(%arg0: i32) -> (i32, i32) {
    %c0_i32 = arith.constant 0 : i32
    %c0_i32_0 = arith.constant 0 : i32
    %c0_i32_1 = arith.constant 0 : i32
    return %c0_i32, %c0_i32_0 : i32, i32
  }
  func.func @transform_5(%arg0: i32) -> (i32, i32) {
    %c0_i32 = arith.constant 0 : i32
    %c0_i32_0 = arith.constant 0 : i32
    %c0_i32_1 = arith.constant 0 : i32
    return %c0_i32, %c0_i32_0 : i32, i32
  }
  func.func @transform_6(%arg0: i32) -> (i32, i32) {
    %c0_i32 = arith.constant 0 : i32
    %c0_i32_0 = arith.constant 0 : i32
    %c0_i32_1 = arith.constant 0 : i32
    return %c0_i32, %c0_i32_0 : i32, i32
  }
  func.func @transform_7(%arg0: i32) -> (i32, i32) {
    %c0_i32 = arith.constant 0 : i32
    %c0_i32_0 = arith.constant 0 : i32
    return %arg0, %c0_i32 : i32, i32
  }
}

module attributes {stable_mosaic.version = 11 : i64} {
  func.func @_scatt_kernel(%arg0: i32, %arg1: memref<2x64xbf16, #tpu.memory_space<vmem>>, %arg2: memref<2x8x64xbf16, #tpu.memory_space<vmem>>, %arg3: memref<2x8x1xf32, #tpu.memory_space<vmem>>, %arg4: memref<32x64xbf16, #tpu.memory_space<vmem>>, %arg5: memref<1x64xf32, #tpu.memory_space<vmem>>, %arg6: memref<64x4xbf16, #tpu.memory_space<vmem>>, %arg7: memref<1x4xf32, #tpu.memory_space<vmem>>, %arg8: memref<64x32xbf16, #tpu.memory_space<vmem>>, %arg9: memref<1x32xf32, #tpu.memory_space<vmem>>, %arg10: memref<4x32xbf16, #tpu.memory_space<vmem>>, %arg11: memref<2x32xbf16, #tpu.memory_space<vmem>>) attributes {dimension_semantics = [#tpu.dimension_semantics<parallel>], iteration_bounds = array<i64: 1>, scalar_prefetch = 0 : i64, scratch_operands = 0 : i64, tpu.core_type = #tpu.core_type<tc>, window_params = [{transform_indices = @transform_0, window_bounds = array<i64: 2, 64>}, {transform_indices = @transform_1, window_bounds = array<i64: 2, 8, 64>}, {transform_indices = @transform_2, window_bounds = array<i64: 2, 8, 1>}, {pipeline_mode = #tpu.pipeline_mode<synchronous>, transform_indices = @transform_3, window_bounds = array<i64: 32, 64>}, {pipeline_mode = #tpu.pipeline_mode<synchronous>, transform_indices = @transform_4, window_bounds = array<i64: 1, 64>}, {pipeline_mode = #tpu.pipeline_mode<synchronous>, transform_indices = @transform_5, window_bounds = array<i64: 64, 4>}, {pipeline_mode = #tpu.pipeline_mode<synchronous>, transform_indices = @transform_6, window_bounds = array<i64: 1, 4>}, {pipeline_mode = #tpu.pipeline_mode<synchronous>, transform_indices = @transform_7, window_bounds = array<i64: 64, 32>}, {pipeline_mode = #tpu.pipeline_mode<synchronous>, transform_indices = @transform_8, window_bounds = array<i64: 1, 32>}, {pipeline_mode = #tpu.pipeline_mode<synchronous>, transform_indices = @transform_9, window_bounds = array<i64: 4, 32>}, {transform_indices = @transform_10, window_bounds = array<i64: 2, 32>}]} {
    %c0 = arith.constant 0 : index
    %c0_0 = arith.constant 0 : index
    %0 = vector.load %arg1[%c0, %c0_0] : memref<2x64xbf16, #tpu.memory_space<vmem>>, vector<2x64xbf16>
    %c0_1 = arith.constant 0 : index
    %c0_2 = arith.constant 0 : index
    %c0_3 = arith.constant 0 : index
    %1 = vector.load %arg2[%c0_1, %c0_2, %c0_3] : memref<2x8x64xbf16, #tpu.memory_space<vmem>>, vector<2x8x64xbf16>
    %2 = vector.extract_strided_slice %0 {offsets = [0, 0], sizes = [2, 32], strides = [1, 1]} : vector<2x64xbf16> to vector<2x32xbf16>
    %3 = vector.extract_strided_slice %0 {offsets = [0, 32], sizes = [2, 32], strides = [1, 1]} : vector<2x64xbf16> to vector<2x32xbf16>
    %4 = arith.extf %3 : vector<2x32xbf16> to vector<2x32xf32>
    %5 = vector.extract_strided_slice %1 {offsets = [0, 0, 0], sizes = [2, 8, 32], strides = [1, 1, 1]} : vector<2x8x64xbf16> to vector<2x8x32xbf16>
    %6 = vector.extract_strided_slice %1 {offsets = [0, 0, 32], sizes = [2, 8, 32], strides = [1, 1, 1]} : vector<2x8x64xbf16> to vector<2x8x32xbf16>
    %7 = arith.extf %6 : vector<2x8x32xbf16> to vector<2x8x32xf32>
    %c0_4 = arith.constant 0 : index
    %c0_5 = arith.constant 0 : index
    %c0_6 = arith.constant 0 : index
    %8 = vector.load %arg3[%c0_4, %c0_5, %c0_6] : memref<2x8x1xf32, #tpu.memory_space<vmem>>, vector<2x8x1xf32>
    %9 = vector.shape_cast %2 : vector<2x32xbf16> to vector<2x1x32xbf16>
    %10 = vector.broadcast %9 : vector<2x1x32xbf16> to vector<2x8x32xbf16>
    %11 = arith.mulf %10, %5 : vector<2x8x32xbf16>
    %12 = vector.shape_cast %11 : vector<2x8x32xbf16> to vector<16x32xbf16>
    %c0_7 = arith.constant 0 : index
    %c0_8 = arith.constant 0 : index
    %13 = vector.load %arg4[%c0_7, %c0_8] : memref<32x64xbf16, #tpu.memory_space<vmem>>, vector<32x64xbf16>
    %cst = arith.constant dense<0.000000e+00> : vector<16x64xf32>
    %14 = tpu.matmul %12, %13, %cst {dimension_numbers = #tpu.dot_dimension_numbers<[1], [0], [0], [1], [0, 0, 1, 1], [], []>} : vector<16x32xbf16>, vector<32x64xbf16>, vector<16x64xf32> -> vector<16x64xf32>
    %c0_9 = arith.constant 0 : index
    %c0_10 = arith.constant 0 : index
    %15 = vector.load %arg5[%c0_9, %c0_10] : memref<1x64xf32, #tpu.memory_space<vmem>>, vector<1x64xf32>
    %16 = vector.broadcast %15 : vector<1x64xf32> to vector<16x64xf32>
    %17 = arith.addf %14, %16 : vector<16x64xf32>
    %cst_11 = arith.constant 0.000000e+00 : f32
    %18 = vector.broadcast %cst_11 : f32 to vector<16x64xf32>
    %19 = arith.maximumf %17, %18 : vector<16x64xf32>
    %20 = vector.shape_cast %19 : vector<16x64xf32> to vector<2x8x64xf32>
    %cst_12 = arith.constant dense<0.000000e+00> : vector<2x1xf32>
    %21 = vector.multi_reduction <add>, %8, %cst_12 [1] : vector<2x8x1xf32> to vector<2x1xf32>
    %cst_13 = arith.constant 9.99999997E-7 : f32
    %22 = vector.broadcast %cst_13 : f32 to vector<2x1xf32>
    %23 = arith.maximumf %21, %22 : vector<2x1xf32>
    %24 = vector.broadcast %8 : vector<2x8x1xf32> to vector<2x8x64xf32>
    %25 = arith.mulf %20, %24 : vector<2x8x64xf32>
    %cst_14 = arith.constant dense<0.000000e+00> : vector<2x64xf32>
    %26 = vector.multi_reduction <add>, %25, %cst_14 [1] : vector<2x8x64xf32> to vector<2x64xf32>
    %27 = vector.broadcast %23 : vector<2x1xf32> to vector<2x64xf32>
    %28 = arith.divf %26, %27 : vector<2x64xf32>
    %29 = arith.truncf %19 : vector<16x64xf32> to vector<16x64xbf16>
    %c0_15 = arith.constant 0 : index
    %c0_16 = arith.constant 0 : index
    %30 = vector.load %arg6[%c0_15, %c0_16] : memref<64x4xbf16, #tpu.memory_space<vmem>>, vector<64x4xbf16>
    %cst_17 = arith.constant dense<0.000000e+00> : vector<16x4xf32>
    %31 = tpu.matmul %29, %30, %cst_17 {dimension_numbers = #tpu.dot_dimension_numbers<[1], [0], [0], [1], [0, 0, 1, 1], [], []>} : vector<16x64xbf16>, vector<64x4xbf16>, vector<16x4xf32> -> vector<16x4xf32>
    %32 = vector.shape_cast %31 : vector<16x4xf32> to vector<2x8x4xf32>
    %c0_18 = arith.constant 0 : index
    %c0_19 = arith.constant 0 : index
    %33 = vector.load %arg7[%c0_18, %c0_19] : memref<1x4xf32, #tpu.memory_space<vmem>>, vector<1x4xf32>
    %34 = vector.shape_cast %33 : vector<1x4xf32> to vector<1x1x4xf32>
    %35 = vector.broadcast %34 : vector<1x1x4xf32> to vector<2x8x4xf32>
    %36 = arith.addf %32, %35 : vector<2x8x4xf32>
    %cst_20 = arith.constant 0.000000e+00 : f32
    %37 = vector.broadcast %cst_20 : f32 to vector<2x8x1xf32>
    %38 = arith.cmpf ogt, %8, %37 : vector<2x8x1xf32>
    %cst_21 = arith.constant -1.000000e+09 : f32
    %39 = vector.shape_cast %38 : vector<2x8x1xi1> to vector<2x8x1xi1>
    %40 = vector.broadcast %39 : vector<2x8x1xi1> to vector<2x8x4xi1>
    %41 = vector.broadcast %cst_21 : f32 to vector<2x8x4xf32>
    %42 = arith.select %40, %36, %41 : vector<2x8x4xi1>, vector<2x8x4xf32>
    %cst_22 = arith.constant dense<0xFF800000> : vector<2x4xf32>
    %43 = vector.multi_reduction <maximumf>, %42, %cst_22 [1] : vector<2x8x4xf32> to vector<2x4xf32>
    %44 = vector.shape_cast %43 : vector<2x4xf32> to vector<2x1x4xf32>
    %45 = vector.broadcast %44 : vector<2x1x4xf32> to vector<2x8x4xf32>
    %46 = arith.subf %42, %45 : vector<2x8x4xf32>
    %47 = math.exp %46 : vector<2x8x4xf32>
    %48 = vector.broadcast %8 : vector<2x8x1xf32> to vector<2x8x4xf32>
    %49 = arith.mulf %47, %48 : vector<2x8x4xf32>
    %cst_23 = arith.constant dense<0.000000e+00> : vector<2x4xf32>
    %50 = vector.multi_reduction <add>, %49, %cst_23 [1] : vector<2x8x4xf32> to vector<2x4xf32>
    %51 = vector.shape_cast %50 : vector<2x4xf32> to vector<2x1x4xf32>
    %cst_24 = arith.constant 9.99999971E-10 : f32
    %52 = vector.broadcast %cst_24 : f32 to vector<2x1x4xf32>
    %53 = arith.maximumf %51, %52 : vector<2x1x4xf32>
    %54 = vector.broadcast %53 : vector<2x1x4xf32> to vector<2x8x4xf32>
    %55 = arith.divf %49, %54 : vector<2x8x4xf32>
    %56 = arith.truncf %28 : vector<2x64xf32> to vector<2x64xbf16>
    %c0_25 = arith.constant 0 : index
    %c0_26 = arith.constant 0 : index
    %57 = vector.load %arg8[%c0_25, %c0_26] : memref<64x32xbf16, #tpu.memory_space<vmem>>, vector<64x32xbf16>
    %cst_27 = arith.constant dense<0.000000e+00> : vector<2x32xf32>
    %58 = tpu.matmul %56, %57, %cst_27 {dimension_numbers = #tpu.dot_dimension_numbers<[1], [0], [0], [1], [0, 0, 1, 1], [], []>} : vector<2x64xbf16>, vector<64x32xbf16>, vector<2x32xf32> -> vector<2x32xf32>
    %c0_28 = arith.constant 0 : index
    %c0_29 = arith.constant 0 : index
    %59 = vector.load %arg9[%c0_28, %c0_29] : memref<1x32xf32, #tpu.memory_space<vmem>>, vector<1x32xf32>
    %60 = vector.broadcast %59 : vector<1x32xf32> to vector<2x32xf32>
    %61 = arith.addf %58, %60 : vector<2x32xf32>
    %62 = arith.negf %61 : vector<2x32xf32>
    %63 = math.exp %62 : vector<2x32xf32>
    %cst_30 = arith.constant 1.000000e+00 : f32
    %64 = vector.broadcast %cst_30 : f32 to vector<2x32xf32>
    %65 = arith.addf %64, %63 : vector<2x32xf32>
    %66 = arith.divf %64, %65 : vector<2x32xf32>
    %67 = vector.shape_cast %55 : vector<2x8x4xf32> to vector<16x4xf32>
    %68 = arith.truncf %67 : vector<16x4xf32> to vector<16x4xbf16>
    %c0_31 = arith.constant 0 : index
    %c0_32 = arith.constant 0 : index
    %69 = vector.load %arg10[%c0_31, %c0_32] : memref<4x32xbf16, #tpu.memory_space<vmem>>, vector<4x32xbf16>
    %cst_33 = arith.constant dense<0.000000e+00> : vector<16x32xf32>
    %70 = tpu.matmul %68, %69, %cst_33 {dimension_numbers = #tpu.dot_dimension_numbers<[1], [0], [0], [1], [0, 0, 1, 1], [], []>} : vector<16x4xbf16>, vector<4x32xbf16>, vector<16x32xf32> -> vector<16x32xf32>
    %71 = vector.shape_cast %70 : vector<16x32xf32> to vector<2x8x32xf32>
    %72 = arith.mulf %71, %7 : vector<2x8x32xf32>
    %cst_34 = arith.constant dense<0.000000e+00> : vector<2x32xf32>
    %73 = vector.multi_reduction <add>, %72, %cst_34 [1] : vector<2x8x32xf32> to vector<2x32xf32>
    %74 = arith.mulf %4, %66 : vector<2x32xf32>
    %75 = arith.mulf %74, %73 : vector<2x32xf32>
    %76 = arith.truncf %75 : vector<2x32xf32> to vector<2x32xbf16>
    %c0_35 = arith.constant 0 : index
    %c0_36 = arith.constant 0 : index
    %77 = vector.load %arg11[%c0_35, %c0_36] : memref<2x32xbf16, #tpu.memory_space<vmem>>, vector<2x32xbf16>
    tpu.vector_store %arg11[%c0_35, %c0_36], %76 {strides = array<i32>} : memref<2x32xbf16, #tpu.memory_space<vmem>>, vector<2x32xbf16>,
    return
  }
  func.func @transform_0(%arg0: i32) -> (i32, i32) {
    %c0_i32 = arith.constant 0 : i32
    %c0_i32_0 = arith.constant 0 : i32
    return %arg0, %c0_i32 : i32, i32
  }
  func.func @transform_1(%arg0: i32) -> (i32, i32, i32) {
    %c0_i32 = arith.constant 0 : i32
    %c0_i32_0 = arith.constant 0 : i32
    %c0_i32_1 = arith.constant 0 : i32
    return %arg0, %c0_i32, %c0_i32_0 : i32, i32, i32
  }
  func.func @transform_2(%arg0: i32) -> (i32, i32, i32) {
    %c0_i32 = arith.constant 0 : i32
    %c0_i32_0 = arith.constant 0 : i32
    %c0_i32_1 = arith.constant 0 : i32
    return %arg0, %c0_i32, %c0_i32_0 : i32, i32, i32
  }
  func.func @transform_3(%arg0: i32) -> (i32, i32) {
    %c0_i32 = arith.constant 0 : i32
    %c0_i32_0 = arith.constant 0 : i32
    %c0_i32_1 = arith.constant 0 : i32
    return %c0_i32, %c0_i32_0 : i32, i32
  }
  func.func @transform_4(%arg0: i32) -> (i32, i32) {
    %c0_i32 = arith.constant 0 : i32
    %c0_i32_0 = arith.constant 0 : i32
    %c0_i32_1 = arith.constant 0 : i32
    return %c0_i32, %c0_i32_0 : i32, i32
  }
  func.func @transform_5(%arg0: i32) -> (i32, i32) {
    %c0_i32 = arith.constant 0 : i32
    %c0_i32_0 = arith.constant 0 : i32
    %c0_i32_1 = arith.constant 0 : i32
    return %c0_i32, %c0_i32_0 : i32, i32
  }
  func.func @transform_6(%arg0: i32) -> (i32, i32) {
    %c0_i32 = arith.constant 0 : i32
    %c0_i32_0 = arith.constant 0 : i32
    %c0_i32_1 = arith.constant 0 : i32
    return %c0_i32, %c0_i32_0 : i32, i32
  }
  func.func @transform_7(%arg0: i32) -> (i32, i32) {
    %c0_i32 = arith.constant 0 : i32
    %c0_i32_0 = arith.constant 0 : i32
    %c0_i32_1 = arith.constant 0 : i32
    return %c0_i32, %c0_i32_0 : i32, i32
  }
  func.func @transform_8(%arg0: i32) -> (i32, i32) {
    %c0_i32 = arith.constant 0 : i32
    %c0_i32_0 = arith.constant 0 : i32
    %c0_i32_1 = arith.constant 0 : i32
    return %c0_i32, %c0_i32_0 : i32, i32
  }
  func.func @transform_9(%arg0: i32) -> (i32, i32) {
    %c0_i32 = arith.constant 0 : i32
    %c0_i32_0 = arith.constant 0 : i32
    %c0_i32_1 = arith.constant 0 : i32
    return %c0_i32, %c0_i32_0 : i32, i32
  }
  func.func @transform_10(%arg0: i32) -> (i32, i32) {
    %c0_i32 = arith.constant 0 : i32
    %c0_i32_0 = arith.constant 0 : i32
    return %arg0, %c0_i32 : i32, i32
  }
}

module attributes {stable_mosaic.version = 11 : i64} {
  func.func @_bifeat_kernel(%arg0: i32, %arg1: memref<2x8x32xbf16, #tpu.memory_space<vmem>>, %arg2: memref<2x32xbf16, #tpu.memory_space<vmem>>, %arg3: memref<32x32xbf16, #tpu.memory_space<vmem>>, %arg4: memref<32x32xbf16, #tpu.memory_space<vmem>>, %arg5: memref<1x32xf32, #tpu.memory_space<vmem>>, %arg6: memref<1x32xf32, #tpu.memory_space<vmem>>, %arg7: memref<1x32xf32, #tpu.memory_space<vmem>>, %arg8: memref<2x8x32xbf16, #tpu.memory_space<vmem>>) attributes {dimension_semantics = [#tpu.dimension_semantics<parallel>], iteration_bounds = array<i64: 1>, scalar_prefetch = 0 : i64, scratch_operands = 0 : i64, tpu.core_type = #tpu.core_type<tc>, window_params = [{transform_indices = @transform_0, window_bounds = array<i64: 2, 8, 32>}, {transform_indices = @transform_1, window_bounds = array<i64: 2, 32>}, {pipeline_mode = #tpu.pipeline_mode<synchronous>, transform_indices = @transform_2, window_bounds = array<i64: 32, 32>}, {pipeline_mode = #tpu.pipeline_mode<synchronous>, transform_indices = @transform_3, window_bounds = array<i64: 32, 32>}, {pipeline_mode = #tpu.pipeline_mode<synchronous>, transform_indices = @transform_4, window_bounds = array<i64: 1, 32>}, {pipeline_mode = #tpu.pipeline_mode<synchronous>, transform_indices = @transform_5, window_bounds = array<i64: 1, 32>}, {pipeline_mode = #tpu.pipeline_mode<synchronous>, transform_indices = @transform_6, window_bounds = array<i64: 1, 32>}, {transform_indices = @transform_7, window_bounds = array<i64: 2, 8, 32>}]} {
    %c0 = arith.constant 0 : index
    %c0_0 = arith.constant 0 : index
    %c0_1 = arith.constant 0 : index
    %0 = vector.load %arg1[%c0, %c0_0, %c0_1] : memref<2x8x32xbf16, #tpu.memory_space<vmem>>, vector<2x8x32xbf16>
    %c0_2 = arith.constant 0 : index
    %c0_3 = arith.constant 0 : index
    %1 = vector.load %arg2[%c0_2, %c0_3] : memref<2x32xbf16, #tpu.memory_space<vmem>>, vector<2x32xbf16>
    %2 = vector.shape_cast %0 : vector<2x8x32xbf16> to vector<16x32xbf16>
    %c0_4 = arith.constant 0 : index
    %c0_5 = arith.constant 0 : index
    %3 = vector.load %arg4[%c0_4, %c0_5] : memref<32x32xbf16, #tpu.memory_space<vmem>>, vector<32x32xbf16>
    %cst = arith.constant dense<0.000000e+00> : vector<16x32xf32>
    %4 = tpu.matmul %2, %3, %cst {dimension_numbers = #tpu.dot_dimension_numbers<[1], [0], [0], [1], [0, 0, 1, 1], [], []>} : vector<16x32xbf16>, vector<32x32xbf16>, vector<16x32xf32> -> vector<16x32xf32>
    %5 = vector.shape_cast %4 : vector<16x32xf32> to vector<2x8x32xf32>
    %c0_6 = arith.constant 0 : index
    %c0_7 = arith.constant 0 : index
    %6 = vector.load %arg3[%c0_6, %c0_7] : memref<32x32xbf16, #tpu.memory_space<vmem>>, vector<32x32xbf16>
    %cst_8 = arith.constant dense<0.000000e+00> : vector<2x32xf32>
    %7 = tpu.matmul %1, %6, %cst_8 {dimension_numbers = #tpu.dot_dimension_numbers<[1], [0], [0], [1], [0, 0, 1, 1], [], []>} : vector<2x32xbf16>, vector<32x32xbf16>, vector<2x32xf32> -> vector<2x32xf32>
    %8 = vector.shape_cast %7 : vector<2x32xf32> to vector<2x1x32xf32>
    %9 = vector.broadcast %8 : vector<2x1x32xf32> to vector<2x8x32xf32>
    %10 = arith.addf %5, %9 : vector<2x8x32xf32>
    %c0_9 = arith.constant 0 : index
    %c0_10 = arith.constant 0 : index
    %11 = vector.load %arg5[%c0_9, %c0_10] : memref<1x32xf32, #tpu.memory_space<vmem>>, vector<1x32xf32>
    %12 = vector.shape_cast %11 : vector<1x32xf32> to vector<1x1x32xf32>
    %13 = vector.broadcast %12 : vector<1x1x32xf32> to vector<2x8x32xf32>
    %14 = arith.addf %10, %13 : vector<2x8x32xf32>
    %cst_11 = arith.constant 0.000000e+00 : f32
    %15 = vector.broadcast %cst_11 : f32 to vector<2x8x32xf32>
    %16 = arith.maximumf %14, %15 : vector<2x8x32xf32>
    %17 = arith.extf %0 : vector<2x8x32xbf16> to vector<2x8x32xf32>
    %18 = arith.addf %16, %17 : vector<2x8x32xf32>
    %cst_12 = arith.constant dense<0.000000e+00> : vector<2x8xf32>
    %19 = vector.multi_reduction <add>, %18, %cst_12 [2] : vector<2x8x32xf32> to vector<2x8xf32>
    %20 = vector.shape_cast %19 : vector<2x8xf32> to vector<2x8x1xf32>
    %cst_13 = arith.constant 3.200000e+01 : f32
    %21 = vector.broadcast %cst_13 : f32 to vector<2x8x1xf32>
    %22 = arith.divf %20, %21 : vector<2x8x1xf32>
    %23 = vector.broadcast %22 : vector<2x8x1xf32> to vector<2x8x32xf32>
    %24 = arith.subf %18, %23 : vector<2x8x32xf32>
    %25 = arith.mulf %24, %24 : vector<2x8x32xf32>
    %cst_14 = arith.constant dense<0.000000e+00> : vector<2x8xf32>
    %26 = vector.multi_reduction <add>, %25, %cst_14 [2] : vector<2x8x32xf32> to vector<2x8xf32>
    %27 = vector.shape_cast %26 : vector<2x8xf32> to vector<2x8x1xf32>
    %cst_15 = arith.constant 3.200000e+01 : f32
    %28 = vector.broadcast %cst_15 : f32 to vector<2x8x1xf32>
    %29 = arith.divf %27, %28 : vector<2x8x1xf32>
    %30 = vector.broadcast %22 : vector<2x8x1xf32> to vector<2x8x32xf32>
    %31 = arith.subf %18, %30 : vector<2x8x32xf32>
    %cst_16 = arith.constant 9.99999974E-6 : f32
    %32 = vector.broadcast %cst_16 : f32 to vector<2x8x1xf32>
    %33 = arith.addf %29, %32 : vector<2x8x1xf32>
    %34 = math.rsqrt %33 : vector<2x8x1xf32>
    %35 = vector.broadcast %34 : vector<2x8x1xf32> to vector<2x8x32xf32>
    %36 = arith.mulf %31, %35 : vector<2x8x32xf32>
    %c0_17 = arith.constant 0 : index
    %c0_18 = arith.constant 0 : index
    %37 = vector.load %arg6[%c0_17, %c0_18] : memref<1x32xf32, #tpu.memory_space<vmem>>, vector<1x32xf32>
    %38 = vector.shape_cast %37 : vector<1x32xf32> to vector<1x1x32xf32>
    %39 = vector.broadcast %38 : vector<1x1x32xf32> to vector<2x8x32xf32>
    %40 = arith.mulf %36, %39 : vector<2x8x32xf32>
    %c0_19 = arith.constant 0 : index
    %c0_20 = arith.constant 0 : index
    %41 = vector.load %arg7[%c0_19, %c0_20] : memref<1x32xf32, #tpu.memory_space<vmem>>, vector<1x32xf32>
    %42 = vector.shape_cast %41 : vector<1x32xf32> to vector<1x1x32xf32>
    %43 = vector.broadcast %42 : vector<1x1x32xf32> to vector<2x8x32xf32>
    %44 = arith.addf %40, %43 : vector<2x8x32xf32>
    %45 = arith.truncf %44 : vector<2x8x32xf32> to vector<2x8x32xbf16>
    %c0_21 = arith.constant 0 : index
    %c0_22 = arith.constant 0 : index
    %c0_23 = arith.constant 0 : index
    %46 = vector.load %arg8[%c0_21, %c0_22, %c0_23] : memref<2x8x32xbf16, #tpu.memory_space<vmem>>, vector<2x8x32xbf16>
    tpu.vector_store %arg8[%c0_21, %c0_22, %c0_23], %45 {strides = array<i32>} : memref<2x8x32xbf16, #tpu.memory_space<vmem>>, vector<2x8x32xbf16>,
    return
  }
  func.func @transform_0(%arg0: i32) -> (i32, i32, i32) {
    %c0_i32 = arith.constant 0 : i32
    %c0_i32_0 = arith.constant 0 : i32
    %c0_i32_1 = arith.constant 0 : i32
    return %arg0, %c0_i32, %c0_i32_0 : i32, i32, i32
  }
  func.func @transform_1(%arg0: i32) -> (i32, i32) {
    %c0_i32 = arith.constant 0 : i32
    %c0_i32_0 = arith.constant 0 : i32
    return %arg0, %c0_i32 : i32, i32
  }
  func.func @transform_2(%arg0: i32) -> (i32, i32) {
    %c0_i32 = arith.constant 0 : i32
    %c0_i32_0 = arith.constant 0 : i32
    %c0_i32_1 = arith.constant 0 : i32
    return %c0_i32, %c0_i32_0 : i32, i32
  }
  func.func @transform_3(%arg0: i32) -> (i32, i32) {
    %c0_i32 = arith.constant 0 : i32
    %c0_i32_0 = arith.constant 0 : i32
    %c0_i32_1 = arith.constant 0 : i32
    return %c0_i32, %c0_i32_0 : i32, i32
  }
  func.func @transform_4(%arg0: i32) -> (i32, i32) {
    %c0_i32 = arith.constant 0 : i32
    %c0_i32_0 = arith.constant 0 : i32
    %c0_i32_1 = arith.constant 0 : i32
    return %c0_i32, %c0_i32_0 : i32, i32
  }
  func.func @transform_5(%arg0: i32) -> (i32, i32) {
    %c0_i32 = arith.constant 0 : i32
    %c0_i32_0 = arith.constant 0 : i32
    %c0_i32_1 = arith.constant 0 : i32
    return %c0_i32, %c0_i32_0 : i32, i32
  }
  func.func @transform_6(%arg0: i32) -> (i32, i32) {
    %c0_i32 = arith.constant 0 : i32
    %c0_i32_0 = arith.constant 0 : i32
    %c0_i32_1 = arith.constant 0 : i32
    return %c0_i32, %c0_i32_0 : i32, i32
  }
  func.func @transform_7(%arg0: i32) -> (i32, i32, i32) {
    %c0_i32 = arith.constant 0 : i32
    %c0_i32_0 = arith.constant 0 : i32
    %c0_i32_1 = arith.constant 0 : i32
    return %arg0, %c0_i32, %c0_i32_0 : i32, i32, i32
  }
}

module attributes {stable_mosaic.version = 11 : i64} {
  func.func @_bifeat_kernel(%arg0: i32, %arg1: memref<2x8x32xbf16, #tpu.memory_space<vmem>>, %arg2: memref<2x32xbf16, #tpu.memory_space<vmem>>, %arg3: memref<32x32xbf16, #tpu.memory_space<vmem>>, %arg4: memref<32x32xbf16, #tpu.memory_space<vmem>>, %arg5: memref<1x32xf32, #tpu.memory_space<vmem>>, %arg6: memref<1x32xf32, #tpu.memory_space<vmem>>, %arg7: memref<1x32xf32, #tpu.memory_space<vmem>>, %arg8: memref<2x8x32xbf16, #tpu.memory_space<vmem>>) attributes {dimension_semantics = [#tpu.dimension_semantics<parallel>], iteration_bounds = array<i64: 1>, scalar_prefetch = 0 : i64, scratch_operands = 0 : i64, tpu.core_type = #tpu.core_type<tc>, window_params = [{transform_indices = @transform_0, window_bounds = array<i64: 2, 8, 32>}, {transform_indices = @transform_1, window_bounds = array<i64: 2, 32>}, {pipeline_mode = #tpu.pipeline_mode<synchronous>, transform_indices = @transform_2, window_bounds = array<i64: 32, 32>}, {pipeline_mode = #tpu.pipeline_mode<synchronous>, transform_indices = @transform_3, window_bounds = array<i64: 32, 32>}, {pipeline_mode = #tpu.pipeline_mode<synchronous>, transform_indices = @transform_4, window_bounds = array<i64: 1, 32>}, {pipeline_mode = #tpu.pipeline_mode<synchronous>, transform_indices = @transform_5, window_bounds = array<i64: 1, 32>}, {pipeline_mode = #tpu.pipeline_mode<synchronous>, transform_indices = @transform_6, window_bounds = array<i64: 1, 32>}, {transform_indices = @transform_7, window_bounds = array<i64: 2, 8, 32>}]} {
    %c0 = arith.constant 0 : index
    %c0_0 = arith.constant 0 : index
    %c0_1 = arith.constant 0 : index
    %0 = vector.load %arg1[%c0, %c0_0, %c0_1] : memref<2x8x32xbf16, #tpu.memory_space<vmem>>, vector<2x8x32xbf16>
    %c0_2 = arith.constant 0 : index
    %c0_3 = arith.constant 0 : index
    %1 = vector.load %arg2[%c0_2, %c0_3] : memref<2x32xbf16, #tpu.memory_space<vmem>>, vector<2x32xbf16>
    %2 = vector.shape_cast %0 : vector<2x8x32xbf16> to vector<16x32xbf16>
    %c0_4 = arith.constant 0 : index
    %c0_5 = arith.constant 0 : index
    %3 = vector.load %arg4[%c0_4, %c0_5] : memref<32x32xbf16, #tpu.memory_space<vmem>>, vector<32x32xbf16>
    %cst = arith.constant dense<0.000000e+00> : vector<16x32xf32>
    %4 = tpu.matmul %2, %3, %cst {dimension_numbers = #tpu.dot_dimension_numbers<[1], [0], [0], [1], [0, 0, 1, 1], [], []>} : vector<16x32xbf16>, vector<32x32xbf16>, vector<16x32xf32> -> vector<16x32xf32>
    %5 = vector.shape_cast %4 : vector<16x32xf32> to vector<2x8x32xf32>
    %c0_6 = arith.constant 0 : index
    %c0_7 = arith.constant 0 : index
    %6 = vector.load %arg3[%c0_6, %c0_7] : memref<32x32xbf16, #tpu.memory_space<vmem>>, vector<32x32xbf16>
    %cst_8 = arith.constant dense<0.000000e+00> : vector<2x32xf32>
    %7 = tpu.matmul %1, %6, %cst_8 {dimension_numbers = #tpu.dot_dimension_numbers<[1], [0], [0], [1], [0, 0, 1, 1], [], []>} : vector<2x32xbf16>, vector<32x32xbf16>, vector<2x32xf32> -> vector<2x32xf32>
    %8 = vector.shape_cast %7 : vector<2x32xf32> to vector<2x1x32xf32>
    %9 = vector.broadcast %8 : vector<2x1x32xf32> to vector<2x8x32xf32>
    %10 = arith.addf %5, %9 : vector<2x8x32xf32>
    %c0_9 = arith.constant 0 : index
    %c0_10 = arith.constant 0 : index
    %11 = vector.load %arg5[%c0_9, %c0_10] : memref<1x32xf32, #tpu.memory_space<vmem>>, vector<1x32xf32>
    %12 = vector.shape_cast %11 : vector<1x32xf32> to vector<1x1x32xf32>
    %13 = vector.broadcast %12 : vector<1x1x32xf32> to vector<2x8x32xf32>
    %14 = arith.addf %10, %13 : vector<2x8x32xf32>
    %cst_11 = arith.constant 0.000000e+00 : f32
    %15 = vector.broadcast %cst_11 : f32 to vector<2x8x32xf32>
    %16 = arith.maximumf %14, %15 : vector<2x8x32xf32>
    %17 = arith.extf %0 : vector<2x8x32xbf16> to vector<2x8x32xf32>
    %18 = arith.addf %16, %17 : vector<2x8x32xf32>
    %cst_12 = arith.constant dense<0.000000e+00> : vector<2x8xf32>
    %19 = vector.multi_reduction <add>, %18, %cst_12 [2] : vector<2x8x32xf32> to vector<2x8xf32>
    %20 = vector.shape_cast %19 : vector<2x8xf32> to vector<2x8x1xf32>
    %cst_13 = arith.constant 3.200000e+01 : f32
    %21 = vector.broadcast %cst_13 : f32 to vector<2x8x1xf32>
    %22 = arith.divf %20, %21 : vector<2x8x1xf32>
    %23 = vector.broadcast %22 : vector<2x8x1xf32> to vector<2x8x32xf32>
    %24 = arith.subf %18, %23 : vector<2x8x32xf32>
    %25 = arith.mulf %24, %24 : vector<2x8x32xf32>
    %cst_14 = arith.constant dense<0.000000e+00> : vector<2x8xf32>
    %26 = vector.multi_reduction <add>, %25, %cst_14 [2] : vector<2x8x32xf32> to vector<2x8xf32>
    %27 = vector.shape_cast %26 : vector<2x8xf32> to vector<2x8x1xf32>
    %cst_15 = arith.constant 3.200000e+01 : f32
    %28 = vector.broadcast %cst_15 : f32 to vector<2x8x1xf32>
    %29 = arith.divf %27, %28 : vector<2x8x1xf32>
    %30 = vector.broadcast %22 : vector<2x8x1xf32> to vector<2x8x32xf32>
    %31 = arith.subf %18, %30 : vector<2x8x32xf32>
    %cst_16 = arith.constant 9.99999974E-6 : f32
    %32 = vector.broadcast %cst_16 : f32 to vector<2x8x1xf32>
    %33 = arith.addf %29, %32 : vector<2x8x1xf32>
    %34 = math.rsqrt %33 : vector<2x8x1xf32>
    %35 = vector.broadcast %34 : vector<2x8x1xf32> to vector<2x8x32xf32>
    %36 = arith.mulf %31, %35 : vector<2x8x32xf32>
    %c0_17 = arith.constant 0 : index
    %c0_18 = arith.constant 0 : index
    %37 = vector.load %arg6[%c0_17, %c0_18] : memref<1x32xf32, #tpu.memory_space<vmem>>, vector<1x32xf32>
    %38 = vector.shape_cast %37 : vector<1x32xf32> to vector<1x1x32xf32>
    %39 = vector.broadcast %38 : vector<1x1x32xf32> to vector<2x8x32xf32>
    %40 = arith.mulf %36, %39 : vector<2x8x32xf32>
    %c0_19 = arith.constant 0 : index
    %c0_20 = arith.constant 0 : index
    %41 = vector.load %arg7[%c0_19, %c0_20] : memref<1x32xf32, #tpu.memory_space<vmem>>, vector<1x32xf32>
    %42 = vector.shape_cast %41 : vector<1x32xf32> to vector<1x1x32xf32>
    %43 = vector.broadcast %42 : vector<1x1x32xf32> to vector<2x8x32xf32>
    %44 = arith.addf %40, %43 : vector<2x8x32xf32>
    %45 = arith.truncf %44 : vector<2x8x32xf32> to vector<2x8x32xbf16>
    %c0_21 = arith.constant 0 : index
    %c0_22 = arith.constant 0 : index
    %c0_23 = arith.constant 0 : index
    %46 = vector.load %arg8[%c0_21, %c0_22, %c0_23] : memref<2x8x32xbf16, #tpu.memory_space<vmem>>, vector<2x8x32xbf16>
    tpu.vector_store %arg8[%c0_21, %c0_22, %c0_23], %45 {strides = array<i32>} : memref<2x8x32xbf16, #tpu.memory_space<vmem>>, vector<2x8x32xbf16>,
    return
  }
  func.func @transform_0(%arg0: i32) -> (i32, i32, i32) {
    %c0_i32 = arith.constant 0 : i32
    %c0_i32_0 = arith.constant 0 : i32
    %c0_i32_1 = arith.constant 0 : i32
    return %arg0, %c0_i32, %c0_i32_0 : i32, i32, i32
  }
  func.func @transform_1(%arg0: i32) -> (i32, i32) {
    %c0_i32 = arith.constant 0 : i32
    %c0_i32_0 = arith.constant 0 : i32
    return %arg0, %c0_i32 : i32, i32
  }
  func.func @transform_2(%arg0: i32) -> (i32, i32) {
    %c0_i32 = arith.constant 0 : i32
    %c0_i32_0 = arith.constant 0 : i32
    %c0_i32_1 = arith.constant 0 : i32
    return %c0_i32, %c0_i32_0 : i32, i32
  }
  func.func @transform_3(%arg0: i32) -> (i32, i32) {
    %c0_i32 = arith.constant 0 : i32
    %c0_i32_0 = arith.constant 0 : i32
    %c0_i32_1 = arith.constant 0 : i32
    return %c0_i32, %c0_i32_0 : i32, i32
  }
  func.func @transform_4(%arg0: i32) -> (i32, i32) {
    %c0_i32 = arith.constant 0 : i32
    %c0_i32_0 = arith.constant 0 : i32
    %c0_i32_1 = arith.constant 0 : i32
    return %c0_i32, %c0_i32_0 : i32, i32
  }
  func.func @transform_5(%arg0: i32) -> (i32, i32) {
    %c0_i32 = arith.constant 0 : i32
    %c0_i32_0 = arith.constant 0 : i32
    %c0_i32_1 = arith.constant 0 : i32
    return %c0_i32, %c0_i32_0 : i32, i32
  }
  func.func @transform_6(%arg0: i32) -> (i32, i32) {
    %c0_i32 = arith.constant 0 : i32
    %c0_i32_0 = arith.constant 0 : i32
    %c0_i32_1 = arith.constant 0 : i32
    return %c0_i32, %c0_i32_0 : i32, i32
  }
  func.func @transform_7(%arg0: i32) -> (i32, i32, i32) {
    %c0_i32 = arith.constant 0 : i32
    %c0_i32_0 = arith.constant 0 : i32
    %c0_i32_1 = arith.constant 0 : i32
    return %arg0, %c0_i32, %c0_i32_0 : i32, i32, i32
  }
}

module attributes {stable_mosaic.version = 11 : i64} {
  func.func @_linear_ln_kernel(%arg0: i32, %arg1: memref<2x96xbf16, #tpu.memory_space<vmem>>, %arg2: memref<96x32xbf16, #tpu.memory_space<vmem>>, %arg3: memref<1x32xf32, #tpu.memory_space<vmem>>, %arg4: memref<1x32xf32, #tpu.memory_space<vmem>>, %arg5: memref<1x32xf32, #tpu.memory_space<vmem>>, %arg6: memref<2x32xbf16, #tpu.memory_space<vmem>>) attributes {dimension_semantics = [#tpu.dimension_semantics<parallel>], iteration_bounds = array<i64: 1>, scalar_prefetch = 0 : i64, scratch_operands = 0 : i64, tpu.core_type = #tpu.core_type<tc>, window_params = [{transform_indices = @transform_0, window_bounds = array<i64: 2, 96>}, {pipeline_mode = #tpu.pipeline_mode<synchronous>, transform_indices = @transform_1, window_bounds = array<i64: 96, 32>}, {pipeline_mode = #tpu.pipeline_mode<synchronous>, transform_indices = @transform_2, window_bounds = array<i64: 1, 32>}, {pipeline_mode = #tpu.pipeline_mode<synchronous>, transform_indices = @transform_3, window_bounds = array<i64: 1, 32>}, {pipeline_mode = #tpu.pipeline_mode<synchronous>, transform_indices = @transform_4, window_bounds = array<i64: 1, 32>}, {transform_indices = @transform_5, window_bounds = array<i64: 2, 32>}]} {
    %c0 = arith.constant 0 : index
    %c0_0 = arith.constant 0 : index
    %0 = vector.load %arg1[%c0, %c0_0] : memref<2x96xbf16, #tpu.memory_space<vmem>>, vector<2x96xbf16>
    %c0_1 = arith.constant 0 : index
    %c0_2 = arith.constant 0 : index
    %1 = vector.load %arg2[%c0_1, %c0_2] : memref<96x32xbf16, #tpu.memory_space<vmem>>, vector<96x32xbf16>
    %cst = arith.constant dense<0.000000e+00> : vector<2x32xf32>
    %2 = tpu.matmul %0, %1, %cst {dimension_numbers = #tpu.dot_dimension_numbers<[1], [0], [0], [1], [0, 0, 1, 1], [], []>} : vector<2x96xbf16>, vector<96x32xbf16>, vector<2x32xf32> -> vector<2x32xf32>
    %c0_3 = arith.constant 0 : index
    %c0_4 = arith.constant 0 : index
    %3 = vector.load %arg3[%c0_3, %c0_4] : memref<1x32xf32, #tpu.memory_space<vmem>>, vector<1x32xf32>
    %4 = vector.broadcast %3 : vector<1x32xf32> to vector<2x32xf32>
    %5 = arith.addf %2, %4 : vector<2x32xf32>
    %cst_5 = arith.constant dense<0.000000e+00> : vector<2xf32>
    %6 = vector.multi_reduction <add>, %5, %cst_5 [1] : vector<2x32xf32> to vector<2xf32>
    %7 = vector.shape_cast %6 : vector<2xf32> to vector<2x1xf32>
    %cst_6 = arith.constant 3.200000e+01 : f32
    %8 = vector.broadcast %cst_6 : f32 to vector<2x1xf32>
    %9 = arith.divf %7, %8 : vector<2x1xf32>
    %10 = vector.broadcast %9 : vector<2x1xf32> to vector<2x32xf32>
    %11 = arith.subf %5, %10 : vector<2x32xf32>
    %12 = arith.mulf %11, %11 : vector<2x32xf32>
    %cst_7 = arith.constant dense<0.000000e+00> : vector<2xf32>
    %13 = vector.multi_reduction <add>, %12, %cst_7 [1] : vector<2x32xf32> to vector<2xf32>
    %14 = vector.shape_cast %13 : vector<2xf32> to vector<2x1xf32>
    %cst_8 = arith.constant 3.200000e+01 : f32
    %15 = vector.broadcast %cst_8 : f32 to vector<2x1xf32>
    %16 = arith.divf %14, %15 : vector<2x1xf32>
    %17 = vector.broadcast %9 : vector<2x1xf32> to vector<2x32xf32>
    %18 = arith.subf %5, %17 : vector<2x32xf32>
    %cst_9 = arith.constant 9.99999974E-6 : f32
    %19 = vector.broadcast %cst_9 : f32 to vector<2x1xf32>
    %20 = arith.addf %16, %19 : vector<2x1xf32>
    %21 = math.rsqrt %20 : vector<2x1xf32>
    %22 = vector.broadcast %21 : vector<2x1xf32> to vector<2x32xf32>
    %23 = arith.mulf %18, %22 : vector<2x32xf32>
    %c0_10 = arith.constant 0 : index
    %c0_11 = arith.constant 0 : index
    %24 = vector.load %arg4[%c0_10, %c0_11] : memref<1x32xf32, #tpu.memory_space<vmem>>, vector<1x32xf32>
    %25 = vector.broadcast %24 : vector<1x32xf32> to vector<2x32xf32>
    %26 = arith.mulf %23, %25 : vector<2x32xf32>
    %c0_12 = arith.constant 0 : index
    %c0_13 = arith.constant 0 : index
    %27 = vector.load %arg5[%c0_12, %c0_13] : memref<1x32xf32, #tpu.memory_space<vmem>>, vector<1x32xf32>
    %28 = vector.broadcast %27 : vector<1x32xf32> to vector<2x32xf32>
    %29 = arith.addf %26, %28 : vector<2x32xf32>
    %30 = arith.truncf %29 : vector<2x32xf32> to vector<2x32xbf16>
    %c0_14 = arith.constant 0 : index
    %c0_15 = arith.constant 0 : index
    %31 = vector.load %arg6[%c0_14, %c0_15] : memref<2x32xbf16, #tpu.memory_space<vmem>>, vector<2x32xbf16>
    tpu.vector_store %arg6[%c0_14, %c0_15], %30 {strides = array<i32>} : memref<2x32xbf16, #tpu.memory_space<vmem>>, vector<2x32xbf16>,
    return
  }
  func.func @transform_0(%arg0: i32) -> (i32, i32) {
    %c0_i32 = arith.constant 0 : i32
    %c0_i32_0 = arith.constant 0 : i32
    return %arg0, %c0_i32 : i32, i32
  }
  func.func @transform_1(%arg0: i32) -> (i32, i32) {
    %c0_i32 = arith.constant 0 : i32
    %c0_i32_0 = arith.constant 0 : i32
    %c0_i32_1 = arith.constant 0 : i32
    return %c0_i32, %c0_i32_0 : i32, i32
  }
  func.func @transform_2(%arg0: i32) -> (i32, i32) {
    %c0_i32 = arith.constant 0 : i32
    %c0_i32_0 = arith.constant 0 : i32
    %c0_i32_1 = arith.constant 0 : i32
    return %c0_i32, %c0_i32_0 : i32, i32
  }
  func.func @transform_3(%arg0: i32) -> (i32, i32) {
    %c0_i32 = arith.constant 0 : i32
    %c0_i32_0 = arith.constant 0 : i32
    %c0_i32_1 = arith.constant 0 : i32
    return %c0_i32, %c0_i32_0 : i32, i32
  }
  func.func @transform_4(%arg0: i32) -> (i32, i32) {
    %c0_i32 = arith.constant 0 : i32
    %c0_i32_0 = arith.constant 0 : i32
    %c0_i32_1 = arith.constant 0 : i32
    return %c0_i32, %c0_i32_0 : i32, i32
  }
  func.func @transform_5(%arg0: i32) -> (i32, i32) {
    %c0_i32 = arith.constant 0 : i32
    %c0_i32_0 = arith.constant 0 : i32
    return %arg0, %c0_i32 : i32, i32
  }
}

</mosaic_0001>

<bundles_post_ra>
// kernel: tpu_custom_call.1
= control target key start
LH: loop header
LB: loop body
LE: loop exit
PB: predicated region body
PF: predicated region fallthrough
CT: control target
= control target key end

     0   :  { %6 = vsyncpa [#allocation3], 0  ;;  %s484_s0 = inlined_call_operand.hbm [shape: f32[16,128], index: 0, kind: input, shape index: {}]   ;;  %s485_s1 = inlined_call_operand.hbm [shape: f32[16,128], index: 1, kind: output, shape index: {}]  }
   0x1   :  { %7 = vsyncpa [#allocation4], 0 }
   0x2   :  { %9 = vsyncpa [#allocation4 + $0x1], 0  ;;  %s351_s6 = smov 0   ;;  %s353_s7 = smov 0  }
   0x3   :  { %s355_s8 = smov 0   ;;  %s357_s9 = smov 0  }
   0x4 LB: > { %s372_s10 = sadd.s32 4294967295, %s337_s9   ;;  %s183_s11 = sadd.s32 4294967294, %s337_s9   ;;  %s337_s9 = sphi %s357_s9, %s501_s9   ;;  %s333_s8 = sphi %s355_s8, %s500_s8   ;;  %s329_s7 = sphi %s353_s7, %s499_s7   ;;  %s325_s6 = sphi %s351_s6, %s498_s6  }
   0x5   : > { %s376_s12 = sadd.s32 1, %s337_s9   ;;  %s43_s13 = sadd.s32 1, %s333_s8 }
   0x6   : > { %s40_s14 = ssub.s32 %s337_s9, %s376_s12  ;;  %p53_p0 = scmp.ne.s32.totalorder %s333_s8, %s329_s7 }
   0x7   : > { %p41_p1 = scmp.eq.s32.totalorder %s40_s14, 0  ;;  %p54_p2 = scmp.eq.s32.totalorder %s372_s10, 1 }
   0x8   : > { %p59_p3 = scmp.ne.s32.totalorder %s329_s7, %s325_s6  ;;  %p60_p4 = scmp.eq.s32.totalorder %s183_s11, 1 }
   0x9   : > { %s387_s15 = scalar_select %p41_p1, %s333_s8, %s43_s13  }
   0xa   : > { %p389_p5 = por %p54_p2, %p53_p0  ;;  %p393_p6 = por %p60_p4, %p59_p3 }
   0xb   : > { %p184_p7 = scmp.ge.s32.totalorder %s337_s9, 1  ;;  %p67_p8 = scmp.lt.s32.totalorder %s337_s9, 3 }
   0xc   : > { %s489_s16 = scalar_select %p389_p5, 1, 0 }
   0xd   : > { %s490_s17 = scalar_select %p393_p6, 1, 0 }
   0xe   : > { %p486_p9 = scmp.eq.s32.totalorder %s372_s10, 0  ;;  %p400_p10 = pnand %p184_p7, %p67_p8 }
   0xf   : > { %s339_s19 = smov [#allocation2]   ;;  %s243_s24 = scalar_lea.hbm %s484_s0, 128 }
  0x10   : > { %s491_s18 = scalar_select %p400_p10, 1, 0 }
  0x11   : > { %s80_s20 = sshll.u32 %s339_s19, 4  ;;  %p199_p11 = pneg %p400_p10  ;;  %s81_s20 = int_to_ptr.vmem [resolvable:$true] %s80_s20 }
  0x12   : > { %p244_p13 = scmp.ne.s32.totalorder %s484_s0, %s243_s24  ;;  %s248_s29 = scalar_lea.hbm %s484_s0, 256 }
  0x13   : > { %p408_p12 = pnand %p486_p9, %p199_p11  ;;  %p249_p3 = scmp.lt.u32.totalorder %s248_s29, %s243_s24 }
  0x14   : > { %p250_p4 = scmp.lt.u32.totalorder %s243_s24, %s484_s0 }
  0x15   : > { %p245_p0 = pneg %p408_p12 }
  0x16   : > { %p251_p7 = por %p250_p4, %p249_p3 }
  0x17   : > { %p246_p1 = pnand %p245_p0, %p244_p13 }
  0x19   : > { %p247_p2 = pneg %p246_p1 }
  0x1b   : > { %p252_p8 = pnand %p251_p7, %p247_p2 }
  0x1d   : > { %255 = shalt.err (!%p252_p8)
}
  0x1e   : > { %s256_s3 = scalar_lea.vmem %s81_s20, 128  ;;  %p264_p5 = scmp.lt.s32.totalorder %s81_s20, %s81_s20 }
  0x1f   : > { %p257_p11 = scmp.ne.s32.totalorder %s81_s20, %s256_s3  ;;  %p265_p10 = scmp.lt.s32.totalorder %s256_s3, %s256_s3 }
  0x21   : > { %p259_p9 = pnand %p257_p11, %p245_p0  ;;  %p266_p13 = por %p265_p10, %p264_p5 }
  0x23   : > { %p260_p6 = pneg %p259_p9 }
  0x25   : > { %p267_p1 = pnand %p266_p13, %p260_p6 }
  0x27   : > { %270 = shalt.err (!%p267_p1)
}
  0x28   : > { %202 = dma.hbm_to_vmem [thread:$0]  (!%p408_p12), %s484_s0, 128, %s81_s20, [#allocation3]  }
  0x29   : > { %p493_p3 = scmp.ne.s32.totalorder %s491_s18, 0 }
  0x2a   : > { %p494_p2 = scmp.eq.s32.totalorder (!%p493_p3), %s372_s10, 0 }
  0x2b   : > { %93 = sbr.rel (%p493_p3) target bundleno = 77 (0x4d), region = 24 }
  0x32   : > { %316 = dma.done.wait (%p494_p2), [#allocation3], 128   ;;  %p495_p0 = pmov %p494_p2 }
  0x33   : > { %s105_s11 = sand.u32 1, %s329_s7   ;;  %s190_s21 = sshll.u32 %s372_s10, 7  ;;  %v108_v0 = vld [vmem:[#allocation2] sm:$0xff] }
  0x34   : > { %318 = vsyncadd (%p495_p0), [#allocation3], 4294967168  ;;  %s188_s13 = sshll.u32 %s105_s11, 3  ;;  %s444_s18 = scalar_lea.hbm %s485_s1, %s190_s21 }
  0x35   : > { %s107_s14 = scalar_lea.vmem [#allocation5], %s188_s13  ;;  %s111_s23 = scalar_lea.sflag [#allocation4], %s105_s11 }
  0x36   : > { %s124_s19 = sshll.u32 %s107_s14, 4  ;;  %109 = vst [vmem:[%s107_s14] sm:$0xff] %v108_v0  ;;  %p496_p6 = scmp.ne.s32.totalorder %s489_s16, 0  ;;  %s439_s19 = int_to_ptr.vmem [resolvable:$true] %s124_s19 }
  0x37   : > { %s271_s24 = scalar_lea.vmem %s439_s19, 128  ;;  %s340_s25 = smov [#allocation5]  }
  0x38   : > { %p272_p5 = scmp.ne.s32.totalorder %s439_s19, %s271_s24  ;;  %s275_s10 = sshll.u32 %s340_s25, 4  ;;  %s276_s10 = int_to_ptr.vmem [resolvable:$false] %s275_s10 }
  0x39   : > { %s277_s26 = scalar_lea.vmem %s276_s10, 256  ;;  %p278_p12 = scmp.lt.s32.totalorder %s439_s19, %s276_s10 }
  0x3a   : > { %p273_p9 = pnand %p272_p5, %p496_p6  ;;  %p279_p4 = scmp.lt.s32.totalorder %s277_s26, %s271_s24 }
  0x3c   : > { %p274_p10 = pneg %p273_p9  ;;  %p280_p7 = por %p279_p4, %p278_p12 }
  0x3e   : > { %p281_p8 = pnand %p280_p7, %p274_p10 }
  0x40   : > { %284 = shalt.err (!%p281_p8)
}
  0x41   : > { %s285_s27 = scalar_lea.hbm %s444_s18, 128  ;;  %s289_s30 = scalar_lea.hbm %s485_s1, 256 }
  0x42   : > { %p286_p11 = scmp.ne.s32.totalorder %s444_s18, %s285_s27  ;;  %p290_p3 = scmp.lt.u32.totalorder %s444_s18, %s485_s1 }
  0x43   : > { %p291_p2 = scmp.lt.u32.totalorder %s289_s30, %s285_s27  ;;  %p293_p5 = scmp.lt.u32.totalorder %s285_s27, %s444_s18 }
  0x44   : > { %p287_p13 = pnand %p286_p11, %p496_p6 }
  0x45   : > { %p292_p0 = por %p291_p2, %p290_p3 }
  0x46   : > { %p288_p1 = pneg %p287_p13 }
  0x47   : > { %p294_p9 = por %p293_p5, %p292_p0 }
  0x49   : > { %p295_p10 = pnand %p294_p9, %p288_p1 }
  0x4b   : > { %298 = shalt.err (!%p295_p10)
}
  0x4c   : > { %197 = dma.vmem_to_hbm [thread:$0]  (%p496_p6), %s439_s19, 128, %s444_s18, %s111_s23  }
  0x4d PF: > { %p209_p12 = scmp.ge.s32.totalorder %s337_s9, 2  ;;  %s136_s4 = sand.u32 1, %s325_s6  }
  0x4e   : > { %p497_p4 = scmp.ne.s32.totalorder %s490_s17, 0  ;;  %s137_s5 = scalar_lea.sflag [#allocation4], %s136_s4 }
  0x50   : > { %p204_p7 = pnand %p209_p12, %p497_p4 }
  0x52   : > { %320 = dma.done.wait (!%p204_p7), %s137_s5, 128  }
  0x53   : > { %322 = vsyncadd (!%p204_p7), %s137_s5, 4294967168  ;;  %p12_p8 = scmp.ge.s32.totalorder %s376_s12, 4   ;;  %s498_s6 = smov %s329_s7 }
  0x54   : > { %s499_s7 = smov %s333_s8  ;;  %s500_s8 = smov %s387_s15 }
  0x55   : > { %s501_s9 = smov %s376_s12  ;;  %14 = sbr.rel (!%p12_p8) target bundleno = 4 (0x4), region = 61 }
  0x5c   :  { %142 = vsyncpa [#allocation3], 1 }
  0x5d   :  { %144 = vsyncpa [#allocation3 + $0x1], 1 }
  0x5e   :  { %145 = vsyncpa [#allocation4], 1 }
  0x5f   :  { %147 = vsyncpa [#allocation4 + $0x1], 1 }

// kernel: _lambda_.12
= control target key start
LH: loop header
LB: loop body
LE: loop exit
PB: predicated region body
PF: predicated region fallthrough
CT: control target
= control target key end

     0   :  { %vm44_vm0 = vcmask 7168   ;;  %v175_v0 = vmov 0   ;;  %vm29_vm1 = vcmask 261120   ;;  %v176_v36 = vmov 1966171168   ;;  %s205_s1 = inlined_call_operand.vmem [shape: f32[2,8,1], index: 1, kind: input, shape index: {}]   ;;  %s206_s0 = inlined_call_operand.vmem [shape: bf16[2,8,32], index: 0, kind: input, shape index: {}]   ;;  %s207_s2 = inlined_call_operand.vmem [shape: bf16[2,32], index: 2, kind: output, shape index: {}]  }
   0x1   :  { %169 = vset.pattern.permute.xlu0 %v175_v0  ;;  %v16_v1 = vld [vmem:[%s205_s1 + $0x8] sm:$0xff]  ;;  %v15_v2 = vld [vmem:[%s205_s1] sm:$0xff]  ;;  %170 = vset.pattern.permute.xlu1 %v175_v0  ;;  %v80_v37 = vunpack.c.l.s4 %v176_v36  ;;  %v82_v38 = vlaneseq  ;;  %v177_v44 = vmov 1935823168   ;;  %vm138_vm2 = vcmask 1041409  }
   0x2   :  { %24 = vperm.xlu0 %169, %v16_v1   ;;  %v52_v3 = vsel %vm44_vm0, %v16_v1, 0.0  ;;  %v45_v4 = vsel %vm44_vm0, %v15_v2, 0.0  ;;  %v163_v19 = vld [vmem:[%s206_s0] sm:$0xff]   ;;  %v108_v45 = vunpack.c.l.s4 %v177_v44  ;;  %vm156_vm3 = vcmask 253952  }
   0x3   :  { %v53_v5 = vrot.slane %v52_v3, 4  ;;  %v46_v6 = vrot.slane %v45_v4, 4  ;;  %v165_v20 = vunpack.c.h.bf16 %v163_v19  ;;  %v164_v23 = vunpack.c.l.bf16 %v163_v19 }
   0x4   :  { %v81_v42 = vunpack.c.0.s8 %v80_v37  ;;  %v83_v43 = vshrl.u32 %v82_v38, 7  ;;  %v109_v50 = vunpack.c.0.s8 %v108_v45 }
   0x5   :  { %v54_v7 = vadd.f32 %v53_v5, %v52_v3  ;;  %v47_v8 = vadd.f32 %v46_v6, %v45_v4 }
   0x6   :  { %19 = vperm.xlu0 %169, %v15_v2   ;;  %v84_v49 = vsub.s32 %v81_v42, %v83_v43  ;;  %v112_v55 = vsub.s32 %v109_v50, %v83_v43 }
   0x7   :  { %v55_v9 = vrot.slane %v54_v7, 2  ;;  %v48_v10 = vrot.slane %v47_v8, 2 }
   0x9   :  { %v49_v11 = vadd.f32 %v48_v10, %v47_v8  ;;  %v56_v12 = vadd.f32 %v55_v9, %v54_v7 }
   0xb   :  { %v57_v13 = vrot.slane %v56_v12, 1  ;;  %v50_v14 = vrot.slane %v49_v11, 1 }
   0xd   :  { %v58_v15 = vadd.f32 %v57_v13, %v56_v12  ;;  %v51_v16 = vadd.f32 %v50_v14, %v49_v11 }
   0xf   :  { %v60_v17 = vmax.f32 %v58_v15, 1e-06  ;;  %v59_v18 = vmax.f32 %v51_v16, 1e-06 }
  0x11   :  { %68 = vperm.xlu1 %170, %v60_v17  }
  0x15   :  { %63 = vperm.xlu1 %170, %v59_v18  }
  0x81   :  { %v25_v21 = vpop.permute.xlu0 %24 }
  0x82   :  { %v28_v22 = vmul.f32 %v165_v20, %v25_v21 }
  0x84   :  { %v37_v24 = vsel %vm29_vm1, %v28_v22, 0.0 }
  0x85   :  { %v20_v25 = vpop.permute.xlu0 %19  ;;  %v38_v26 = vrot.slane %v37_v24, 4 }
  0x86   :  { %v27_v27 = vmul.f32 %v164_v23, %v20_v25 }
  0x87   :  { %v39_v29 = vadd.f32 %v38_v26, %v37_v24 }
  0x88   :  { %v30_v28 = vsel %vm29_vm1, %v27_v27, 0.0 }
  0x89   :  { %v31_v30 = vrot.slane %v30_v28, 4  ;;  %v40_v31 = vrot.slane %v39_v29, 2 }
  0x8b   :  { %v32_v32 = vadd.f32 %v31_v30, %v30_v28  ;;  %v41_v34 = vadd.f32 %v40_v31, %v39_v29 }
  0x8d   :  { %v33_v35 = vrot.slane %v32_v32, 2  ;;  %v42_v40 = vrot.slane %v41_v34, 1 }
  0x8f   :  { %v34_v41 = vadd.f32 %v33_v35, %v32_v32  ;;  %v43_v46 = vadd.f32 %v42_v40, %v41_v34 }
  0x90   :  { %v69_v33 = vpop.permute.xlu1 %68 }
  0x91   :  { %171 = vrcp.f32 %v69_v33  ;;  %v35_v47 = vrot.slane %v34_v41, 1 }
  0x93   :  { %v36_v52 = vadd.f32 %v35_v47, %v34_v41 }
  0x94   :  { %v64_v39 = vpop.permute.xlu1 %63 }
  0x95   :  { %173 = vrcp.f32 %v64_v39 }
  0x9b   :  { %v172_v48 = vpop.eup %171 }
  0x9c   :  { %v74_v51 = vmul.f32 %v172_v48, %v43_v46 }
  0x9e   :  { %v76_v53 = vpack.c.bf16 %v74_v51, %v74_v51 }
  0x9f   :  { %v174_v54 = vpop.eup %173 }
  0xa0   :  { %v99_v56 = vrot.slane %v76_v53, %v84_v49  ;;  %v72_v57 = vmul.f32 %v174_v54, %v36_v52 }
  0xa2   :  { %v106_v58 = vrot.slane %v99_v56, %v84_v49  ;;  %v75_v59 = vpack.c.bf16 %v72_v57, %v72_v57 }
  0xa4   :  { %v127_v60 = vrot.slane %v106_v58, %v112_v55  ;;  %v85_v61 = vrot.slane %v75_v59, %v84_v49 }
  0xa6   :  { %v134_v62 = vrot.slane %v127_v60, %v112_v55  ;;  %v92_v63 = vrot.slane %v85_v61, %v84_v49 }
  0xa8   :  { %v136_v0 = vunpack.c.l.b16 %v134_v62  ;;  %v113_v1 = vrot.slane %v92_v63, %v112_v55 }
  0xaa   :  { %v120_v2 = vrot.slane %v113_v1, %v112_v55  ;;  %v137_v3 = vrot.slane %v136_v0, 7 }
  0xac   :  { %v135_v4 = vunpack.c.l.b16 %v120_v2 }
  0xae   :  { %v139_v5 = vsel %vm138_vm2, %v137_v3, %v135_v4 }
  0xaf   :  { %v140_v6 = vpack.c.b16 %v139_v5, %v139_v5 }
  0xb1   :  { %v147_v7 = vrot.slane %v140_v6, %v84_v49 }
  0xb3   :  { %v154_v8 = vrot.slane %v147_v7, %v84_v49 }
  0xb5   :  { %157 = vst.msk [vmem:[%s207_s2] sm:$0x1] %vm156_vm3, %v154_v8 }

// kernel: _lambda_.11
= control target key start
LH: loop header
LB: loop body
LE: loop exit
PB: predicated region body
PF: predicated region fallthrough
CT: control target
= control target key end

     0   :  { %v335_v0 = vmov 0.0   ;;  %vm336_vm0 = vmmov 0   ;;  %vm51_vm1 = vcmask 130048   ;;  %vm117_vm2 = vcmask 261120   ;;  %s410_s2 = inlined_call_operand.vmem [shape: bf16[16,32], index: 2, kind: input, shape index: {}]   ;;  %s411_s1 = inlined_call_operand.vmem [shape: bf16[16,16], index: 1, kind: input, shape index: {}]   ;;  %s412_s4 = inlined_call_operand.vmem [shape: bf16[32,32], index: 4, kind: input, shape index: {}]   ;;  %s413_s5 = inlined_call_operand.vmem [shape: bf16[32,32], index: 5, kind: input, shape index: {}]   ;;  %s414_s0 = inlined_call_operand.vmem [shape: bf16[16,32], index: 0, kind: input, shape index: {}]   ;;  %s415_s3 = inlined_call_operand.vmem [shape: f32[1,32], index: 3, kind: input, shape index: {}]   ;;  %s416_s6 = inlined_call_operand.vmem [shape: f32[1,32], index: 6, kind: input, shape index: {}]   ;;  %s417_s7 = inlined_call_operand.vmem [shape: bf16[16,32], index: 7, kind: output, shape index: {}]  }
   0x1   :  { %295 = vmatprep.subr.bf16.mxu0 %v335_v0  ;;  %v319_v1 = vld [vmem:[%s410_s2] sm:$0xff]   ;;  %297 = vmatprep.mubr.msk.bf16.mxu0 %vm336_vm0, %v335_v0  ;;  %v323_v5 = vld [vmem:[%s412_s4 + $0x8] sm:$0xff]   ;;  %vm262_vm3 = vcmask 257024  }
   0x2   :  { %v320_v2 = vld [vmem:[%s411_s1] sm:$0xff]   ;;  %301 = vmatprep.subr.bf16.mxu1 %v335_v0  ;;  %305 = vmatprep.mubr.msk.bf16.mxu1 %vm336_vm0, %v335_v0  ;;  %v324_v7 = vld [vmem:[%s413_s5 + $0x8] sm:$0xff]  }
   0x3   :  { %296 = vmatpush3.bf16.msra.mxu0 %v319_v1  ;;  %v321_v3 = vld [vmem:[%s412_s4] sm:$0xff]  }
   0x4   :  { %309 = vmatprep.subr.bf16.mxu0 %v335_v0  ;;  %v322_v4 = vld [vmem:[%s413_s5] sm:$0xff]  }
   0x5   :  { %302 = vmatpush3.bf16.msra.mxu1 %v322_v4  ;;  %v27_v6 = vld [vmem:[%s414_s0] sm:$0xff]  }
   0x6   :  { %298 = vmatmul.mubr.msk.bf16.vlgmr.msra.gmra.mrb[0].mxu0 %vm51_vm1, %v320_v2  ;;  %303 = vmatprep.subr.bf16.mxu1 %v335_v0  ;;  %v269_v8 = vld [vmem:[%s415_s3] ss:$0 sm:$0xff]  ;;  %v244_v35 = vunpack.c.l.bf16 %v27_v6  ;;  %v245_v36 = vunpack.c.h.bf16 %v27_v6 }
   0x7   :  { %310 = vmatpush3.bf16.msra.mxu0 %v321_v3  ;;  %313 = vmatprep.mubr.msk.bf16.mxu0 %vm336_vm0, %v335_v0  ;;  %v280_v21 = vld [vmem:[%s416_s6] ss:$0 sm:$0xff] }
   0x8   :  { %311 = vmatprep.subr.bf16.mxu0 %v335_v0 }
   0x9   :  { %304 = vmatpush3.bf16.msra.mxu1 %v324_v7 }
   0xb   :  { %312 = vmatpush3.bf16.msra.mxu0 %v323_v5 }
   0xe   :  { %314 = vmatmul.mubr.msk.bf16.vlgmr.msra.gmra.mrb[4].mxu0 %vm117_vm2, %v27_v6 }
  0xd9   :  { %v89_v9 = vpop.f32.mrb[0].mxu0 }
  0xda   :  { %v299_v10 = vpop.f32.mrb[1].mxu0  ;;  %v90_v12 = vadd.f32 %v269_v8, %v89_v9 }
  0xdb   :  { %v92_v11 = vpop.f32.mrb[2].mxu0 }
  0xdc   :  { %v93_v13 = vadd.f32 %v269_v8, %v92_v11  ;;  %v300_v14 = vpop.f32.mrb[3].mxu0 }
  0xde   :  { %v100_v15 = vpack.c.bf16 %v93_v13, %v90_v12 }
  0xe0   :  { %306 = vmatmul.mubr.msk.bf16.vlgmr.msra.gmra.mrb[0].mxu1 %vm117_vm2, %v100_v15 }
  0xe1   :  { %v216_v16 = vpop.f32.mrb[4].mxu0 }
  0xe2   :  { %v315_v17 = vpop.f32.mrb[5].mxu0 }
  0xe3   :  { %v219_v18 = vpop.f32.mrb[6].mxu0 }
  0xe4   :  { %v316_v19 = vpop.f32.mrb[7].mxu0 }
 0x1b3   :  { %v155_v20 = vpop.f32.mrb[0].mxu1 }
 0x1b4   :  { %v217_v22 = vadd.f32 %v216_v16, %v155_v20  ;;  %v307_v23 = vpop.f32.mrb[1].mxu1 }
 0x1b5   :  { %v158_v24 = vpop.f32.mrb[2].mxu1 }
 0x1b6   :  { %v230_v25 = vadd.f32 %v280_v21, %v217_v22  ;;  %v220_v26 = vadd.f32 %v219_v18, %v158_v24  ;;  %v308_v27 = vpop.f32.mrb[3].mxu1 }
 0x1b8   :  { %v281_v28 = vmul.f32 -1.442695, %v230_v25  ;;  %v231_v29 = vadd.f32 %v280_v21, %v220_v26 }
 0x1ba   :  { %327 = vpow2.f32 %v281_v28  ;;  %v282_v30 = vmul.f32 -1.442695, %v231_v29 }
 0x1bc   :  { %329 = vpow2.f32 %v282_v30 }
 0x1c4   :  { %v328_v31 = vpop.eup %327 }
 0x1c5   :  { %v238_v32 = vadd.f32 1.0, %v328_v31 }
 0x1c6   :  { %v330_v33 = vpop.eup %329 }
 0x1c7   :  { %331 = vrcp.f32 %v238_v32  ;;  %v239_v34 = vadd.f32 1.0, %v330_v33 }
 0x1c9   :  { %333 = vrcp.f32 %v239_v34 }
 0x1d1   :  { %v332_v37 = vpop.eup %331 }
 0x1d2   :  { %v246_v38 = vmul.f32 %v332_v37, %v244_v35  ;;  %v248_v39 = vsub.f32 1.0, %v332_v37 }
 0x1d3   :  { %v334_v40 = vpop.eup %333 }
 0x1d4   :  { %v250_v41 = vmul.f32 %v248_v39, %v90_v12  ;;  %v247_v42 = vmul.f32 %v334_v40, %v245_v36  ;;  %v249_v43 = vsub.f32 1.0, %v334_v40 }
 0x1d6   :  { %v252_v44 = vadd.f32 %v250_v41, %v246_v38  ;;  %v251_v45 = vmul.f32 %v249_v43, %v93_v13 }
 0x1d8   :  { %v285_v46 = vpack.c.bf16 %v252_v44, %v252_v44  ;;  %v253_v47 = vadd.f32 %v251_v45, %v247_v42 }
 0x1da   :  { %263 = vst.msk [vmem:[%s417_s7] sm:$0xf] %vm262_vm3, %v285_v46  ;;  %v286_v48 = vpack.c.bf16 %v253_v47, %v253_v47 }
 0x1dc   :  { %264 = vst.msk [vmem:[%s417_s7 + $0x4] sm:$0xf] %vm262_vm3, %v286_v48 }

// kernel: _lambda_.13
= control target key start
LH: loop header
LB: loop body
LE: loop exit
PB: predicated region body
PF: predicated region fallthrough
CT: control target
= control target key end

     0   :  { %v562_v0 = vmov 0.0   ;;  %vm563_vm0 = vmmov 0   ;;  %vm51_vm1 = vcmask 261120   ;;  %v564_v7 = vmov 0.0|0.0   ;;  %s667_s1 = inlined_call_operand.vmem [shape: bf16[32,64], index: 1, kind: input, shape index: {}]   ;;  %s668_s0 = inlined_call_operand.vmem [shape: bf16[2,32], index: 0, kind: input, shape index: {}]   ;;  %s669_s3 = inlined_call_operand.vmem [shape: f32[64,8], index: 3, kind: input, shape index: {}]   ;;  %s670_s2 = inlined_call_operand.vmem [shape: f32[1,64], index: 2, kind: input, shape index: {}]   ;;  %s671_s4 = inlined_call_operand.vmem [shape: f32[8,64], index: 4, kind: input, shape index: {}]   ;;  %s672_s5 = inlined_call_operand.vmem [shape: f32[1,64], index: 5, kind: input, shape index: {}]   ;;  %s673_s6 = inlined_call_operand.vmem [shape: f32[1,64], index: 6, kind: input, shape index: {}]   ;;  %s674_s7 = inlined_call_operand.vmem [shape: bf16[2,64], index: 7, kind: output, shape index: {}]  }
   0x1   :  { %473 = vmatprep.subr.bf16.mxu0 %v562_v0  ;;  %v556_v1 = vld [vmem:[%s667_s1] sm:$0xff]   ;;  %477 = vmatprep.mubr.msk.bf16.mxu0 %vm563_vm0, %v562_v0  ;;  %v557_v2 = vld [vmem:[%s667_s1 + $0x8] sm:$0xff]   ;;  %v103_v8 = vld [vmem:[%s669_s3 + $0x10] sm:$0xff]  ;;  %vm110_vm2 = vcmask 523264   ;;  %vm263_vm4 = vcmask 64512   ;;  %vm431_vm5 = vcmask 516096  }
   0x2   :  { %497 = vmatprep.mubr.msk.f32.mxu1 %vm563_vm0, %v562_v0  ;;  %474 = vmatpush3.bf16.msra.mxu0 %v556_v1  ;;  %v27_v3 = vld [vmem:[%s668_s0] sm:$0x1]  ;;  %v102_v5 = vld [vmem:[%s669_s3 + $0x8] sm:$0xff]  ;;  %v104_v9 = vld [vmem:[%s669_s3 + $0x18] sm:$0xff] }
   0x3   :  { %475 = vmatprep.subr.bf16.mxu0 %v562_v0  ;;  %v101_v4 = vld [vmem:[%s669_s3] sm:$0xff]  ;;  %529 = vmatprep.subr.bf16.mxu1 %v564_v7  ;;  %v533_v11 = vpack.c.bf16 %v104_v9, %v103_v8  ;;  %v106_v12 = vld [vmem:[%s669_s3 + $0x28] sm:$0xff]  ;;  %v107_v14 = vld [vmem:[%s669_s3 + $0x30] sm:$0xff] }
   0x4   :  { %v530_v6 = vpack.c.bf16 %v102_v5, %v101_v4  ;;  %v105_v10 = vld [vmem:[%s669_s3 + $0x20] sm:$0xff]  ;;  %v108_v15 = vld [vmem:[%s669_s3 + $0x38] sm:$0xff] }
   0x5   :  { %v536_v13 = vpack.c.bf16 %v106_v12, %v105_v10  ;;  %v539_v16 = vpack.c.bf16 %v108_v15, %v107_v14  ;;  %v437_v17 = vld [vmem:[%s670_s2] ss:$0 sm:$0xff] }
   0x6   :  { %476 = vmatpush3.bf16.msra.mxu0 %v557_v2  ;;  %531 = vmatpush3.bf16.msra.mxu1 %v530_v6  ;;  %v109_v29 = vld [vmem:[%s671_s4] sm:$0xff] }
   0x7   :  { %541 = vmatprep.subr.bf16.mxu0 %v564_v7  ;;  %532 = vmatprep.subr.bf16.mxu1 %v564_v7  ;;  %v446_v45 = vld [vmem:[%s672_s5] ss:$0 sm:$0xff] }
   0x8   :  { %v447_v48 = vld [vmem:[%s673_s6] ss:$0 sm:$0xff] }
   0x9   :  { %478 = vmatmul.mubr.msk.bf16.vlgmr.msra.gmra.mrb[0].mxu0 %vm51_vm1, %v27_v3 }
   0xa   :  { %516 = vmatprep.mubr.msk.f32.mxu0 %vm563_vm0, %v562_v0  ;;  %543 = vmatpush3.bf16.msra.mxu0 %v530_v6 }
   0xb   :  { %544 = vmatprep.subr.bf16.mxu0 %v564_v7  ;;  %534 = vmatpush3.bf16.msra.mxu1 %v533_v11 }
   0xc   :  { %535 = vmatprep.subr.bf16.mxu1 %v564_v7 }
   0xe   :  { %546 = vmatpush3.bf16.msra.mxu0 %v533_v11 }
   0xf   :  { %547 = vmatprep.subr.bf16.mxu0 %v564_v7  ;;  %537 = vmatpush3.bf16.msra.mxu1 %v536_v13 }
  0x10   :  { %538 = vmatprep.subr.bf16.mxu1 %v564_v7 }
  0x12   :  { %549 = vmatpush3.bf16.msra.mxu0 %v536_v13 }
  0x13   :  { %550 = vmatprep.subr.bf16.mxu0 %v564_v7  ;;  %540 = vmatpush3.bf16.msra.mxu1 %v539_v16 }
  0x14   :  { %519 = vmatprep.subr.mxu1 %v562_v0 }
  0x16   :  { %552 = vmatpush3.bf16.msra.mxu0 %v539_v16 }
  0xdc   :  { %v89_v18 = vpop.f32.mrb[0].mxu0 }
  0xdd   :  { %v90_v19 = vadd.f32 %v437_v17, %v89_v18  ;;  %v479_v20 = vpop.f32.mrb[1].mxu0 }
  0xde   :  { %v92_v21 = vpop.f32.mrb[2].mxu0 }
  0xdf   :  { %v96_v22 = vmin.f32 %v90_v19, 0.0  ;;  %v480_v23 = vpop.f32.mrb[3].mxu0  ;;  %vm95_vm3 = vcmp.gt.f32.partialorder %v90_v19, 0.0 }
  0xe1   :  { %v97_v24 = vmul.f32 1.442695, %v96_v22 }
  0xe3   :  { %558 = vpow2.f32 %v97_v24 }
  0xed   :  { %v559_v25 = vpop.eup %558 }
  0xee   :  { %v441_v26 = vadd.f32 -1.0, %v559_v25 }
  0xf0   :  { %v100_v27 = vsel %vm95_vm3, %v90_v19, %v441_v26 }
  0xf1   :  { %498 = vmatmul.mubr.msk.f32.vlgmr.msra.gmra.mrb[0].mxu1 %vm110_vm2, %v100_v27  ;;  %v184_v28 = vmul.f32 %v100_v27, %v100_v27 }
  0xf2   :  { %521 = vmatprep.mubr.msk.f32.mxu1 %vm563_vm0, %v562_v0  ;;  %520 = vmatpush3.msra.mxu1 %v109_v29 }
  0xf3   :  { %517 = vmatmul.mubr.msk.f32.vlgmr.msra.gmra.mrb[4].mxu0 %vm110_vm2, %v184_v28  ;;  %524 = vmatprep.subr.mxu1 %v562_v0 }
 0x1c4   :  { %v180_v30 = vpop.f32.mrb[0].mxu1 }
 0x1c5   :  { %v258_v31 = vmul.f32 0.125, %v180_v30  ;;  %v499_v32 = vpop.f32.mrb[1].mxu1 }
 0x1c6   :  { %v254_v33 = vpop.f32.mrb[4].mxu0 }
 0x1c7   :  { %v260_v34 = vmul.f32 %v258_v31, %v258_v31  ;;  %v259_v35 = vmul.f32 0.125, %v254_v33  ;;  %v518_v36 = vpop.f32.mrb[5].mxu0  ;;  %522 = vmatmul.mubr.msk.f32.vlgmr.msra.gmra.mrb[2].mxu1 %vm263_vm4, %v258_v31 }
 0x1c8   :  { %525 = vmatpush3.msra.mxu1 %v109_v29  ;;  %526 = vmatprep.mubr.msk.f32.mxu1 %vm563_vm0, %v562_v0 }
 0x1c9   :  { %v261_v37 = vsub.f32 %v259_v35, %v260_v34 }
 0x1cb   :  { %v262_v38 = vmax.f32 %v261_v37, 0.0 }
 0x1cd   :  { %v337_v39 = vadd.f32 1e-05, %v262_v38 }
 0x1cf   :  { %560 = vrsqrt.f32 %v337_v39 }
 0x1d9   :  { %v561_v40 = vpop.eup %560 }
 0x1da   :  { %527 = vmatmul.mubr.msk.f32.vlgmr.msra.gmra.mrb[4].mxu1 %vm263_vm4, %v561_v40 }
 0x29a   :  { %v333_v41 = vpop.f32.mrb[2].mxu1 }
 0x29b   :  { %v523_v42 = vpop.f32.mrb[3].mxu1  ;;  %v412_v43 = vsub.f32 %v100_v27, %v333_v41 }
 0x2ad   :  { %v408_v44 = vpop.f32.mrb[4].mxu1 }
 0x2ae   :  { %v413_v46 = vmul.f32 %v412_v43, %v408_v44  ;;  %v528_v47 = vpop.f32.mrb[5].mxu1 }
 0x2b0   :  { %v421_v49 = vmul.f32 %v446_v45, %v413_v46 }
 0x2b2   :  { %v429_v50 = vadd.f32 %v447_v48, %v421_v49 }
 0x2b4   :  { %v430_v51 = vpack.c.bf16 %v429_v50, %v429_v50 }
 0x2b6   :  { %432 = vst.msk [vmem:[%s674_s7] sm:$0x1] %vm431_vm5, %v430_v51 }

// kernel: _lambda_.14
= control target key start
LH: loop header
LB: loop body
LE: loop exit
PB: predicated region body
PF: predicated region fallthrough
CT: control target
= control target key end

     0   :  { %v653_v0 = vmov 0.0   ;;  %vm654_vm0 = vmmov 0   ;;  %vm57_vm1 = vcmask 261120   ;;  %vm123_vm2 = vcmask 523264   ;;  %s750_s1 = inlined_call_operand.vmem [shape: bf16[32,64], index: 1, kind: input, shape index: {}]   ;;  %s751_s0 = inlined_call_operand.vmem [shape: bf16[16,32], index: 0, kind: input, shape index: {}]   ;;  %s752_s3 = inlined_call_operand.vmem [shape: f32[64,8], index: 3, kind: input, shape index: {}]   ;;  %s753_s2 = inlined_call_operand.vmem [shape: f32[1,64], index: 2, kind: input, shape index: {}]   ;;  %s754_s4 = inlined_call_operand.vmem [shape: f32[8,64], index: 4, kind: input, shape index: {}]   ;;  %s755_s5 = inlined_call_operand.vmem [shape: f32[1,64], index: 5, kind: input, shape index: {}]   ;;  %s756_s6 = inlined_call_operand.vmem [shape: f32[1,64], index: 6, kind: input, shape index: {}]   ;;  %s757_s7 = inlined_call_operand.vmem [shape: bf16[16,64], index: 7, kind: output, shape index: {}]  }
   0x1   :  { %552 = vmatprep.subr.bf16.mxu0 %v653_v0  ;;  %v642_v1 = vld [vmem:[%s750_s1] sm:$0xff]   ;;  %556 = vmatprep.mubr.msk.bf16.mxu0 %vm654_vm0, %v653_v0  ;;  %v643_v2 = vld [vmem:[%s750_s1 + $0x8] sm:$0xff]   ;;  %v116_v7 = vld [vmem:[%s752_s3 + $0x10] sm:$0xff]  ;;  %vm298_vm5 = vcmask 64512   ;;  %vm495_vm6 = vcmask 519168  }
   0x2   :  { %553 = vmatpush3.bf16.msra.mxu0 %v642_v1  ;;  %v644_v3 = vld [vmem:[%s751_s0] sm:$0xff]   ;;  %v115_v5 = vld [vmem:[%s752_s3 + $0x8] sm:$0xff]  ;;  %v117_v8 = vld [vmem:[%s752_s3 + $0x18] sm:$0xff] }
   0x3   :  { %554 = vmatprep.subr.bf16.mxu0 %v653_v0  ;;  %v114_v4 = vld [vmem:[%s752_s3] sm:$0xff]  ;;  %v612_v9 = vpack.c.bf16 %v117_v8, %v116_v7  ;;  %v119_v11 = vld [vmem:[%s752_s3 + $0x28] sm:$0xff]  ;;  %v120_v13 = vld [vmem:[%s752_s3 + $0x30] sm:$0xff] }
   0x4   :  { %v608_v6 = vpack.c.bf16 %v115_v5, %v114_v4  ;;  %v118_v10 = vld [vmem:[%s752_s3 + $0x20] sm:$0xff]  ;;  %v121_v14 = vld [vmem:[%s752_s3 + $0x38] sm:$0xff] }
   0x5   :  { %v616_v12 = vpack.c.bf16 %v119_v11, %v118_v10  ;;  %v620_v15 = vpack.c.bf16 %v121_v14, %v120_v13  ;;  %v502_v16 = vld [vmem:[%s753_s2] ss:$0 sm:$0xff] }
   0x6   :  { %555 = vmatpush3.bf16.msra.mxu0 %v643_v2  ;;  %609 = vmatprep.subr.bf16.mxu1 %v608_v6  ;;  %v122_v35 = vld [vmem:[%s754_s4] sm:$0xff] }
   0x7   :  { %625 = vmatprep.subr.bf16.mxu0 %v608_v6  ;;  %611 = vmatpush3.bf16.msra.mxu1 %v608_v6  ;;  %v517_v59 = vld [vmem:[%s755_s5] ss:$0 sm:$0xff] }
   0x8   :  { %613 = vmatprep.subr.bf16.mxu1 %v612_v9  ;;  %v518_v62 = vld [vmem:[%s756_s6] ss:$0 sm:$0xff] }
   0x9   :  { %557 = vmatmul.mubr.msk.bf16.vlgmr.msra.gmra.mrb[0].mxu0 %vm57_vm1, %v644_v3 }
   0xa   :  { %627 = vmatpush3.bf16.msra.mxu0 %v608_v6 }
   0xb   :  { %629 = vmatprep.subr.bf16.mxu0 %v612_v9  ;;  %615 = vmatpush3.bf16.msra.mxu1 %v612_v9 }
   0xc   :  { %617 = vmatprep.subr.bf16.mxu1 %v616_v12 }
   0xe   :  { %631 = vmatpush3.bf16.msra.mxu0 %v612_v9 }
   0xf   :  { %633 = vmatprep.subr.bf16.mxu0 %v616_v12  ;;  %619 = vmatpush3.bf16.msra.mxu1 %v616_v12 }
  0x10   :  { %621 = vmatprep.subr.bf16.mxu1 %v620_v15 }
  0x12   :  { %635 = vmatpush3.bf16.msra.mxu0 %v616_v12 }
  0x13   :  { %637 = vmatprep.subr.bf16.mxu0 %v620_v15  ;;  %623 = vmatpush3.bf16.msra.mxu1 %v620_v15 }
  0x14   :  { %598 = vmatprep.subr.mxu1 %v122_v35 }
  0x16   :  { %639 = vmatpush3.bf16.msra.mxu0 %v620_v15 }
  0xdc   :  { %v95_v17 = vpop.f32.mrb[0].mxu0 }
  0xdd   :  { %v96_v18 = vadd.f32 %v502_v16, %v95_v17  ;;  %v558_v19 = vpop.f32.mrb[1].mxu0 }
  0xde   :  { %v98_v20 = vpop.f32.mrb[2].mxu0 }
  0xdf   :  { %v104_v21 = vmin.f32 %v96_v18, 0.0  ;;  %v99_v22 = vadd.f32 %v502_v16, %v98_v20  ;;  %v559_v23 = vpop.f32.mrb[3].mxu0  ;;  %vm102_vm3 = vcmp.gt.f32.partialorder %v96_v18, 0.0 }
  0xe1   :  { %v106_v24 = vmul.f32 1.442695, %v104_v21  ;;  %v105_v25 = vmin.f32 %v99_v22, 0.0  ;;  %vm103_vm4 = vcmp.gt.f32.partialorder %v99_v22, 0.0 }
  0xe3   :  { %645 = vpow2.f32 %v106_v24  ;;  %v108_v26 = vmul.f32 1.442695, %v105_v25 }
  0xe5   :  { %647 = vpow2.f32 %v108_v26 }
  0xed   :  { %v646_v27 = vpop.eup %645 }
  0xee   :  { %v507_v28 = vadd.f32 -1.0, %v646_v27 }
  0xef   :  { %v648_v29 = vpop.eup %647 }
  0xf0   :  { %v112_v30 = vsel %vm102_vm3, %v96_v18, %v507_v28  ;;  %v508_v31 = vadd.f32 -1.0, %v648_v29 }
  0xf1   :  { %576 = vmatprep.mubr.msk.f32.mxu1 %vm123_vm2, %v112_v30  ;;  %v205_v32 = vmul.f32 %v112_v30, %v112_v30 }
  0xf2   :  { %v113_v33 = vsel %vm103_vm4, %v99_v22, %v508_v31 }
  0xf3   :  { %577 = vmatmul.mubr.msk.f32.vlgmr.msra.gmra.mrb[0].mxu1 %vm123_vm2, %v113_v33  ;;  %v206_v34 = vmul.f32 %v113_v33, %v113_v33  ;;  %595 = vmatprep.mubr.msk.f32.mxu0 %vm123_vm2, %v205_v32 }
  0xf4   :  { %599 = vmatpush3.msra.mxu1 %v122_v35 }
  0xf5   :  { %596 = vmatmul.mubr.msk.f32.vlgmr.msra.gmra.mrb[4].mxu0 %vm123_vm2, %v206_v34  ;;  %603 = vmatprep.subr.mxu1 %v122_v35 }
 0x1c6   :  { %v578_v36 = vpop.f32.mrb[0].mxu1 }
 0x1c7   :  { %v289_v37 = vmul.f32 0.125, %v578_v36  ;;  %v196_v38 = vpop.f32.mrb[1].mxu1 }
 0x1c8   :  { %v288_v39 = vmul.f32 0.125, %v196_v38  ;;  %v597_v40 = vpop.f32.mrb[4].mxu0 }
 0x1c9   :  { %v293_v41 = vmul.f32 %v289_v37, %v289_v37  ;;  %v291_v42 = vmul.f32 0.125, %v597_v40  ;;  %v279_v43 = vpop.f32.mrb[5].mxu0 }
 0x1ca   :  { %v292_v44 = vmul.f32 %v288_v39, %v288_v39  ;;  %v290_v45 = vmul.f32 0.125, %v279_v43  ;;  %600 = vmatprep.mubr.msk.f32.mxu1 %vm298_vm5, %v288_v39 }
 0x1cb   :  { %v295_v46 = vsub.f32 %v291_v42, %v293_v41  ;;  %601 = vmatmul.mubr.msk.f32.vlgmr.msra.gmra.mrb[2].mxu1 %vm298_vm5, %v289_v37 }
 0x1cc   :  { %v294_v47 = vsub.f32 %v290_v45, %v292_v44  ;;  %604 = vmatpush3.msra.mxu1 %v122_v35 }
 0x1cd   :  { %v297_v48 = vmax.f32 %v295_v46, 0.0 }
 0x1ce   :  { %v296_v49 = vmax.f32 %v294_v47, 0.0 }
 0x1cf   :  { %v381_v50 = vadd.f32 1e-05, %v297_v48 }
 0x1d0   :  { %v380_v51 = vadd.f32 1e-05, %v296_v49 }
 0x1d2   :  { %649 = vrsqrt.f32 %v380_v51 }
 0x1d3   :  { %651 = vrsqrt.f32 %v381_v50 }
 0x1dc   :  { %v650_v52 = vpop.eup %649 }
 0x1dd   :  { %v652_v53 = vpop.eup %651  ;;  %605 = vmatprep.mubr.msk.f32.mxu1 %vm298_vm5, %v650_v52 }
 0x1de   :  { %606 = vmatmul.mubr.msk.f32.vlgmr.msra.gmra.mrb[4].mxu1 %vm298_vm5, %v652_v53 }
 0x29e   :  { %v602_v54 = vpop.f32.mrb[2].mxu1 }
 0x29f   :  { %v371_v55 = vpop.f32.mrb[3].mxu1  ;;  %v466_v56 = vsub.f32 %v113_v33, %v602_v54 }
 0x2a0   :  { %v465_v57 = vsub.f32 %v112_v30, %v371_v55 }
 0x2b1   :  { %v607_v58 = vpop.f32.mrb[4].mxu1 }
 0x2b2   :  { %v468_v60 = vmul.f32 %v607_v58, %v466_v56  ;;  %v456_v61 = vpop.f32.mrb[5].mxu1 }
 0x2b3   :  { %v467_v63 = vmul.f32 %v465_v57, %v456_v61 }
 0x2b4   :  { %v477_v0 = vmul.f32 %v517_v59, %v468_v60 }
 0x2b5   :  { %v476_v1 = vmul.f32 %v517_v59, %v467_v63 }
 0x2b6   :  { %v486_v2 = vadd.f32 %v518_v62, %v477_v0 }
 0x2b7   :  { %v485_v3 = vadd.f32 %v518_v62, %v476_v1 }
 0x2b8   :  { %v522_v4 = vpack.c.bf16 %v486_v2, %v486_v2 }
 0x2b9   :  { %v521_v5 = vpack.c.bf16 %v485_v3, %v485_v3 }
 0x2ba   :  { %497 = vst.msk [vmem:[%s757_s7 + $0x4] sm:$0xf] %vm495_vm6, %v522_v4 }
 0x2bb   :  { %496 = vst.msk [vmem:[%s757_s7] sm:$0xf] %vm495_vm6, %v521_v5 }

// kernel: _lambda_.16
= control target key start
LH: loop header
LB: loop body
LE: loop exit
PB: predicated region body
PF: predicated region fallthrough
CT: control target
= control target key end

     0   :  { %v304_v0 = vmov 0.0   ;;  %vm305_vm0 = vmmov 0   ;;  %vm51_vm1 = vcmask 261120   ;;  %v306_v7 = vmov 1966171168   ;;  %s386_s2 = inlined_call_operand.vmem [shape: bf16[32,32], index: 2, kind: input, shape index: {}]   ;;  %s387_s3 = inlined_call_operand.vmem [shape: bf16[32,32], index: 3, kind: input, shape index: {}]   ;;  %s388_s0 = inlined_call_operand.vmem [shape: bf16[2,8,32], index: 0, kind: input, shape index: {}]   ;;  %s389_s1 = inlined_call_operand.vmem [shape: bf16[2,32], index: 1, kind: input, shape index: {}]   ;;  %s390_s4 = inlined_call_operand.vmem [shape: f32[1,32], index: 4, kind: input, shape index: {}]   ;;  %s391_s5 = inlined_call_operand.vmem [shape: f32[1,32], index: 5, kind: input, shape index: {}]   ;;  %s392_s6 = inlined_call_operand.vmem [shape: f32[1,32], index: 6, kind: input, shape index: {}]   ;;  %s393_s7 = inlined_call_operand.vmem [shape: bf16[2,8,32], index: 7, kind: output, shape index: {}]  }
   0x1   :  { %283 = vmatprep.subr.bf16.mxu1 %v304_v0  ;;  %v294_v1 = vld [vmem:[%s386_s2] sm:$0xff]   ;;  %275 = vmatprep.subr.bf16.mxu0 %v304_v0  ;;  %v296_v3 = vld [vmem:[%s386_s2 + $0x8] sm:$0xff]   ;;  %v157_v8 = vunpack.c.l.s4 %v306_v7  ;;  %v159_v9 = vlaneseq  ;;  %vm252_vm2 = vcmask 257024  }
   0x2   :  { %v295_v2 = vld [vmem:[%s387_s3] sm:$0xff]   ;;  %287 = vmatprep.mubr.msk.bf16.mxu1 %vm305_vm0, %v304_v0  ;;  %279 = vmatprep.mubr.msk.bf16.mxu0 %vm305_vm0, %v304_v0  ;;  %v297_v4 = vld [vmem:[%s387_s3 + $0x8] sm:$0xff]  }
   0x3   :  { %284 = vmatpush3.bf16.msra.mxu1 %v294_v1  ;;  %276 = vmatpush3.bf16.msra.mxu0 %v295_v2  ;;  %v27_v5 = vld [vmem:[%s388_s0] sm:$0xff]   ;;  %v158_v10 = vunpack.c.0.s8 %v157_v8  ;;  %v160_v11 = vshrl.u32 %v159_v9, 7 }
   0x4   :  { %285 = vmatprep.subr.bf16.mxu1 %v304_v0  ;;  %277 = vmatprep.subr.bf16.mxu0 %v304_v0  ;;  %v29_v6 = vld [vmem:[%s389_s1] sm:$0x1]  ;;  %v201_v32 = vunpack.c.l.bf16 %v27_v5  ;;  %v202_v35 = vunpack.c.h.bf16 %v27_v5 }
   0x5   :  { %v161_v12 = vsub.s32 %v158_v10, %v160_v11  ;;  %v180_v17 = vsub.s32 0, %v160_v11  ;;  %v266_v27 = vld [vmem:[%s390_s4] ss:$0 sm:$0xff] }
   0x6   :  { %v267_v58 = vld [vmem:[%s391_s5] ss:$0 sm:$0xff] }
   0x7   :  { %286 = vmatpush3.bf16.msra.mxu1 %v296_v3  ;;  %278 = vmatpush3.bf16.msra.mxu0 %v297_v4  ;;  %v268_v60 = vld [vmem:[%s392_s6] ss:$0 sm:$0xff] }
   0xa   :  { %288 = vmatmul.mubr.msk.bf16.vlgmr.msra.gmra.mrb[0].mxu1 %vm51_vm1, %v29_v6  ;;  %280 = vmatmul.mubr.msk.bf16.vlgmr.msra.gmra.mrb[0].mxu0 %vm51_vm1, %v27_v5 }
  0xdd   :  { %v149_v13 = vpop.f32.mrb[0].mxu1  ;;  %v89_v16 = vpop.f32.mrb[0].mxu0 }
  0xde   :  { %v162_v14 = vrot.slane %v149_v13, %v161_v12  ;;  %v289_v15 = vpop.f32.mrb[1].mxu1  ;;  %v281_v19 = vpop.f32.mrb[1].mxu0 }
  0xdf   :  { %v152_v18 = vpop.f32.mrb[2].mxu1  ;;  %v92_v23 = vpop.f32.mrb[2].mxu0 }
  0xe0   :  { %v163_v20 = vcombine.high %v162_v14, %v162_v14  ;;  %v170_v21 = vrot.slane %v162_v14, %v161_v12  ;;  %v290_v22 = vpop.f32.mrb[3].mxu1  ;;  %v282_v24 = vpop.f32.mrb[3].mxu0 }
  0xe2   :  { %v181_v25 = vrot.slane %v170_v21, %v180_v17  ;;  %v177_v26 = vrot.slane %v163_v20, %v161_v12 }
  0xe4   :  { %v188_v28 = vadd.f32 %v181_v25, %v89_v16  ;;  %v185_v29 = vrot.slane %v177_v26, %v180_v17 }
  0xe6   :  { %v197_v30 = vadd.f32 %v266_v27, %v188_v28  ;;  %v189_v31 = vadd.f32 %v185_v29, %v92_v23 }
  0xe8   :  { %v199_v33 = vmax.f32 %v197_v30, 0.0  ;;  %v198_v34 = vadd.f32 %v266_v27, %v189_v31 }
  0xea   :  { %v200_v36 = vmax.f32 %v198_v34, 0.0  ;;  %v203_v37 = vadd.f32 %v201_v32, %v199_v33 }
  0xec   :  { %v205_v38 = vsel %vm51_vm1, %v203_v37, 0.0  ;;  %v204_v39 = vadd.f32 %v202_v35, %v200_v36 }
  0xed   :  { %206 = vadd.xlane.f32.xlu0 %v205_v38 }
  0xee   :  { %v208_v40 = vsel %vm51_vm1, %v204_v39, 0.0 }
  0xf1   :  { %209 = vadd.xlane.f32.xlu0 %v208_v40 }
 0x17a   :  { %v207_v41 = vpop.xlane.xlu0 %206 }
 0x17b   :  { %v212_v42 = vmul.f32 0.03125, %v207_v41 }
 0x17d   :  { %v214_v43 = vsub.f32 %v203_v37, %v212_v42 }
 0x17e   :  { %v210_v44 = vpop.xlane.xlu0 %209 }
 0x17f   :  { %v213_v45 = vmul.f32 0.03125, %v210_v44  ;;  %v216_v46 = vmul.f32 %v214_v43, %v214_v43 }
 0x181   :  { %v215_v47 = vsub.f32 %v204_v39, %v213_v45  ;;  %v218_v48 = vsel %vm51_vm1, %v216_v46, 0.0 }
 0x182   :  { %219 = vadd.xlane.f32.xlu1 %v218_v48 }
 0x183   :  { %v217_v49 = vmul.f32 %v215_v47, %v215_v47 }
 0x185   :  { %v221_v50 = vsel %vm51_vm1, %v217_v49, 0.0 }
 0x186   :  { %222 = vadd.xlane.f32.xlu1 %v221_v50 }
 0x20f   :  { %v220_v51 = vpop.xlane.xlu1 %219 }
 0x210   :  { %v224_v52 = vmul.f32 0.03125, %v220_v51 }
 0x212   :  { %v226_v53 = vadd.f32 1e-05, %v224_v52 }
 0x213   :  { %v223_v54 = vpop.xlane.xlu1 %222 }
 0x214   :  { %300 = vrsqrt.f32 %v226_v53  ;;  %v225_v55 = vmul.f32 0.03125, %v223_v54 }
 0x216   :  { %v227_v56 = vadd.f32 1e-05, %v225_v55 }
 0x218   :  { %302 = vrsqrt.f32 %v227_v56 }
 0x21e   :  { %v301_v57 = vpop.eup %300 }
 0x21f   :  { %v230_v59 = vmul.f32 %v301_v57, %v214_v43 }
 0x221   :  { %v239_v61 = vmul.f32 %v267_v58, %v230_v59 }
 0x222   :  { %v303_v62 = vpop.eup %302 }
 0x223   :  { %v248_v63 = vadd.f32 %v268_v60, %v239_v61  ;;  %v231_v0 = vmul.f32 %v303_v62, %v215_v47 }
 0x225   :  { %v250_v1 = vpack.c.bf16 %v248_v63, %v248_v63  ;;  %v240_v2 = vmul.f32 %v267_v58, %v231_v0 }
 0x227   :  { %253 = vst.msk [vmem:[%s393_s7] sm:$0xf] %vm252_vm2, %v250_v1  ;;  %v249_v3 = vadd.f32 %v268_v60, %v240_v2 }
 0x229   :  { %v251_v4 = vpack.c.bf16 %v249_v3, %v249_v3 }
 0x22b   :  { %254 = vst.msk [vmem:[%s393_s7 + $0x4] sm:$0xf] %vm252_vm2, %v251_v4 }

// kernel: _lambda_.20
= control target key start
LH: loop header
LB: loop body
LE: loop exit
PB: predicated region body
PF: predicated region fallthrough
CT: control target
= control target key end

     0   :  { %v344_v1 = vmov 0.0   ;;  %vm345_vm0 = vmmov 0   ;;  %s435_s0 = inlined_call_operand.vmem [shape: bf16[2,8,32], index: 0, kind: input, shape index: {}]   ;;  %s436_s1 = inlined_call_operand.vmem [shape: bf16[2,32], index: 1, kind: input, shape index: {}]   ;;  %s437_s2 = inlined_call_operand.vmem [shape: bf16[32,32], index: 2, kind: input, shape index: {}]   ;;  %s438_s3 = inlined_call_operand.vmem [shape: bf16[32,32], index: 3, kind: input, shape index: {}]   ;;  %s439_s4 = inlined_call_operand.vmem [shape: f32[1,32], index: 4, kind: input, shape index: {}]   ;;  %s440_s5 = inlined_call_operand.vmem [shape: f32[1,32], index: 5, kind: input, shape index: {}]   ;;  %s441_s6 = inlined_call_operand.vmem [shape: f32[1,32], index: 6, kind: input, shape index: {}]   ;;  %s442_s7 = inlined_call_operand.hbm [shape: bf16[2,8,32], index: 7, kind: output, shape index: {}]  }
   0x1   :  { %v310_v0 = vld [vmem:[%s437_s2] sm:$0xff]   ;;  %296 = vmatprep.subr.bf16.mxu1 %v344_v1  ;;  %288 = vmatprep.subr.bf16.mxu0 %v344_v1  ;;  %v312_v3 = vld [vmem:[%s437_s2 + $0x8] sm:$0xff]  }
   0x2   :  { %v311_v2 = vld [vmem:[%s438_s3] sm:$0xff]   ;;  %297 = vmatpush3.bf16.msra.mxu1 %v310_v0  ;;  %300 = vmatprep.mubr.msk.bf16.mxu1 %vm345_vm0, %v344_v1  ;;  %v313_v4 = vld [vmem:[%s438_s3 + $0x8] sm:$0xff]  }
   0x3   :  { %289 = vmatpush3.bf16.msra.mxu0 %v311_v2  ;;  %298 = vmatprep.subr.bf16.mxu1 %v344_v1  ;;  %v28_v5 = vld [vmem:[%s435_s0] sm:$0xff]  }
   0x4   :  { %290 = vmatprep.subr.bf16.mxu0 %v344_v1  ;;  %292 = vmatprep.mubr.msk.bf16.mxu0 %vm345_vm0, %v344_v1 }
   0x5   :  { %12 = vsyncpa [#allocation3], 0  ;;  %v30_v6 = vld [vmem:[%s436_s1] sm:$0x1]  ;;  %vm52_vm1 = vcmask 261120   ;;  %v160_v9 = vlaneseq  ;;  %v202_v32 = vunpack.c.l.bf16 %v28_v5  ;;  %v203_v35 = vunpack.c.h.bf16 %v28_v5  ;;  %s347_s14 = smov [#allocation2]  }
   0x6   :  { %299 = vmatpush3.bf16.msra.mxu1 %v312_v3  ;;  %v346_v7 = vmov 1966171168   ;;  %v279_v27 = vld [vmem:[%s439_s4] ss:$0 sm:$0xff]  ;;  %vm253_vm2 = vcmask 257024   ;;  %s261_s15 = sshll.u32 %s347_s14, 4  ;;  %s262_s15 = int_to_ptr.vmem [resolvable:$true] %s261_s15 }
   0x7   :  { %291 = vmatpush3.bf16.msra.mxu0 %v313_v4  ;;  %v158_v8 = vunpack.c.l.s4 %v346_v7  ;;  %v161_v11 = vshrl.u32 %v160_v9, 7  ;;  %v280_v58 = vld [vmem:[%s440_s5] ss:$0 sm:$0xff]  ;;  %s320_s5 = scalar_lea.vmem %s262_s15, 128  ;;  %p325_p1 = scmp.lt.s32.totalorder %s262_s15, %s262_s15 }
   0x8   :  { %v281_v60 = vld [vmem:[%s441_s6] ss:$0 sm:$0xff]  ;;  %p321_p0 = scmp.ne.s32.totalorder %s262_s15, %s320_s5  ;;  %p326_p2 = scmp.lt.s32.totalorder %s320_s5, %s320_s5 }
   0x9   :  { %301 = vmatmul.mubr.msk.bf16.vlgmr.msra.gmra.mrb[0].mxu1 %vm52_vm1, %v30_v6  ;;  %v159_v10 = vunpack.c.0.s8 %v158_v8  ;;  %v181_v17 = vsub.s32 0, %v161_v11 }
   0xa   :  { %293 = vmatmul.mubr.msk.bf16.vlgmr.msra.gmra.mrb[0].mxu0 %vm52_vm1, %v28_v5  ;;  %p327_p3 = por %p326_p2, %p325_p1 }
   0xb   :  { %v162_v12 = vsub.s32 %v159_v10, %v161_v11 }
   0xc   :  { %p328_p4 = pnand %p327_p3, %p321_p0 }
  0xdc   :  { %v150_v13 = vpop.f32.mrb[0].mxu1 }
  0xdd   :  { %v163_v14 = vrot.slane %v150_v13, %v162_v12  ;;  %v302_v15 = vpop.f32.mrb[1].mxu1  ;;  %v90_v16 = vpop.f32.mrb[0].mxu0 }
  0xde   :  { %v153_v18 = vpop.f32.mrb[2].mxu1  ;;  %v294_v19 = vpop.f32.mrb[1].mxu0 }
  0xdf   :  { %v164_v20 = vcombine.high %v163_v14, %v163_v14  ;;  %v171_v21 = vrot.slane %v163_v14, %v162_v12  ;;  %v303_v22 = vpop.f32.mrb[3].mxu1  ;;  %v93_v23 = vpop.f32.mrb[2].mxu0 }
  0xe0   :  { %v295_v24 = vpop.f32.mrb[3].mxu0 }
  0xe1   :  { %v182_v25 = vrot.slane %v171_v21, %v181_v17  ;;  %v178_v26 = vrot.slane %v164_v20, %v162_v12 }
  0xe3   :  { %v189_v28 = vadd.f32 %v182_v25, %v90_v16  ;;  %v186_v29 = vrot.slane %v178_v26, %v181_v17 }
  0xe5   :  { %v198_v30 = vadd.f32 %v279_v27, %v189_v28  ;;  %v190_v31 = vadd.f32 %v186_v29, %v93_v23 }
  0xe7   :  { %v200_v33 = vmax.f32 %v198_v30, 0.0  ;;  %v199_v34 = vadd.f32 %v279_v27, %v190_v31 }
  0xe9   :  { %v201_v36 = vmax.f32 %v199_v34, 0.0  ;;  %v204_v37 = vadd.f32 %v202_v32, %v200_v33 }
  0xeb   :  { %v206_v38 = vsel %vm52_vm1, %v204_v37, 0.0  ;;  %v205_v39 = vadd.f32 %v203_v35, %v201_v36 }
  0xec   :  { %207 = vadd.xlane.f32.xlu0 %v206_v38 }
  0xed   :  { %v209_v40 = vsel %vm52_vm1, %v205_v39, 0.0 }
  0xf0   :  { %210 = vadd.xlane.f32.xlu0 %v209_v40 }
 0x179   :  { %v208_v41 = vpop.xlane.xlu0 %207 }
 0x17a   :  { %v213_v42 = vmul.f32 0.03125, %v208_v41 }
 0x17c   :  { %v215_v43 = vsub.f32 %v204_v37, %v213_v42 }
 0x17d   :  { %v211_v44 = vpop.xlane.xlu0 %210 }
 0x17e   :  { %v214_v45 = vmul.f32 0.03125, %v211_v44  ;;  %v217_v46 = vmul.f32 %v215_v43, %v215_v43 }
 0x180   :  { %v216_v47 = vsub.f32 %v205_v39, %v214_v45  ;;  %v219_v48 = vsel %vm52_vm1, %v217_v46, 0.0 }
 0x181   :  { %220 = vadd.xlane.f32.xlu1 %v219_v48 }
 0x182   :  { %v218_v49 = vmul.f32 %v216_v47, %v216_v47 }
 0x184   :  { %v222_v50 = vsel %vm52_vm1, %v218_v49, 0.0 }
 0x185   :  { %223 = vadd.xlane.f32.xlu1 %v222_v50 }
 0x20e   :  { %v221_v51 = vpop.xlane.xlu1 %220 }
 0x20f   :  { %v225_v52 = vmul.f32 0.03125, %v221_v51 }
 0x211   :  { %v227_v53 = vadd.f32 1e-05, %v225_v52 }
 0x212   :  { %v224_v54 = vpop.xlane.xlu1 %223 }
 0x213   :  { %316 = vrsqrt.f32 %v227_v53  ;;  %v226_v55 = vmul.f32 0.03125, %v224_v54 }
 0x215   :  { %v228_v56 = vadd.f32 1e-05, %v226_v55 }
 0x217   :  { %318 = vrsqrt.f32 %v228_v56 }
 0x21d   :  { %v317_v57 = vpop.eup %316 }
 0x21e   :  { %v231_v59 = vmul.f32 %v317_v57, %v215_v43 }
 0x220   :  { %v240_v61 = vmul.f32 %v280_v58, %v231_v59 }
 0x221   :  { %v319_v62 = vpop.eup %318 }
 0x222   :  { %v232_v63 = vmul.f32 %v319_v62, %v216_v47  ;;  %v249_v0 = vadd.f32 %v281_v60, %v240_v61 }
 0x224   :  { %v241_v1 = vmul.f32 %v280_v58, %v232_v63  ;;  %v251_v2 = vpack.c.bf16 %v249_v0, %v249_v0 }
 0x226   :  { %v250_v3 = vadd.f32 %v281_v60, %v241_v1  ;;  %254 = vst.msk [vmem:[#allocation2] sm:$0xf] %vm253_vm2, %v251_v2 }
 0x228   :  { %v252_v4 = vpack.c.bf16 %v250_v3, %v250_v3 }
 0x22a   :  { %255 = vst.msk [vmem:[#allocation2 + $0x4] sm:$0xf] %vm253_vm2, %v252_v4 }
 0x22b   :  { %331 = shalt.err (!%p328_p4)
}
 0x22c   :  { %s332_s17 = scalar_lea.hbm %s442_s7, 128 }
 0x22d   :  { %p333_p5 = scmp.ne.s32.totalorder %s442_s7, %s332_s17  ;;  %p336_p6 = scmp.lt.u32.totalorder %s332_s17, %s442_s7 }
 0x22f   :  { %p338_p7 = pnand %p336_p6, %p333_p5 }
 0x231   :  { %341 = shalt.err (!%p338_p7)
}
 0x232   :  { %s348_s22 = smov 64   ;;  %s349_s23 = smov 4  }
 0x233   :  { %267 = dma.vmem_to_hbm [thread:$0]  %s262_s15, 128, %s442_s7, [#allocation3], %s348_s22, %s348_s22, %s349_s23  }
 0x234   :  { %342 = dma.done.wait [#allocation3], 128  }
 0x235   :  { %343 = vsyncadd [#allocation3], 4294967168 }
 0x236   :  { %271 = vsyncpa [#allocation3], 1 }

// kernel: _lambda_.15
= control target key start
LH: loop header
LB: loop body
LE: loop exit
PB: predicated region body
PF: predicated region fallthrough
CT: control target
= control target key end

     0   :  { %v49_v0 = vlaneseq  ;;  %v697_v1 = vmov 0.0   ;;  %vm698_vm0 = vmmov 0   ;;  %v699_v4 = vmov 0   ;;  %s890_s3 = inlined_call_operand.vmem [shape: bf16[32,64], index: 3, kind: input, shape index: {}]   ;;  %s891_s0 = inlined_call_operand.vmem [shape: bf16[2,64], index: 0, kind: input, shape index: {}]   ;;  %s892_s2 = inlined_call_operand.vmem [shape: f32[2,8,1], index: 2, kind: input, shape index: {}]   ;;  %s893_s5 = inlined_call_operand.vmem [shape: bf16[64,4], index: 5, kind: input, shape index: {}]   ;;  %s894_s1 = inlined_call_operand.vmem [shape: bf16[2,8,64], index: 1, kind: input, shape index: {}]   ;;  %s895_s7 = inlined_call_operand.vmem [shape: bf16[64,32], index: 7, kind: input, shape index: {}]   ;;  %s896_s4 = inlined_call_operand.vmem [shape: f32[1,64], index: 4, kind: input, shape index: {}]   ;;  %s897_s9 = inlined_call_operand.vmem [shape: bf16[4,32], index: 9, kind: input, shape index: {}]   ;;  %s898_s6 = inlined_call_operand.vmem [shape: f32[1,4], index: 6, kind: input, shape index: {}]   ;;  %s899_s8 = inlined_call_operand.vmem [shape: f32[1,32], index: 8, kind: input, shape index: {}]   ;;  %s900_s10 = inlined_call_operand.vmem [shape: bf16[2,32], index: 10, kind: output, shape index: {}]  }
   0x1   :  { %624 = vmatprep.subr.bf16.mxu0 %v697_v1  ;;  %v671_v2 = vld [vmem:[%s890_s3] sm:$0xff]   ;;  %628 = vmatprep.mubr.msk.bf16.mxu0 %vm698_vm0, %v697_v1  ;;  %v672_v5 = vld [vmem:[%s890_s3 + $0x8] sm:$0xff]   ;;  %vm148_vm1 = vcmask 7168   ;;  %vm101_vm4 = vcmask 261120   ;;  %v675_v44 = vld [vmem:[%s893_s5 + $0x10] sm:$0xff]   ;;  %vm177_vm5 = vcmask 523264  }
   0x2   :  { %v765_v3 = vshrl.u32 %v49_v0, 7  ;;  %669 = vset.pattern.permute.xlu0 %v699_v4  ;;  %670 = vset.pattern.permute.xlu1 %v699_v4  ;;  %v773_v6 = vld [vmem:[%s891_s0] sm:$0x1]  ;;  %v43_v11 = vld [vmem:[%s892_s2 + $0x8] sm:$0xff]  ;;  %v805_v30 = vld [vmem:[%s894_s1 + $0x4] sm:$0xf] }
   0x3   :  { %625 = vmatpush3.bf16.msra.mxu0 %v671_v2  ;;  %632 = vmatprep.subr.bf16.mxu1 %v697_v1  ;;  %v46_v7 = vunpack.i.h.s16 %v773_v6  ;;  %v589_v8 = vpack.i.b16 %v773_v6, %v773_v6  ;;  %v42_v10 = vld [vmem:[%s892_s2] sm:$0xff]  ;;  %v156_v13 = vsel %vm148_vm1, %v43_v11, 0.0  ;;  %vm293_vm3 = vcmp.gt.f32.partialorder %v43_v11, 0.0  ;;  %v674_v24 = vld [vmem:[%s893_s5 + $0x8] sm:$0xff]   ;;  %v676_v45 = vld [vmem:[%s893_s5 + $0x18] sm:$0xff]  }
   0x4   :  { %626 = vmatprep.subr.bf16.mxu0 %v697_v1  ;;  %v51_v9 = vsub.s32 0, %v765_v3  ;;  %640 = vmatprep.mubr.msk.bf16.mxu1 %vm698_vm0, %v697_v1  ;;  %vm292_vm2 = vcmp.gt.f32.partialorder %v42_v10, 0.0  ;;  %v149_v12 = vsel %vm148_vm1, %v42_v10, 0.0  ;;  %v673_v18 = vld [vmem:[%s893_s5] sm:$0xff]   ;;  %v157_v19 = vrot.slane %v156_v13, 4  ;;  %v678_v47 = vld [vmem:[%s895_s7 + $0x8] sm:$0xff]  }
   0x5   :  { %167 = vperm.xlu1 %670, %v42_v10   ;;  %v48_v14 = vpack.i.b16 %v46_v7, %v46_v7  ;;  %v294_v16 = vsel %vm292_vm2, 1, %v699_v4  ;;  %v150_v17 = vrot.slane %v149_v12, 4  ;;  %v295_v23 = vsel %vm293_vm3, 1, %v699_v4  ;;  %633 = vmatpush3.bf16.msra.mxu1 %v673_v18  ;;  %v799_v25 = vld [vmem:[%s894_s1] sm:$0xf]  ;;  %v679_v48 = vld [vmem:[%s895_s7 + $0x10] sm:$0xff]  }
   0x6   :  { %v52_v15 = vrot.slane %v589_v8, %v51_v9  ;;  %297 = vperm.xlu0 %669, %v294_v16   ;;  %v158_v26 = vadd.f32 %v157_v19, %v156_v13  ;;  %634 = vmatprep.subr.bf16.mxu1 %v697_v1  ;;  %v677_v46 = vld [vmem:[%s895_s7] sm:$0xff]   ;;  %v680_v49 = vld [vmem:[%s895_s7 + $0x18] sm:$0xff]   ;;  %vm370_vm6 = vcmask 1041409   ;;  %vm451_vm7 = vcmask 1041408  }
   0x7   :  { %627 = vmatpush3.bf16.msra.mxu0 %v672_v5  ;;  %v56_v20 = vrot.slane %v48_v14, %v51_v9  ;;  %v151_v22 = vadd.f32 %v150_v17, %v149_v12  ;;  %v590_v52 = vld [vmem:[%s896_s4] ss:$0 sm:$0xff]  ;;  %s700_s4 = smov 96   ;;  %vm306_vm8 = vcmask 31744   ;;  %vm554_vm11 = vcmask 1043459  }
   0x8   :  { %v58_v21 = vpack.i.b16 %v52_v15, %v52_v15  ;;  %644 = vmatprep.subr.bf16.mxu0 %v697_v1  ;;  %v159_v31 = vrot.slane %v158_v26, 2  ;;  %vm556_vm12 = vcmask 1045509   ;;  %vm558_vm13 = vcmask 1047559  }
   0x9   :  { %172 = vperm.xlu1 %670, %v43_v11   ;;  %v65_v28 = vpack.i.b16 %v56_v20, %v56_v20  ;;  %v152_v29 = vrot.slane %v151_v22, 2  ;;  %635 = vmatpush3.bf16.msra.mxu1 %v674_v24  ;;  %vm583_vm14 = vcmask 253952  }
   0xa   :  { %v63_v27 = vrot.slane %v58_v21, %v51_v9  ;;  %300 = vperm.xlu0 %669, %v295_v23   ;;  %v160_v35 = vadd.f32 %v159_v31, %v158_v26  ;;  %636 = vmatprep.subr.bf16.mxu1 %v697_v1 }
   0xb   :  { %v70_v32 = vrot.slane %v65_v28, %v51_v9  ;;  %v153_v34 = vadd.f32 %v152_v29, %v151_v22 }
   0xc   :  { %v71_v33 = vmul.bf16 %v63_v27, %v799_v25  ;;  %v161_v38 = vrot.slane %v160_v35, 1 }
   0xd   :  { %v72_v36 = vmul.bf16 %v70_v32, %v805_v30  ;;  %v154_v37 = vrot.slane %v153_v34, 1  ;;  %637 = vmatpush3.bf16.msra.mxu1 %v675_v44  ;;  %v41_v32 = vunpack.c.l.bf16 %v805_v30 }
   0xe   :  { %v162_v41 = vadd.f32 %v161_v38, %v160_v35  ;;  %638 = vmatprep.subr.bf16.mxu1 %v697_v1  ;;  %v40_v35 = vunpack.c.l.bf16 %v799_v25 }
   0xf   :  { %v591_v39 = vcombine.low %v71_v33, %v72_v36  ;;  %v155_v40 = vadd.f32 %v154_v37, %v153_v34  ;;  %v447_v33 = vld [vmem:[%s897_s9] sm:$0x3] }
  0x10   :  { %v164_v43 = vmax.f32 %v162_v41, 1e-06  ;;  %v453_v34 = vsel %vm451_vm7, %v447_v33, 0  ;;  %v600_v36 = vld [vmem:[%s898_s6] ss:$0 sm:$0xff] }
  0x11   :  { %629 = vmatmul.mubr.msk.bf16.vlgmr.msra.gmra.mrb[0].mxu0 %vm101_vm4, %v591_v39  ;;  %v163_v42 = vmax.f32 %v155_v40, 1e-06  ;;  %639 = vmatpush3.bf16.msra.mxu1 %v676_v45 }
  0x12   :  { %652 = vmatprep.mubr.msk.bf16.mxu0 %vm698_vm0, %v697_v1  ;;  %199 = vperm.xlu1 %670, %v164_v43  }
  0x13   :  { %194 = vperm.xlu0 %669, %v163_v42   ;;  %656 = vmatprep.subr.bf16.mxu1 %v697_v1 }
  0x14   :  { %645 = vmatpush3.bf16.msra.mxu0 %v677_v46 }
  0x15   :  { %646 = vmatprep.subr.bf16.mxu0 %v697_v1 }
  0x16   :  { %498 = vrot.lane.b32.xlu1 %v40_v35, %s700_s4 }
  0x17   :  { %500 = vrot.lane.b32.xlu0 %v41_v32, %s700_s4 }
  0x18   :  { %647 = vmatpush3.bf16.msra.mxu0 %v678_v47 }
  0x19   :  { %648 = vmatprep.subr.bf16.mxu0 %v697_v1 }
  0x1c   :  { %649 = vmatpush3.bf16.msra.mxu0 %v679_v48 }
  0x1d   :  { %650 = vmatprep.subr.bf16.mxu0 %v697_v1 }
  0x20   :  { %651 = vmatpush3.bf16.msra.mxu0 %v680_v49 }
  0x84   :  { %v838_v51 = vpop.permute.xlu1 %167 }
  0x85   :  { %v836_v50 = vpop.permute.xlu0 %297 }
  0x86   :  { %vm302_vm9 = vcmp.eq.s32.totalorder %v836_v50, 1 }
  0x88   :  { %v845_v55 = vpop.permute.xlu1 %172 }
  0x89   :  { %v843_v53 = vpop.permute.xlu0 %300 }
  0x8a   :  { %vm303_vm10 = vcmp.eq.s32.totalorder %v843_v53, 1 }
  0x91   :  { %v200_v2 = vpop.permute.xlu1 %199 }
  0x92   :  { %v195_v62 = vpop.permute.xlu0 %194 }
  0x93   :  { %681 = vrcp.f32 %v195_v62  ;;  %v601_v62 = vld [vmem:[%s899_s8] ss:$0 sm:$0xff]  ;;  %s702_s8 = smov 32  }
  0x94   :  { %683 = vrcp.f32 %v200_v2 }
  0x9d   :  { %v682_v18 = vpop.eup %681 }
  0x9e   :  { %v684_v21 = vpop.eup %683 }
  0xe4   :  { %v139_v54 = vpop.f32.mrb[0].mxu0 }
  0xe5   :  { %v140_v56 = vadd.f32 %v590_v52, %v139_v54  ;;  %v630_v57 = vpop.f32.mrb[1].mxu0 }
  0xe6   :  { %v142_v58 = vpop.f32.mrb[2].mxu0 }
  0xe7   :  { %v146_v59 = vmax.f32 %v140_v56, 0.0  ;;  %v143_v60 = vadd.f32 %v590_v52, %v142_v58  ;;  %v631_v61 = vpop.f32.mrb[3].mxu0 }
  0xe9   :  { %v175_v63 = vmul.f32 %v838_v51, %v146_v59  ;;  %v147_v0 = vmax.f32 %v143_v60, 0.0 }
  0xeb   :  { %v206_v4 = vpack.c.bf16 %v147_v0, %v146_v59  ;;  %v176_v5 = vmul.f32 %v845_v55, %v147_v0  ;;  %v178_v7 = vsel %vm177_vm5, %v175_v63, 0.0 }
  0xec   :  { %v179_v8 = vrot.slane %v178_v7, 4 }
  0xed   :  { %v185_v9 = vsel %vm177_vm5, %v176_v5, 0.0  ;;  %641 = vmatmul.mubr.msk.bf16.vlgmr.msra.gmra.mrb[0].mxu1 %vm177_vm5, %v206_v4 }
  0xee   :  { %v180_v10 = vadd.f32 %v179_v8, %v178_v7  ;;  %v186_v11 = vrot.slane %v185_v9, 4  ;;  %658 = vmatprep.mubr.msk.bf16.mxu1 %vm698_vm0, %v697_v1  ;;  %657 = vmatpush3.bf16.msra.mxu1 %v453_v34 }
  0xf0   :  { %v181_v12 = vrot.slane %v180_v10, 2  ;;  %v187_v13 = vadd.f32 %v186_v11, %v185_v9 }
  0xf2   :  { %v182_v14 = vadd.f32 %v181_v12, %v180_v10  ;;  %v188_v15 = vrot.slane %v187_v13, 2 }
  0xf4   :  { %v183_v16 = vrot.slane %v182_v14, 1  ;;  %v189_v17 = vadd.f32 %v188_v15, %v187_v13 }
  0xf6   :  { %v184_v19 = vadd.f32 %v183_v16, %v182_v14  ;;  %v190_v20 = vrot.slane %v189_v17, 1 }
  0xf8   :  { %v191_v22 = vadd.f32 %v190_v20, %v189_v17  ;;  %v203_v23 = vmul.f32 %v682_v18, %v184_v19 }
  0xfa   :  { %v349_v24 = vpack.c.bf16 %v203_v23, %v203_v23  ;;  %v205_v26 = vmul.f32 %v684_v21, %v191_v22  ;;  %v701_v22 = vmov 1983009808  }
  0xfb   :  { %v522_v23 = vunpack.c.l.s4 %v701_v22 }
  0xfc   :  { %v350_v27 = vpack.c.bf16 %v205_v26, %v205_v26  ;;  %v368_v28 = vunpack.c.l.b16 %v349_v24 }
  0xfe   :  { %v369_v29 = vunpack.c.l.b16 %v350_v27 }
 0x100   :  { %v371_v1 = vsel %vm370_vm6, %v369_v29, %v368_v28  ;;  %v523_v28 = vunpack.c.0.s8 %v522_v23 }
 0x101   :  { %v372_v31 = vpack.c.b16 %v371_v1, %v371_v1 }
 0x102   :  { %v526_v32 = vsub.s32 %v523_v28, %v765_v3 }
 0x103   :  { %653 = vmatmul.mubr.msk.bf16.vlgmr.msra.gmra.mrb[4].mxu0 %vm177_vm5, %v372_v31 }
 0x1c0   :  { %v276_v37 = vpop.f32.mrb[0].mxu1 }
 0x1c1   :  { %v290_v30 = vadd.f32 %v600_v36, %v276_v37  ;;  %v642_v38 = vpop.f32.mrb[1].mxu1 }
 0x1c2   :  { %v279_v39 = vpop.f32.mrb[2].mxu1 }
 0x1c3   :  { %v304_v40 = vsel %vm302_vm9, %v290_v30, -1e+09  ;;  %v291_v41 = vadd.f32 %v600_v36, %v279_v39  ;;  %v643_v42 = vpop.f32.mrb[3].mxu1 }
 0x1c4   :  { %v307_v25 = vsel %vm306_vm8, %v304_v40, -inf }
 0x1c5   :  { %v308_v43 = vrot.slane %v307_v25, 4  ;;  %v305_v44 = vsel %vm303_vm10, %v291_v41, -1e+09 }
 0x1c6   :  { %v314_v45 = vsel %vm306_vm8, %v305_v44, -inf }
 0x1c7   :  { %v309_v46 = vmax.f32 %v307_v25, %v308_v43  ;;  %v315_v47 = vrot.slane %v314_v45, 4  ;;  %v501_v43 = vpop.permute.xlu0 %500 }
 0x1c9   :  { %v310_v48 = vrot.slane %v309_v46, 2  ;;  %v316_v49 = vmax.f32 %v314_v45, %v315_v47 }
 0x1cb   :  { %v311_v52 = vmax.f32 %v309_v46, %v310_v48  ;;  %v317_v54 = vrot.slane %v316_v49, 2 }
 0x1cd   :  { %v312_v56 = vrot.slane %v311_v52, 1  ;;  %v318_v50 = vmax.f32 %v316_v49, %v317_v54 }
 0x1cf   :  { %v313_v57 = vmax.f32 %v311_v52, %v312_v56  ;;  %v319_v58 = vrot.slane %v318_v50, 1 }
 0x1d1   :  { %v321_v59 = vsub.f32 %v304_v40, %v313_v57  ;;  %v320_v60 = vmax.f32 %v318_v50, %v319_v58  ;;  %v499_v40 = vpop.permute.xlu1 %498 }
 0x1d3   :  { %v323_v61 = vmul.f32 1.442695, %v321_v59  ;;  %v322_v53 = vsub.f32 %v305_v44, %v320_v60 }
 0x1d5   :  { %685 = vpow2.f32 %v323_v61  ;;  %v325_v63 = vmul.f32 1.442695, %v322_v53 }
 0x1d6   :  { %v434_v0 = vpop.f32.mrb[4].mxu0 }
 0x1d7   :  { %687 = vpow2.f32 %v325_v63  ;;  %v435_v2 = vadd.f32 %v601_v62, %v434_v0  ;;  %v654_v4 = vpop.f32.mrb[5].mxu0 }
 0x1d8   :  { %v437_v5 = vpop.f32.mrb[6].mxu0 }
 0x1d9   :  { %v607_v7 = vmul.f32 -1.442695, %v435_v2  ;;  %v655_v8 = vpop.f32.mrb[7].mxu0 }
 0x1db   :  { %689 = vpow2.f32 %v607_v7 }
 0x1df   :  { %v686_v9 = vpop.eup %685 }
 0x1e0   :  { %v327_v10 = vmul.f32 %v686_v9, %v838_v51  ;;  %v703_v9 = vmov 1966171168  }
 0x1e1   :  { %v688_v11 = vpop.eup %687 }
 0x1e2   :  { %v329_v12 = vsel %vm306_vm8, %v327_v10, 0.0  ;;  %v328_v13 = vmul.f32 %v688_v11, %v845_v55  ;;  %v39_v11 = vunpack.c.l.bf16 %v773_v6 }
 0x1e3   :  { %v330_v14 = vrot.slane %v329_v12, 4 }
 0x1e4   :  { %v336_v15 = vsel %vm306_vm8, %v328_v13, 0.0 }
 0x1e5   :  { %v690_v16 = vpop.eup %689  ;;  %v331_v17 = vadd.f32 %v330_v14, %v329_v12  ;;  %v337_v18 = vrot.slane %v336_v15, 4 }
 0x1e6   :  { %v443_v19 = vadd.f32 1.0, %v690_v16 }
 0x1e7   :  { %v332_v20 = vrot.slane %v331_v17, 2  ;;  %v338_v21 = vadd.f32 %v337_v18, %v336_v15 }
 0x1e8   :  { %691 = vrcp.f32 %v443_v19 }
 0x1e9   :  { %v333_v24 = vadd.f32 %v332_v20, %v331_v17  ;;  %v339_v26 = vrot.slane %v338_v21, 2 }
 0x1eb   :  { %v334_v51 = vrot.slane %v333_v24, 1  ;;  %v340_v27 = vadd.f32 %v339_v26, %v338_v21 }
 0x1ed   :  { %v335_v29 = vadd.f32 %v334_v51, %v333_v24  ;;  %v341_v1 = vrot.slane %v340_v27, 1 }
 0x1ef   :  { %v343_v55 = vmax.f32 %v335_v29, 1e-09  ;;  %v342_v31 = vadd.f32 %v341_v1, %v340_v27 }
 0x1f1   :  { %693 = vrcp.f32 %v343_v55  ;;  %v344_v33 = vmax.f32 %v342_v31, 1e-09 }
 0x1f2   :  { %v692_v34 = vpop.eup %691 }
 0x1f3   :  { %695 = vrcp.f32 %v344_v33  ;;  %v527_v35 = vrot.slane %v692_v34, %v526_v32 }
 0x1f5   :  { %528 = vrot.lane.b32.xlu0 %v527_v35, %s702_s8 }
 0x1fb   :  { %v694_v36 = vpop.eup %693 }
 0x1fc   :  { %v346_v30 = vmul.f32 %v694_v36, %v327_v10  ;;  %v567_v10 = vunpack.c.l.s4 %v703_v9 }
 0x1fd   :  { %v696_v37 = vpop.eup %695 }
 0x1fe   :  { %v348_v38 = vmul.f32 %v696_v37, %v328_v13  ;;  %v568_v13 = vunpack.c.0.s8 %v567_v10 }
 0x200   :  { %v446_v39 = vpack.c.bf16 %v348_v38, %v346_v30  ;;  %v571_v16 = vsub.s32 %v568_v13, %v765_v3 }
 0x202   :  { %659 = vmatmul.mubr.msk.bf16.vlgmr.msra.gmra.mrb[4].mxu1 %vm306_vm8, %v446_v39 }
 0x267   :  { %v529_v12 = vpop.permute.xlu0 %528 }
 0x268   :  { %v531_v14 = vmul.f32 %v529_v12, %v39_v11 }
 0x2d5   :  { %v489_v41 = vpop.f32.mrb[4].mxu1 }
 0x2d6   :  { %v504_v42 = vmul.f32 %v499_v40, %v489_v41  ;;  %v660_v25 = vpop.f32.mrb[5].mxu1 }
 0x2d7   :  { %v492_v44 = vpop.f32.mrb[6].mxu1 }
 0x2d8   :  { %v506_v45 = vsel %vm101_vm4, %v504_v42, 0.0  ;;  %v505_v46 = vmul.f32 %v501_v43, %v492_v44  ;;  %v661_v47 = vpop.f32.mrb[7].mxu1 }
 0x2d9   :  { %v507_v48 = vrot.slane %v506_v45, 4 }
 0x2da   :  { %v513_v49 = vsel %vm101_vm4, %v505_v46, 0.0 }
 0x2db   :  { %v508_v52 = vadd.f32 %v507_v48, %v506_v45  ;;  %v514_v54 = vrot.slane %v513_v49, 4 }
 0x2dd   :  { %v509_v56 = vrot.slane %v508_v52, 2  ;;  %v515_v50 = vadd.f32 %v514_v54, %v513_v49 }
 0x2df   :  { %v510_v57 = vadd.f32 %v509_v56, %v508_v52  ;;  %v516_v58 = vrot.slane %v515_v50, 2 }
 0x2e1   :  { %v511_v59 = vrot.slane %v510_v57, 1  ;;  %v517_v60 = vadd.f32 %v516_v58, %v515_v50 }
 0x2e3   :  { %v518_v61 = vrot.slane %v517_v60, 1  ;;  %v512_v53 = vadd.f32 %v511_v59, %v510_v57 }
 0x2e5   :  { %v519_v62 = vadd.f32 %v518_v61, %v517_v60  ;;  %v540_v0 = vrot.slane %v512_v53, %v526_v32 }
 0x2e7   :  { %v547_v63 = vrot.slane %v519_v62, %v526_v32 }
 0x2e9   :  { %v552_v2 = vrot.slane %v547_v63, 7 }
 0x2eb   :  { %v553_v4 = vsel %vm370_vm6, %v552_v2, %v540_v0 }
 0x2ec   :  { %v555_v5 = vsel %vm554_vm11, %v552_v2, %v553_v4 }
 0x2ed   :  { %v557_v7 = vsel %vm556_vm12, %v552_v2, %v555_v5 }
 0x2ee   :  { %v559_v8 = vsel %vm558_vm13, %v552_v2, %v557_v7 }
 0x2ef   :  { %560 = vrot.lane.b32.xlu1 %v559_v8, %s702_s8 }
 0x361   :  { %v561_v15 = vpop.permute.xlu1 %560 }
 0x362   :  { %v563_v17 = vmul.f32 %v561_v15, %v531_v14 }
 0x364   :  { %v564_v18 = vpack.c.bf16 %v563_v17, %v563_v17 }
 0x366   :  { %v572_v19 = vrot.slane %v564_v18, %v571_v16 }
 0x368   :  { %v579_v20 = vrot.slane %v572_v19, %v571_v16 }
 0x36a   :  { %580 = vrot.lane.b32.xlu0 %v579_v20, %s700_s4 }
 0x3dc   :  { %v581_v21 = vpop.permute.xlu0 %580 }
 0x3dd   :  { %584 = vst.msk [vmem:[%s900_s10] sm:$0x1] %vm583_vm14, %v581_v21 }

// kernel: _lambda_.21
= control target key start
LH: loop header
LB: loop body
LE: loop exit
PB: predicated region body
PF: predicated region fallthrough
CT: control target
= control target key end

     0   :  { %v238_v1 = vmov 0.0   ;;  %vm239_vm0 = vmmov 0   ;;  %s313_s0 = inlined_call_operand.vmem [shape: bf16[2,96], index: 0, kind: input, shape index: {}]   ;;  %s314_s1 = inlined_call_operand.vmem [shape: bf16[96,32], index: 1, kind: input, shape index: {}]   ;;  %s315_s2 = inlined_call_operand.vmem [shape: f32[1,32], index: 2, kind: input, shape index: {}]   ;;  %s316_s3 = inlined_call_operand.vmem [shape: f32[1,32], index: 3, kind: input, shape index: {}]   ;;  %s317_s4 = inlined_call_operand.vmem [shape: f32[1,32], index: 4, kind: input, shape index: {}]   ;;  %s318_s5 = inlined_call_operand.hbm [shape: bf16[2,32], index: 5, kind: output, shape index: {}]  }
   0x1   :  { %v206_v0 = vld [vmem:[%s314_s1] sm:$0xff]   ;;  %187 = vmatprep.subr.bf16.mxu0 %v238_v1  ;;  %v207_v2 = vld [vmem:[%s314_s1 + $0x8] sm:$0xff]   ;;  %199 = vmatprep.mubr.msk.bf16.mxu0 %vm239_vm0, %v238_v1  ;;  %v208_v3 = vld [vmem:[%s314_s1 + $0x10] sm:$0xff]  }
   0x2   :  { %188 = vmatpush3.bf16.msra.mxu0 %v206_v0 }
   0x3   :  { %189 = vmatprep.subr.bf16.mxu0 %v238_v1 }
   0x6   :  { %190 = vmatpush3.bf16.msra.mxu0 %v207_v2 }
   0x7   :  { %10 = vsyncpa [#allocation3], 0  ;;  %191 = vmatprep.subr.bf16.mxu0 %v238_v1  ;;  %v209_v4 = vld [vmem:[%s314_s1 + $0x18] sm:$0xff]   ;;  %v210_v5 = vld [vmem:[%s314_s1 + $0x20] sm:$0xff]   ;;  %vm78_vm1 = vcmask 785408   ;;  %vm122_vm2 = vcmask 254976  }
   0x8   :  { %v211_v6 = vld [vmem:[%s314_s1 + $0x28] sm:$0xff]   ;;  %v22_v7 = vld [vmem:[%s313_s0] sm:$0x1]  ;;  %s240_s10 = smov [#allocation2]   ;;  %vm154_vm3 = vcmask 253952  }
   0x9   :  { %v170_v8 = vld [vmem:[%s315_s2] ss:$0 sm:$0xff]  ;;  %s162_s11 = sshll.u32 %s240_s10, 4  ;;  %s163_s11 = int_to_ptr.vmem [resolvable:$true] %s162_s11 }
   0xa   :  { %192 = vmatpush3.bf16.msra.mxu0 %v208_v3  ;;  %v178_v24 = vld [vmem:[%s316_s3] ss:$0 sm:$0xff]  ;;  %s214_s12 = scalar_lea.vmem %s163_s11, 16  ;;  %s218_s13 = scalar_lea.vmem %s163_s11, 32 }
   0xb   :  { %193 = vmatprep.subr.bf16.mxu0 %v238_v1  ;;  %v179_v26 = vld [vmem:[%s317_s4] ss:$0 sm:$0xff]  ;;  %p215_p0 = scmp.ne.s32.totalorder %s163_s11, %s214_s12  ;;  %p219_p1 = scmp.lt.s32.totalorder %s163_s11, %s163_s11 }
   0xc   :  { %p220_p2 = scmp.lt.s32.totalorder %s218_s13, %s214_s12 }
   0xe   :  { %194 = vmatpush3.bf16.msra.mxu0 %v209_v4  ;;  %p221_p3 = por %p220_p2, %p219_p1 }
   0xf   :  { %195 = vmatprep.subr.bf16.mxu0 %v238_v1 }
  0x10   :  { %p222_p4 = pnand %p221_p3, %p215_p0 }
  0x12   :  { %196 = vmatpush3.bf16.msra.mxu0 %v210_v5 }
  0x13   :  { %197 = vmatprep.subr.bf16.mxu0 %v238_v1 }
  0x16   :  { %198 = vmatpush3.bf16.msra.mxu0 %v211_v6 }
  0x19   :  { %200 = vmatmul.mubr.msk.bf16.vlgmr.msra.gmra.mrb[0].mxu0 %vm78_vm1, %v22_v7 }
  0xec   :  { %v116_v9 = vpop.f32.mrb[0].mxu0 }
  0xed   :  { %v117_v10 = vadd.f32 %v170_v8, %v116_v9  ;;  %v201_v11 = vpop.f32.mrb[1].mxu0 }
  0xee   :  { %v119_v12 = vpop.f32.mrb[2].mxu0 }
  0xef   :  { %v202_v13 = vpop.f32.mrb[3].mxu0  ;;  %v123_v14 = vsel %vm122_vm2, %v117_v10, 0.0 }
  0xf0   :  { %124 = vadd.xlane.f32.xlu0 %v123_v14 }
 0x17d   :  { %v125_v15 = vpop.xlane.xlu0 %124 }
 0x17e   :  { %v127_v16 = vmul.f32 0.03125, %v125_v15 }
 0x180   :  { %v128_v17 = vsub.f32 %v117_v10, %v127_v16 }
 0x182   :  { %v129_v18 = vmul.f32 %v128_v17, %v128_v17 }
 0x184   :  { %v130_v19 = vsel %vm122_vm2, %v129_v18, 0.0 }
 0x185   :  { %131 = vadd.xlane.f32.xlu0 %v130_v19 }
 0x212   :  { %v132_v20 = vpop.xlane.xlu0 %131 }
 0x213   :  { %v133_v21 = vmul.f32 0.03125, %v132_v20 }
 0x215   :  { %v134_v22 = vadd.f32 1e-05, %v133_v21 }
 0x217   :  { %212 = vrsqrt.f32 %v134_v22 }
 0x221   :  { %v213_v23 = vpop.eup %212 }
 0x222   :  { %v136_v25 = vmul.f32 %v213_v23, %v128_v17 }
 0x224   :  { %v144_v27 = vmul.f32 %v178_v24, %v136_v25 }
 0x226   :  { %v152_v28 = vadd.f32 %v179_v26, %v144_v27 }
 0x228   :  { %v153_v29 = vpack.c.bf16 %v152_v28, %v152_v28 }
 0x22a   :  { %155 = vst.msk [vmem:[#allocation2] sm:$0x1] %vm154_vm3, %v153_v29 }
 0x22b   :  { %225 = shalt.err (!%p222_p4)
}
 0x22c   :  { %s226_s4 = scalar_lea.hbm %s318_s5, 16 }
 0x22d   :  { %p227_p5 = scmp.ne.s32.totalorder %s318_s5, %s226_s4  ;;  %p230_p6 = scmp.lt.u32.totalorder %s226_s4, %s318_s5 }
 0x22f   :  { %p232_p7 = pnand %p230_p6, %p227_p5 }
 0x231   :  { %235 = shalt.err (!%p232_p7)
}
 0x232   :  { %165 = dma.vmem_to_hbm [thread:$0]  %s163_s11, 16, %s318_s5, [#allocation3]  }
 0x233   :  { %236 = dma.done.wait [#allocation3], 16  }
 0x234   :  { %237 = vsyncadd [#allocation3], 4294967280 }
 0x235   :  { %169 = vsyncpa [#allocation3], 1 }

</bundles_post_ra>
